<compile_context>
chip_gen: v7x
topology: tpu7x:2x2x1
jax: 0.10.0
libtpu: 0.0.40
codegen_flags: <defaults>
</compile_context>

<pallas_src>
import functools
import math

import jax
import jax.numpy as jnp
import numpy as np
from jax.experimental import pallas as pl
from jax.experimental.pallas import tpu as pltpu

_BN_EPS = 1e-5


def _round_up(x, m):
    return (x + m - 1) // m * m


def _vmem_limit_bytes():
    """~3/4 of physical VMEM, capped at 100 MiB (96 MiB on v5e/v6e, 48 MiB on v7x)."""
    try:
        cap = int(pltpu.get_tpu_info().vmem_capacity_bytes)
    except Exception:
        cap = 64 * 1024 * 1024  # conservative fallback (v7x-sized)
    return min(cap * 3 // 4, 100 * 1024 * 1024)


def _pick_m_tile(M, W, max_m_tile):
    """Largest multiple of W (and of 8) that divides M and is <= max_m_tile."""
    best = M
    t = W
    while t <= min(M, max_m_tile):
        if M % t == 0 and t % 8 == 0:
            best = t
        t += W
    return best


# --------------------------------------------------------------------------------------
# Pass 1: im2col conv matmul + one-pass BN moment accumulation.
# --------------------------------------------------------------------------------------
def conv_im2col_kernel(x9_ref, w_ref, h_ref, stats_ref, patches_ref, *, Cin):
    """x9_ref:      (9, M_tile, Cin) pre-shifted, pre-masked tap slabs (f32).
       w_ref:       (K_pad, Cp) im2col weights, bf16, zero-padded rows/cols.
       h_ref:       (M_tile, Cp) f32 pre-BN conv output block (lane-dense store).
       stats_ref:   (2, Cp) f32 accumulator: row 0 = sum(h), row 1 = sum(h*h).
       patches_ref: (M_tile, K_pad) f32 VMEM scratch for the lane-dense im2col block."""
    i = pl.program_id(0)

    @pl.when(i == 0)
    def _init():
        # K-padding lanes [9*Cin, K_pad) must be zero (NaN garbage * zero-weight would
        # still poison the MXU accumulator).  Scratch persists across grid steps, so
        # zeroing once is enough.  The stats accumulator is also initialized here.
        patches_ref[...] = jnp.zeros_like(patches_ref)
        stats_ref[...] = jnp.zeros_like(stats_ref)

    # Lane-dense im2col staging: tap t = ky*3 + kx occupies lanes [t*Cin, (t+1)*Cin).
    # All taps are already shifted + edge-masked by the wrapper, so this is pure data
    # movement (no VALU masking, no unaligned loads).
    for t in range(9):
        patches_ref[:, t * Cin:(t + 1) * Cin] = x9_ref[t]

    # One fused MXU matmul over the full 3x3 receptive field: bf16 operands, f32 acc.
    h = jnp.dot(patches_ref[...].astype(jnp.bfloat16), w_ref[...],
                preferred_element_type=jnp.float32)           # (M_tile, Cp) f32
    h_ref[...] = h

    # One-pass BN moments (var = E[h^2] - E[h]^2), accumulated across row blocks.
    stats_ref[0:1, :] += jnp.sum(h, axis=0, keepdims=True)
    stats_ref[1:2, :] += jnp.sum(h * h, axis=0, keepdims=True)


# --------------------------------------------------------------------------------------
# Pass 2: normalize + affine + ReLU (one FMA + max per element, lane-dense).
# --------------------------------------------------------------------------------------
def bn_relu_kernel(h_ref, scale_ref, shift_ref, o_ref):
    o_ref[...] = jnp.maximum(h_ref[...] * scale_ref[...] + shift_ref[...], 0.0)


def conv_forward(x_nchw, params, *, max_m_tile=256):
    """Pallas implementation of Conv.forward.  NCHW in / NCHW out (PyTorch interface).

    max_m_tile=256 is a demo-scale tile (guarantees a multi-block grid at the test
    shapes).  For production shapes raise it toward the VMEM budget: the per-row
    footprint is ~1.3 KiB (h + out + slabs + patches), so ~8-16k rows fit v5e/v6e
    (128 MiB VMEM) and ~4-8k rows fit v7x (64 MiB VMEM).
    """
    N, Cin, H, W = x_nchw.shape
    Cout = params["w"].shape[-1]
    M = N * H * W
    K = 9 * Cin
    K_pad = _round_up(K, 128)        # 128 here; use 256 on v6e/v7x when Cin allows
    Cp = _round_up(Cout, 128)        # lane-dense matmul-N / output channel padding
    M_tile = _pick_m_tile(M, W, max_m_tile)
    n_blocks = M // M_tile

    # ---- layout plumbing required by the NCHW PyTorch interface ----
    x_flat = jnp.transpose(x_nchw, (0, 2, 3, 1)).reshape(M, Cin)

    # ---- pre-shifted, pre-masked tap slabs (boundary masks are static numpy) ----
    # For output row r and tap (dy, dx): source row r + dy*W + dx, zeroed wherever the
    # tap would fall outside the image (this also kills cross-image contamination in
    # the flattened row layout and the global out-of-range reads).
    h_idx = (np.arange(M) // W) % H
    w_idx = np.arange(M) % W
    h_ok = {-1: h_idx >= 1, 0: np.ones(M, bool), 1: h_idx <= H - 2}
    w_ok = {-1: w_idx >= 1, 0: np.ones(M, bool), 1: w_idx <= W - 2}
    PADR = W + 1
    x_pad = jnp.pad(x_flat, ((PADR, PADR), (0, 0)))
    taps = []
    for ky in range(3):
        for kx in range(3):
            dy, dx = ky - 1, kx - 1
            start = PADR + dy * W + dx
            shifted = x_pad[start:start + M]                         # x_flat[r+dy*W+dx]
            mask = (h_ok[dy] & w_ok[dx]).astype(np.float32)[:, None]  # compile-time const
            taps.append(shifted * mask)
    x9 = jnp.stack(taps, axis=0)                                      # (9, M, Cin)

    # ---- static parameter prep: HWIO -> (K_pad, Cp) bf16 im2col weights ----
    w2d = params["w"].reshape(K, Cout).astype(jnp.bfloat16)
    w2d = jnp.pad(w2d, ((0, K_pad - K), (0, Cp - Cout)))
    # NOTE: the conv bias is intentionally dropped -- it cancels exactly under
    # training-mode (batch-stat) BatchNorm.  Not valid for eval-mode/running-stats BN.

    vmem_limit = _vmem_limit_bytes()

    # -------------------------- pass 1: conv + moments ------------------------------
    cost1 = pl.CostEstimate(
        flops=2 * M * K_pad * Cp + 4 * M * Cp,
        transcendentals=0,
        bytes_accessed=int(x9.size) * 4 + int(w2d.size) * 2 + M * Cp * 4 + 2 * Cp * 4,
    )
    h_lin, stats = pl.pallas_call(
        functools.partial(conv_im2col_kernel, Cin=Cin),
        out_shape=(jax.ShapeDtypeStruct((M, Cp), jnp.float32),
                   jax.ShapeDtypeStruct((2, Cp), jnp.float32)),
        grid=(n_blocks,),
        in_specs=[
            pl.BlockSpec((9, M_tile, Cin), lambda i: (0, i, 0)),   # tap slabs
            pl.BlockSpec((K_pad, Cp), lambda i: (0, 0)),           # weights (resident)
        ],
        out_specs=(
            pl.BlockSpec((M_tile, Cp), lambda i: (i, 0)),          # h, streamed per block
            pl.BlockSpec((2, Cp), lambda i: (0, 0)),               # stats accumulator
        ),
        scratch_shapes=[pltpu.VMEM((M_tile, K_pad), jnp.float32)],
        compiler_params=pltpu.CompilerParams(
            # stats accumulate across the row-block axis -> must be "arbitrary".
            # TODO(synk): on v7x split this axis across the 2 TensorCores with a
            # cross-core combine of the (2, Cp) partial moments.
            dimension_semantics=("arbitrary",),
            vmem_limit_bytes=vmem_limit),
        cost_estimate=cost1,
    )(x9, w2d)

    # ---- BN scale/shift from the global moments (tiny (2, Cp) op, plain XLA) ----
    mean = stats[0] / M
    var = jnp.maximum(stats[1] / M - mean * mean, 0.0)   # clamp fp cancellation
    gamma_p = jnp.pad(params["gamma"], (0, Cp - Cout))
    beta_p = jnp.pad(params["beta"], (0, Cp - Cout))
    scale = gamma_p * jax.lax.rsqrt(var + _BN_EPS)
    shift = beta_p - mean * scale
    scale = scale.reshape(1, Cp)
    shift = shift.reshape(1, Cp)

    # -------------------------- pass 2: normalize + ReLU ----------------------------
    cost2 = pl.CostEstimate(
        flops=3 * M * Cp, transcendentals=0,
        bytes_accessed=2 * M * Cp * 4 + 4 * Cp * 4,
    )
    out = pl.pallas_call(
        bn_relu_kernel,
        out_shape=jax.ShapeDtypeStruct((M, Cp), jnp.float32),
        grid=(n_blocks,),
        in_specs=[
            pl.BlockSpec((M_tile, Cp), lambda i: (i, 0)),
            pl.BlockSpec((1, Cp), lambda i: (0, 0)),
            pl.BlockSpec((1, Cp), lambda i: (0, 0)),
        ],
        out_specs=pl.BlockSpec((M_tile, Cp), lambda i: (i, 0)),
        compiler_params=pltpu.CompilerParams(
            dimension_semantics=("parallel",),
            vmem_limit_bytes=vmem_limit),
        cost_estimate=cost2,
    )(h_lin, scale, shift)

    # NCHW out, padded channels sliced off (layout plumbing required by the interface).
    y = out[:, :Cout].reshape(N, H, W, Cout)
    return jnp.transpose(y, (0, 3, 1, 2))


def init_params(key, in_channels, out_channels):
    """Deterministic synthetic parameters (shapes from Conv.__init__)."""
    k1, k2, k3, k4 = jax.random.split(key, 4)
    fan_in = 9 * in_channels
    w = jax.random.normal(k1, (3, 3, in_channels, out_channels), jnp.float32)
    w = w * (1.0 / math.sqrt(fan_in))
    b = 0.1 * jax.random.normal(k2, (out_channels,), jnp.float32)
    gamma = 1.0 + 0.1 * jax.random.normal(k3, (out_channels,), jnp.float32)
    beta = 0.1 * jax.random.normal(k4, (out_channels,), jnp.float32)
    return {"w": w, "b": b, "gamma": gamma, "beta": beta}


def conv_reference(x_nchw, params):
    """Pure-JAX reference (correctness check only) — includes the conv bias."""
    x = jnp.transpose(x_nchw, (0, 2, 3, 1))
    out = jax.lax.conv_general_dilated(
        x, params["w"], window_strides=(1, 1), padding="SAME",
        dimension_numbers=("NHWC", "HWIO", "NHWC"),
        precision=jax.lax.Precision.HIGHEST)
    out = out + params["b"].reshape(1, 1, 1, -1)
    mean = jnp.mean(out, axis=(0, 1, 2), keepdims=True)
    var = jnp.mean((out - mean) ** 2, axis=(0, 1, 2), keepdims=True)
    out = (out - mean) * jax.lax.rsqrt(var + _BN_EPS)
    out = out * params["gamma"].reshape(1, 1, 1, -1) + params["beta"].reshape(1, 1, 1, -1)
    out = jnp.maximum(out, 0.0)
    return jnp.transpose(out, (0, 3, 1, 2))


if __name__ == "__main__":
    N, Cin, H, W = 2, 4, 16, 16
    Cout = 8

    key = jax.random.PRNGKey(0)
    kx, kp = jax.random.split(key)
    x = jax.random.normal(kx, (N, Cin, H, W), jnp.float32)   # NCHW, like PyTorch
    params = init_params(kp, Cin, Cout)

    fwd = jax.jit(conv_forward)
    y = jax.block_until_ready(fwd(x, params))

    assert y.shape == (N, Cout, H, W), y.shape
    assert bool(jnp.all(jnp.isfinite(y)))

    y_ref = conv_reference(x, params)
    # bf16 MXU operands -> looser tolerance than a pure-f32 check.
    np.testing.assert_allclose(np.asarray(y), np.asarray(y_ref), rtol=3e-2, atol=3e-2)

    print("KERNEL_OK")
</pallas_src>

<mosaic_0001>
module attributes {stable_mosaic.version = 11 : i64} {
  func.func @bn_relu_kernel(%arg0: i32, %arg1: memref<256x128xf32, #tpu.memory_space<vmem>>, %arg2: memref<1x128xf32, #tpu.memory_space<vmem>>, %arg3: memref<1x128xf32, #tpu.memory_space<vmem>>, %arg4: memref<256x128xf32, #tpu.memory_space<vmem>>) attributes {dimension_semantics = [#tpu.dimension_semantics<parallel>], iteration_bounds = array<i64: 2>, scalar_prefetch = 0 : i64, scratch_operands = 0 : i64, tpu.core_type = #tpu.core_type<tc>, window_params = [{transform_indices = @transform_0, window_bounds = array<i64: 256, 128>}, {pipeline_mode = #tpu.pipeline_mode<synchronous>, transform_indices = @transform_1, window_bounds = array<i64: 1, 128>}, {pipeline_mode = #tpu.pipeline_mode<synchronous>, transform_indices = @transform_2, window_bounds = array<i64: 1, 128>}, {transform_indices = @transform_3, window_bounds = array<i64: 256, 128>}]} {
    %c0 = arith.constant 0 : index
    %c0_0 = arith.constant 0 : index
    %0 = vector.load %arg1[%c0, %c0_0] : memref<256x128xf32, #tpu.memory_space<vmem>>, vector<256x128xf32>
    %c0_1 = arith.constant 0 : index
    %c0_2 = arith.constant 0 : index
    %1 = vector.load %arg2[%c0_1, %c0_2] : memref<1x128xf32, #tpu.memory_space<vmem>>, vector<1x128xf32>
    %2 = vector.broadcast %1 : vector<1x128xf32> to vector<256x128xf32>
    %3 = arith.mulf %0, %2 : vector<256x128xf32>
    %c0_3 = arith.constant 0 : index
    %c0_4 = arith.constant 0 : index
    %4 = vector.load %arg3[%c0_3, %c0_4] : memref<1x128xf32, #tpu.memory_space<vmem>>, vector<1x128xf32>
    %5 = vector.broadcast %4 : vector<1x128xf32> to vector<256x128xf32>
    %6 = arith.addf %3, %5 : vector<256x128xf32>
    %cst = arith.constant 0.000000e+00 : f32
    %7 = vector.broadcast %cst : f32 to vector<256x128xf32>
    %8 = arith.maximumf %6, %7 : vector<256x128xf32>
    %c0_5 = arith.constant 0 : index
    %c0_6 = arith.constant 0 : index
    %9 = vector.load %arg4[%c0_5, %c0_6] : memref<256x128xf32, #tpu.memory_space<vmem>>, vector<256x128xf32>
    tpu.vector_store %arg4[%c0_5, %c0_6], %8 {strides = array<i32>} : memref<256x128xf32, #tpu.memory_space<vmem>>, vector<256x128xf32>,
    return
  }
  func.func @transform_0(%arg0: i32) -> (i32, i32) {
    %c0_i32 = arith.constant 0 : i32
    %c0_i32_0 = arith.constant 0 : i32
    return %arg0, %c0_i32 : i32, i32
  }
  func.func @transform_1(%arg0: i32) -> (i32, i32) {
    %c0_i32 = arith.constant 0 : i32
    %c0_i32_0 = arith.constant 0 : i32
    %c0_i32_1 = arith.constant 0 : i32
    return %c0_i32, %c0_i32_0 : i32, i32
  }
  func.func @transform_2(%arg0: i32) -> (i32, i32) {
    %c0_i32 = arith.constant 0 : i32
    %c0_i32_0 = arith.constant 0 : i32
    %c0_i32_1 = arith.constant 0 : i32
    return %c0_i32, %c0_i32_0 : i32, i32
  }
  func.func @transform_3(%arg0: i32) -> (i32, i32) {
    %c0_i32 = arith.constant 0 : i32
    %c0_i32_0 = arith.constant 0 : i32
    return %arg0, %c0_i32 : i32, i32
  }
}

module attributes {stable_mosaic.version = 11 : i64} {
  func.func @conv_im2col_kernel(%arg0: i32, %arg1: memref<9x256x4xf32, #tpu.memory_space<vmem>>, %arg2: memref<128x128xbf16, #tpu.memory_space<vmem>>, %arg3: memref<256x128xf32, #tpu.memory_space<vmem>>, %arg4: memref<2x128xf32, #tpu.memory_space<vmem>>, %arg5: memref<256x128xf32, #tpu.memory_space<vmem>>) attributes {dimension_semantics = [#tpu.dimension_semantics<arbitrary>], iteration_bounds = array<i64: 2>, scalar_prefetch = 0 : i64, scratch_operands = 1 : i64, tpu.core_type = #tpu.core_type<tc>, window_params = [{transform_indices = @transform_0, window_bounds = array<i64: 9, 256, 4>}, {pipeline_mode = #tpu.pipeline_mode<synchronous>, transform_indices = @transform_1, window_bounds = array<i64: 128, 128>}, {transform_indices = @transform_2, window_bounds = array<i64: 256, 128>}, {pipeline_mode = #tpu.pipeline_mode<synchronous>, transform_indices = @transform_3, window_bounds = array<i64: 2, 128>}]} {
    %c0_i32 = arith.constant 0 : i32
    %0 = arith.cmpi eq, %arg0, %c0_i32 : i32
    %1 = arith.extui %0 : i1 to i32
    %c0_i32_0 = arith.constant 0 : i32
    %2 = arith.cmpi ne, %1, %c0_i32_0 : i32
    scf.if %2 {
      %cst_47 = arith.constant 0.000000e+00 : f32
      %46 = vector.broadcast %cst_47 : f32 to vector<256x128xf32>
      %c0_48 = arith.constant 0 : index
      %c0_49 = arith.constant 0 : index
      %47 = vector.load %arg5[%c0_48, %c0_49] : memref<256x128xf32, #tpu.memory_space<vmem>>, vector<256x128xf32>
      tpu.vector_store %arg5[%c0_48, %c0_49], %46 {strides = array<i32>} : memref<256x128xf32, #tpu.memory_space<vmem>>, vector<256x128xf32>,
      %cst_50 = arith.constant 0.000000e+00 : f32
      %48 = vector.broadcast %cst_50 : f32 to vector<2x128xf32>
      %c0_51 = arith.constant 0 : index
      %c0_52 = arith.constant 0 : index
      %49 = vector.load %arg4[%c0_51, %c0_52] : memref<2x128xf32, #tpu.memory_space<vmem>>, vector<2x128xf32>
      tpu.vector_store %arg4[%c0_51, %c0_52], %48 {strides = array<i32>} : memref<2x128xf32, #tpu.memory_space<vmem>>, vector<2x128xf32>,
    } else {
    }
    %c0 = arith.constant 0 : index
    %c0_1 = arith.constant 0 : index
    %c0_2 = arith.constant 0 : index
    %3 = vector.load %arg1[%c0, %c0_1, %c0_2] : memref<9x256x4xf32, #tpu.memory_space<vmem>>, vector<1x256x4xf32>
    %4 = vector.shape_cast %3 : vector<1x256x4xf32> to vector<256x4xf32>
    %c0_3 = arith.constant 0 : index
    %c0_4 = arith.constant 0 : index
    %5 = vector.load %arg5[%c0_3, %c0_4] : memref<256x128xf32, #tpu.memory_space<vmem>>, vector<256x4xf32>
    tpu.vector_store %arg5[%c0_3, %c0_4], %4 {strides = array<i32>} : memref<256x128xf32, #tpu.memory_space<vmem>>, vector<256x4xf32>,
    %c1 = arith.constant 1 : index
    %c0_5 = arith.constant 0 : index
    %c0_6 = arith.constant 0 : index
    %6 = vector.load %arg1[%c1, %c0_5, %c0_6] : memref<9x256x4xf32, #tpu.memory_space<vmem>>, vector<1x256x4xf32>
    %7 = vector.shape_cast %6 : vector<1x256x4xf32> to vector<256x4xf32>
    %c0_7 = arith.constant 0 : index
    %c4 = arith.constant 4 : index
    %8 = vector.load %arg5[%c0_7, %c4] : memref<256x128xf32, #tpu.memory_space<vmem>>, vector<256x4xf32>
    tpu.vector_store %arg5[%c0_7, %c4], %7 {strides = array<i32>} : memref<256x128xf32, #tpu.memory_space<vmem>>, vector<256x4xf32>,
    %c2 = arith.constant 2 : index
    %c0_8 = arith.constant 0 : index
    %c0_9 = arith.constant 0 : index
    %9 = vector.load %arg1[%c2, %c0_8, %c0_9] : memref<9x256x4xf32, #tpu.memory_space<vmem>>, vector<1x256x4xf32>
    %10 = vector.shape_cast %9 : vector<1x256x4xf32> to vector<256x4xf32>
    %c0_10 = arith.constant 0 : index
    %c8 = arith.constant 8 : index
    %11 = vector.load %arg5[%c0_10, %c8] : memref<256x128xf32, #tpu.memory_space<vmem>>, vector<256x4xf32>
    tpu.vector_store %arg5[%c0_10, %c8], %10 {strides = array<i32>} : memref<256x128xf32, #tpu.memory_space<vmem>>, vector<256x4xf32>,
    %c3 = arith.constant 3 : index
    %c0_11 = arith.constant 0 : index
    %c0_12 = arith.constant 0 : index
    %12 = vector.load %arg1[%c3, %c0_11, %c0_12] : memref<9x256x4xf32, #tpu.memory_space<vmem>>, vector<1x256x4xf32>
    %13 = vector.shape_cast %12 : vector<1x256x4xf32> to vector<256x4xf32>
    %c0_13 = arith.constant 0 : index
    %c12 = arith.constant 12 : index
    %14 = vector.load %arg5[%c0_13, %c12] : memref<256x128xf32, #tpu.memory_space<vmem>>, vector<256x4xf32>
    tpu.vector_store %arg5[%c0_13, %c12], %13 {strides = array<i32>} : memref<256x128xf32, #tpu.memory_space<vmem>>, vector<256x4xf32>,
    %c4_14 = arith.constant 4 : index
    %c0_15 = arith.constant 0 : index
    %c0_16 = arith.constant 0 : index
    %15 = vector.load %arg1[%c4_14, %c0_15, %c0_16] : memref<9x256x4xf32, #tpu.memory_space<vmem>>, vector<1x256x4xf32>
    %16 = vector.shape_cast %15 : vector<1x256x4xf32> to vector<256x4xf32>
    %c0_17 = arith.constant 0 : index
    %c16 = arith.constant 16 : index
    %17 = vector.load %arg5[%c0_17, %c16] : memref<256x128xf32, #tpu.memory_space<vmem>>, vector<256x4xf32>
    tpu.vector_store %arg5[%c0_17, %c16], %16 {strides = array<i32>} : memref<256x128xf32, #tpu.memory_space<vmem>>, vector<256x4xf32>,
    %c5 = arith.constant 5 : index
    %c0_18 = arith.constant 0 : index
    %c0_19 = arith.constant 0 : index
    %18 = vector.load %arg1[%c5, %c0_18, %c0_19] : memref<9x256x4xf32, #tpu.memory_space<vmem>>, vector<1x256x4xf32>
    %19 = vector.shape_cast %18 : vector<1x256x4xf32> to vector<256x4xf32>
    %c0_20 = arith.constant 0 : index
    %c20 = arith.constant 20 : index
    %20 = vector.load %arg5[%c0_20, %c20] : memref<256x128xf32, #tpu.memory_space<vmem>>, vector<256x4xf32>
    tpu.vector_store %arg5[%c0_20, %c20], %19 {strides = array<i32>} : memref<256x128xf32, #tpu.memory_space<vmem>>, vector<256x4xf32>,
    %c6 = arith.constant 6 : index
    %c0_21 = arith.constant 0 : index
    %c0_22 = arith.constant 0 : index
    %21 = vector.load %arg1[%c6, %c0_21, %c0_22] : memref<9x256x4xf32, #tpu.memory_space<vmem>>, vector<1x256x4xf32>
    %22 = vector.shape_cast %21 : vector<1x256x4xf32> to vector<256x4xf32>
    %c0_23 = arith.constant 0 : index
    %c24 = arith.constant 24 : index
    %23 = vector.load %arg5[%c0_23, %c24] : memref<256x128xf32, #tpu.memory_space<vmem>>, vector<256x4xf32>
    tpu.vector_store %arg5[%c0_23, %c24], %22 {strides = array<i32>} : memref<256x128xf32, #tpu.memory_space<vmem>>, vector<256x4xf32>,
    %c7 = arith.constant 7 : index
    %c0_24 = arith.constant 0 : index
    %c0_25 = arith.constant 0 : index
    %24 = vector.load %arg1[%c7, %c0_24, %c0_25] : memref<9x256x4xf32, #tpu.memory_space<vmem>>, vector<1x256x4xf32>
    %25 = vector.shape_cast %24 : vector<1x256x4xf32> to vector<256x4xf32>
    %c0_26 = arith.constant 0 : index
    %c28 = arith.constant 28 : index
    %26 = vector.load %arg5[%c0_26, %c28] : memref<256x128xf32, #tpu.memory_space<vmem>>, vector<256x4xf32>
    tpu.vector_store %arg5[%c0_26, %c28], %25 {strides = array<i32>} : memref<256x128xf32, #tpu.memory_space<vmem>>, vector<256x4xf32>,
    %c8_27 = arith.constant 8 : index
    %c0_28 = arith.constant 0 : index
    %c0_29 = arith.constant 0 : index
    %27 = vector.load %arg1[%c8_27, %c0_28, %c0_29] : memref<9x256x4xf32, #tpu.memory_space<vmem>>, vector<1x256x4xf32>
    %28 = vector.shape_cast %27 : vector<1x256x4xf32> to vector<256x4xf32>
    %c0_30 = arith.constant 0 : index
    %c32 = arith.constant 32 : index
    %29 = vector.load %arg5[%c0_30, %c32] : memref<256x128xf32, #tpu.memory_space<vmem>>, vector<256x4xf32>
    tpu.vector_store %arg5[%c0_30, %c32], %28 {strides = array<i32>} : memref<256x128xf32, #tpu.memory_space<vmem>>, vector<256x4xf32>,
    %c0_31 = arith.constant 0 : index
    %c0_32 = arith.constant 0 : index
    %30 = vector.load %arg5[%c0_31, %c0_32] : memref<256x128xf32, #tpu.memory_space<vmem>>, vector<256x128xf32>
    %31 = arith.truncf %30 : vector<256x128xf32> to vector<256x128xbf16>
    %c0_33 = arith.constant 0 : index
    %c0_34 = arith.constant 0 : index
    %32 = vector.load %arg2[%c0_33, %c0_34] : memref<128x128xbf16, #tpu.memory_space<vmem>>, vector<128x128xbf16>
    %cst = arith.constant dense<0.000000e+00> : vector<256x128xf32>
    %33 = tpu.matmul %31, %32, %cst {dimension_numbers = #tpu.dot_dimension_numbers<[1], [0], [0], [1], [0, 0, 1, 1], [], []>} : vector<256x128xbf16>, vector<128x128xbf16>, vector<256x128xf32> -> vector<256x128xf32>
    %c0_35 = arith.constant 0 : index
    %c0_36 = arith.constant 0 : index
    %34 = vector.load %arg3[%c0_35, %c0_36] : memref<256x128xf32, #tpu.memory_space<vmem>>, vector<256x128xf32>
    tpu.vector_store %arg3[%c0_35, %c0_36], %33 {strides = array<i32>} : memref<256x128xf32, #tpu.memory_space<vmem>>, vector<256x128xf32>,
    %c0_37 = arith.constant 0 : index
    %c0_38 = arith.constant 0 : index
    %35 = vector.load %arg4[%c0_37, %c0_38] : memref<2x128xf32, #tpu.memory_space<vmem>>, vector<1x128xf32>
    %cst_39 = arith.constant dense<0.000000e+00> : vector<128xf32>
    %36 = vector.multi_reduction <add>, %33, %cst_39 [0] : vector<256x128xf32> to vector<128xf32>
    %37 = vector.shape_cast %36 : vector<128xf32> to vector<1x128xf32>
    %38 = arith.addf %35, %37 : vector<1x128xf32>
    %c0_40 = arith.constant 0 : index
    %c0_41 = arith.constant 0 : index
    %39 = vector.load %arg4[%c0_40, %c0_41] : memref<2x128xf32, #tpu.memory_space<vmem>>, vector<1x128xf32>
    tpu.vector_store %arg4[%c0_40, %c0_41], %38 {strides = array<i32>} : memref<2x128xf32, #tpu.memory_space<vmem>>, vector<1x128xf32>,
    %c1_42 = arith.constant 1 : index
    %c0_43 = arith.constant 0 : index
    %40 = vector.load %arg4[%c1_42, %c0_43] : memref<2x128xf32, #tpu.memory_space<vmem>>, vector<1x128xf32>
    %41 = arith.mulf %33, %33 : vector<256x128xf32>
    %cst_44 = arith.constant dense<0.000000e+00> : vector<128xf32>
    %42 = vector.multi_reduction <add>, %41, %cst_44 [0] : vector<256x128xf32> to vector<128xf32>
    %43 = vector.shape_cast %42 : vector<128xf32> to vector<1x128xf32>
    %44 = arith.addf %40, %43 : vector<1x128xf32>
    %c1_45 = arith.constant 1 : index
    %c0_46 = arith.constant 0 : index
    %45 = vector.load %arg4[%c1_45, %c0_46] : memref<2x128xf32, #tpu.memory_space<vmem>>, vector<1x128xf32>
    tpu.vector_store %arg4[%c1_45, %c0_46], %44 {strides = array<i32>} : memref<2x128xf32, #tpu.memory_space<vmem>>, vector<1x128xf32>,
    return
  }
  func.func @transform_0(%arg0: i32) -> (i32, i32, i32) {
    %c0_i32 = arith.constant 0 : i32
    %c0_i32_0 = arith.constant 0 : i32
    %c0_i32_1 = arith.constant 0 : i32
    return %c0_i32, %arg0, %c0_i32_0 : i32, i32, i32
  }
  func.func @transform_1(%arg0: i32) -> (i32, i32) {
    %c0_i32 = arith.constant 0 : i32
    %c0_i32_0 = arith.constant 0 : i32
    %c0_i32_1 = arith.constant 0 : i32
    return %c0_i32, %c0_i32_0 : i32, i32
  }
  func.func @transform_2(%arg0: i32) -> (i32, i32) {
    %c0_i32 = arith.constant 0 : i32
    %c0_i32_0 = arith.constant 0 : i32
    return %arg0, %c0_i32 : i32, i32
  }
  func.func @transform_3(%arg0: i32) -> (i32, i32) {
    %c0_i32 = arith.constant 0 : i32
    %c0_i32_0 = arith.constant 0 : i32
    %c0_i32_1 = arith.constant 0 : i32
    return %c0_i32, %c0_i32_0 : i32, i32
  }
}

</mosaic_0001>

<bundles_post_ra>
// kernel: conv_forward.3
= control target key start
LH: loop header
LB: loop body
LE: loop exit
PB: predicated region body
PF: predicated region fallthrough
CT: control target
= control target key end

     0   :  { %s453_s12 = smov 0   ;;  %s612_s0 = inlined_call_operand.vmem [shape: f32[512,128], index: 0, kind: input, shape index: {}]   ;;  %s613_s1 = inlined_call_operand.vmem [shape: f32[1,128], index: 1, kind: input, shape index: {}]   ;;  %s614_s2 = inlined_call_operand.vmem [shape: f32[1,128], index: 2, kind: input, shape index: {}]   ;;  %s615_s3 = inlined_call_operand.vmem [shape: f32[512,128], index: 3, kind: output, shape index: {}]  }
   0x1 LB: > { %s404_s13 = sadd.s32 4294967295, %s431_s12   ;;  %p408_p0 = scmp.ge.s32.totalorder %s431_s12, 1  ;;  %s431_s12 = sphi %s453_s12, %s13_s12  }
   0x2   : > { %p138_p1 = scmp.lt.s32.totalorder %s431_s12, 3 }
   0x4   : > { %p139_p2 = pnand %p408_p0, %p138_p1 }
   0x5   : > { %s409_s14 = sshll.u32 (!%p139_p2), %s404_s13, 5  ;;  %v464_v0 = vld [vmem:[%s613_s1] ss:$0 sm:$0xff] (!%p139_p2) }
   0x6   : > { %142 = sbr.rel (%p139_p2) target bundleno = 46 (0x2e), region = 32  ;;  %p163_p3 = scmp.lt.s32.totalorder (!%p139_p2), %s409_s14, 63  ;;  %v474_v1 = vld [vmem:[%s614_s2] ss:$0 sm:$0xff] (!%p139_p2) }
   0xd   : > { %s617_s14 = smov (!%p163_p3, %s409_s14), 63 }
   0xe   : > { %s410_s15 = sshll.u32 %s617_s14, 3 }
   0xf   : > { %s469_s20 = scalar_lea.vmem %s612_s0, %s410_s15  ;;  %s497_s25 = scalar_lea.vmem %s615_s3, %s410_s15 }
  0x10   : > { %v174_v2 = vld [vmem:[%s469_s20] sm:$0xff]  ;;  %v175_v3 = vld [vmem:[%s469_s20 + $0x8] sm:$0xff]  ;;  %v176_v4 = vld [vmem:[%s469_s20 + $0x10] sm:$0xff] }
  0x11   : > { %v213_v5 = vmul.f32 %v464_v0, %v174_v2  ;;  %v214_v6 = vmul.f32 %v464_v0, %v175_v3  ;;  %v215_v7 = vmul.f32 %v464_v0, %v176_v4  ;;  %v177_v8 = vld [vmem:[%s469_s20 + $0x18] sm:$0xff]  ;;  %v178_v9 = vld [vmem:[%s469_s20 + $0x20] sm:$0xff]  ;;  %v179_v10 = vld [vmem:[%s469_s20 + $0x28] sm:$0xff] }
  0x12   : > { %v216_v11 = vmul.f32 %v464_v0, %v177_v8  ;;  %v217_v12 = vmul.f32 %v464_v0, %v178_v9  ;;  %v218_v13 = vmul.f32 %v464_v0, %v179_v10  ;;  %v180_v14 = vld [vmem:[%s469_s20 + $0x30] sm:$0xff]  ;;  %v181_v15 = vld [vmem:[%s469_s20 + $0x38] sm:$0xff]  ;;  %v182_v24 = vld [vmem:[%s469_s20 + $0x40] sm:$0xff] }
  0x13   : > { %v252_v16 = vadd.f32 %v474_v1, %v213_v5  ;;  %v253_v17 = vadd.f32 %v474_v1, %v214_v6  ;;  %v254_v18 = vadd.f32 %v474_v1, %v215_v7  ;;  %v219_v19 = vmul.f32 %v464_v0, %v180_v14  ;;  %v183_v25 = vld [vmem:[%s469_s20 + $0x48] sm:$0xff]  ;;  %v184_v26 = vld [vmem:[%s469_s20 + $0x50] sm:$0xff]  ;;  %v185_v31 = vld [vmem:[%s469_s20 + $0x58] sm:$0xff] }
  0x14   : > { %v255_v20 = vadd.f32 %v474_v1, %v216_v11  ;;  %v256_v21 = vadd.f32 %v474_v1, %v217_v12  ;;  %v257_v22 = vadd.f32 %v474_v1, %v218_v13  ;;  %v220_v23 = vmul.f32 %v464_v0, %v181_v15  ;;  %v186_v32 = vld [vmem:[%s469_s20 + $0x60] sm:$0xff]  ;;  %v187_v33 = vld [vmem:[%s469_s20 + $0x68] sm:$0xff]  ;;  %v188_v38 = vld [vmem:[%s469_s20 + $0x70] sm:$0xff] }
  0x15   : > { %v284_v27 = vmax.f32 %v252_v16, 0.0  ;;  %v285_v28 = vmax.f32 %v253_v17, 0.0  ;;  %v286_v29 = vmax.f32 %v254_v18, 0.0  ;;  %v258_v30 = vadd.f32 %v474_v1, %v219_v19  ;;  %v189_v43 = vld [vmem:[%s469_s20 + $0x78] sm:$0xff]  ;;  %v190_v56 = vld [vmem:[%s469_s20 + $0x80] sm:$0xff]  ;;  %v191_v57 = vld [vmem:[%s469_s20 + $0x88] sm:$0xff] }
  0x16   : > { %v287_v34 = vmax.f32 %v255_v20, 0.0  ;;  %v288_v35 = vmax.f32 %v256_v21, 0.0  ;;  %v289_v36 = vmax.f32 %v257_v22, 0.0  ;;  %v259_v37 = vadd.f32 %v474_v1, %v220_v23  ;;  %v192_v58 = vld [vmem:[%s469_s20 + $0x90] sm:$0xff]  ;;  %v193_v63 = vld [vmem:[%s469_s20 + $0x98] sm:$0xff]  ;;  %v194_v2 = vld [vmem:[%s469_s20 + $0xa0] sm:$0xff] }
  0x17   : > { %316 = vst [vmem:[%s497_s25] sm:$0xff] %v284_v27  ;;  %317 = vst [vmem:[%s497_s25 + $0x8] sm:$0xff] %v285_v28  ;;  %v290_v39 = vmax.f32 %v258_v30, 0.0  ;;  %v221_v40 = vmul.f32 %v464_v0, %v182_v24  ;;  %v222_v41 = vmul.f32 %v464_v0, %v183_v25  ;;  %v223_v42 = vmul.f32 %v464_v0, %v184_v26  ;;  %v195_v3 = vld [vmem:[%s469_s20 + $0xa8] sm:$0xff]  ;;  %v196_v8 = vld [vmem:[%s469_s20 + $0xb0] sm:$0xff] }
  0x18   : > { %318 = vst [vmem:[%s497_s25 + $0x10] sm:$0xff] %v286_v29  ;;  %319 = vst [vmem:[%s497_s25 + $0x18] sm:$0xff] %v287_v34  ;;  %v291_v44 = vmax.f32 %v259_v37, 0.0  ;;  %v224_v45 = vmul.f32 %v464_v0, %v185_v31  ;;  %v225_v46 = vmul.f32 %v464_v0, %v186_v32  ;;  %v226_v47 = vmul.f32 %v464_v0, %v187_v33  ;;  %v197_v13 = vld [vmem:[%s469_s20 + $0xb8] sm:$0xff]  ;;  %v198_v26 = vld [vmem:[%s469_s20 + $0xc0] sm:$0xff] }
  0x19   : > { %320 = vst [vmem:[%s497_s25 + $0x20] sm:$0xff] %v288_v35  ;;  %321 = vst [vmem:[%s497_s25 + $0x28] sm:$0xff] %v289_v36  ;;  %v260_v48 = vadd.f32 %v474_v1, %v221_v40  ;;  %v261_v49 = vadd.f32 %v474_v1, %v222_v41  ;;  %v262_v50 = vadd.f32 %v474_v1, %v223_v42  ;;  %v199_v27 = vld [vmem:[%s469_s20 + $0xc8] sm:$0xff]  ;;  %v200_v28 = vld [vmem:[%s469_s20 + $0xd0] sm:$0xff] }
  0x1a   : > { %322 = vst [vmem:[%s497_s25 + $0x30] sm:$0xff] %v290_v39  ;;  %v227_v51 = vmul.f32 %v464_v0, %v188_v38  ;;  %323 = vst [vmem:[%s497_s25 + $0x38] sm:$0xff] %v291_v44  ;;  %v263_v52 = vadd.f32 %v474_v1, %v224_v45  ;;  %v264_v53 = vadd.f32 %v474_v1, %v225_v46  ;;  %v201_v33 = vld [vmem:[%s469_s20 + $0xd8] sm:$0xff]  ;;  %v202_v34 = vld [vmem:[%s469_s20 + $0xe0] sm:$0xff] }
  0x1b   : > { %v265_v54 = vadd.f32 %v474_v1, %v226_v47  ;;  %v228_v55 = vmul.f32 %v464_v0, %v189_v43  ;;  %v292_v59 = vmax.f32 %v260_v48, 0.0  ;;  %v293_v60 = vmax.f32 %v261_v49, 0.0  ;;  %v203_v35 = vld [vmem:[%s469_s20 + $0xe8] sm:$0xff]  ;;  %v204_v40 = vld [vmem:[%s469_s20 + $0xf0] sm:$0xff]  ;;  %v205_v45 = vld [vmem:[%s469_s20 + $0xf8] sm:$0xff] }
  0x1c   : > { %v294_v61 = vmax.f32 %v262_v50, 0.0  ;;  %v266_v62 = vadd.f32 %v474_v1, %v227_v51  ;;  %v295_v4 = vmax.f32 %v263_v52, 0.0  ;;  %v296_v5 = vmax.f32 %v264_v53, 0.0 }
  0x1d   : > { %v297_v6 = vmax.f32 %v265_v54, 0.0  ;;  %v267_v7 = vadd.f32 %v474_v1, %v228_v55  ;;  %324 = vst [vmem:[%s497_s25 + $0x40] sm:$0xff] %v292_v59  ;;  %325 = vst [vmem:[%s497_s25 + $0x48] sm:$0xff] %v293_v60  ;;  %v229_v10 = vmul.f32 %v464_v0, %v190_v56  ;;  %v230_v11 = vmul.f32 %v464_v0, %v191_v57 }
  0x1e   : > { %326 = vst [vmem:[%s497_s25 + $0x50] sm:$0xff] %v294_v61  ;;  %v298_v9 = vmax.f32 %v266_v62, 0.0  ;;  %v231_v12 = vmul.f32 %v464_v0, %v192_v58  ;;  %327 = vst [vmem:[%s497_s25 + $0x58] sm:$0xff] %v295_v4  ;;  %v232_v15 = vmul.f32 %v464_v0, %v193_v63  ;;  %v233_v16 = vmul.f32 %v464_v0, %v194_v2 }
  0x1f   : > { %328 = vst [vmem:[%s497_s25 + $0x60] sm:$0xff] %v296_v5  ;;  %329 = vst [vmem:[%s497_s25 + $0x68] sm:$0xff] %v297_v6  ;;  %v299_v14 = vmax.f32 %v267_v7, 0.0  ;;  %v234_v17 = vmul.f32 %v464_v0, %v195_v3  ;;  %v268_v18 = vadd.f32 %v474_v1, %v229_v10  ;;  %v269_v19 = vadd.f32 %v474_v1, %v230_v11 }
  0x20   : > { %330 = vst [vmem:[%s497_s25 + $0x70] sm:$0xff] %v298_v9  ;;  %v270_v20 = vadd.f32 %v474_v1, %v231_v12  ;;  %v235_v21 = vmul.f32 %v464_v0, %v196_v8  ;;  %v271_v22 = vadd.f32 %v474_v1, %v232_v15  ;;  %v272_v23 = vadd.f32 %v474_v1, %v233_v16 }
  0x21   : > { %331 = vst [vmem:[%s497_s25 + $0x78] sm:$0xff] %v299_v14  ;;  %v273_v24 = vadd.f32 %v474_v1, %v234_v17  ;;  %v236_v25 = vmul.f32 %v464_v0, %v197_v13  ;;  %v300_v29 = vmax.f32 %v268_v18, 0.0  ;;  %v301_v30 = vmax.f32 %v269_v19, 0.0 }
  0x22   : > { %v302_v31 = vmax.f32 %v270_v20, 0.0  ;;  %v274_v32 = vadd.f32 %v474_v1, %v235_v21  ;;  %v303_v36 = vmax.f32 %v271_v22, 0.0  ;;  %v304_v37 = vmax.f32 %v272_v23, 0.0 }
  0x23   : > { %v305_v38 = vmax.f32 %v273_v24, 0.0  ;;  %v275_v39 = vadd.f32 %v474_v1, %v236_v25  ;;  %332 = vst [vmem:[%s497_s25 + $0x80] sm:$0xff] %v300_v29  ;;  %333 = vst [vmem:[%s497_s25 + $0x88] sm:$0xff] %v301_v30  ;;  %v237_v42 = vmul.f32 %v464_v0, %v198_v26  ;;  %v238_v43 = vmul.f32 %v464_v0, %v199_v27 }
  0x24   : > { %334 = vst [vmem:[%s497_s25 + $0x90] sm:$0xff] %v302_v31  ;;  %v306_v41 = vmax.f32 %v274_v32, 0.0  ;;  %v239_v44 = vmul.f32 %v464_v0, %v200_v28  ;;  %335 = vst [vmem:[%s497_s25 + $0x98] sm:$0xff] %v303_v36  ;;  %v240_v47 = vmul.f32 %v464_v0, %v201_v33  ;;  %v241_v48 = vmul.f32 %v464_v0, %v202_v34 }
  0x25   : > { %336 = vst [vmem:[%s497_s25 + $0xa0] sm:$0xff] %v304_v37  ;;  %337 = vst [vmem:[%s497_s25 + $0xa8] sm:$0xff] %v305_v38  ;;  %v307_v46 = vmax.f32 %v275_v39, 0.0  ;;  %v242_v49 = vmul.f32 %v464_v0, %v203_v35  ;;  %v276_v50 = vadd.f32 %v474_v1, %v237_v42  ;;  %v277_v51 = vadd.f32 %v474_v1, %v238_v43 }
  0x26   : > { %338 = vst [vmem:[%s497_s25 + $0xb0] sm:$0xff] %v306_v41  ;;  %v278_v52 = vadd.f32 %v474_v1, %v239_v44  ;;  %v243_v53 = vmul.f32 %v464_v0, %v204_v40  ;;  %v279_v54 = vadd.f32 %v474_v1, %v240_v47  ;;  %v280_v55 = vadd.f32 %v474_v1, %v241_v48 }
  0x27   : > { %339 = vst [vmem:[%s497_s25 + $0xb8] sm:$0xff] %v307_v46  ;;  %v281_v56 = vadd.f32 %v474_v1, %v242_v49  ;;  %v244_v57 = vmul.f32 %v464_v0, %v205_v45  ;;  %v308_v58 = vmax.f32 %v276_v50, 0.0  ;;  %v309_v59 = vmax.f32 %v277_v51, 0.0 }
  0x28   : > { %v310_v60 = vmax.f32 %v278_v52, 0.0  ;;  %v282_v61 = vadd.f32 %v474_v1, %v243_v53  ;;  %v311_v62 = vmax.f32 %v279_v54, 0.0  ;;  %v312_v63 = vmax.f32 %v280_v55, 0.0 }
  0x29   : > { %v313_v2 = vmax.f32 %v281_v56, 0.0  ;;  %v283_v3 = vadd.f32 %v474_v1, %v244_v57  ;;  %340 = vst [vmem:[%s497_s25 + $0xc0] sm:$0xff] %v308_v58  ;;  %341 = vst [vmem:[%s497_s25 + $0xc8] sm:$0xff] %v309_v59 }
  0x2a   : > { %342 = vst [vmem:[%s497_s25 + $0xd0] sm:$0xff] %v310_v60  ;;  %v314_v4 = vmax.f32 %v282_v61, 0.0  ;;  %343 = vst [vmem:[%s497_s25 + $0xd8] sm:$0xff] %v311_v62 }
  0x2b   : > { %344 = vst [vmem:[%s497_s25 + $0xe0] sm:$0xff] %v312_v63  ;;  %345 = vst [vmem:[%s497_s25 + $0xe8] sm:$0xff] %v313_v2  ;;  %v315_v0 = vmax.f32 %v283_v3, 0.0 }
  0x2c   : > { %346 = vst [vmem:[%s497_s25 + $0xf0] sm:$0xff] %v314_v4 }
  0x2d   : > { %347 = vst [vmem:[%s497_s25 + $0xf8] sm:$0xff] %v315_v0 }
  0x2e PF: > { %s13_s12 = sadd.s32 1, %s431_s12  }
  0x2f   : > { %p10_p4 = scmp.ge.s32.totalorder %s13_s12, 4  }
  0x31   :  { %12 = sbr.rel (!%p10_p4) target bundleno = 1 (0x1), region = 62 }

// kernel: conv_forward.2
= control target key start
LH: loop header
LB: loop body
LE: loop exit
PB: predicated region body
PF: predicated region fallthrough
CT: control target
= control target key end

     0   :  { %s3955_s12 = smov 0   ;;  %s3957_s13 = smov 0   ;;  %s5496_s0 = inlined_call_operand.vmem [shape: f32[9,512,4], index: 0, kind: input, shape index: {}]   ;;  %s5497_s1 = inlined_call_operand.vmem [shape: bf16[128,128], index: 1, kind: input, shape index: {}]   ;;  %s5498_s2 = inlined_call_operand.vmem [shape: f32[512,128], index: 2, kind: output, shape index: {0}]   ;;  %s5499_s3 = inlined_call_operand.vmem [shape: f32[2,128], index: 3, kind: output, shape index: {1}]  }
   0x1   :  { %s3959_s14 = smov 0  }
   0x2 LB: > { %s3494_s15 = sadd.s32 4294967295, %s3924_s14   ;;  %s3972_s16 = sadd.s32 1, %s3924_s14   ;;  %s3924_s14 = sphi %s3959_s14, %s5502_s14   ;;  %s3920_s13 = sphi %s3957_s13, %s5501_s13   ;;  %s3916_s12 = sphi %s3955_s12, %s5500_s12  }
   0x3   : > { %s18_s17 = ssub.s32 %s3924_s14, %s3972_s16  ;;  %s21_s18 = sadd.s32 1, %s3920_s13 }
   0x4   : > { %p19_p0 = scmp.eq.s32.totalorder %s18_s17, 0  ;;  %p28_p1 = scmp.ne.s32.totalorder %s3920_s13, %s3916_s12 }
   0x5   : > { %p29_p2 = scmp.eq.s32.totalorder %s3924_s14, 0  ;;  %p3497_p4 = scmp.ge.s32.totalorder %s3924_s14, 2 }
   0x6   : > { %s3981_s19 = scalar_select %p19_p0, %s3920_s13, %s21_s18  }
   0x7   : > { %p30_p3 = por %p29_p2, %p28_p1  ;;  %125 = sbr.rel (%p3497_p4) target bundleno = 163 (0xa3), region = 20 }
   0xe   : > { %128 = sbr.rel (!%p30_p3) target bundleno = 163 (0xa3), region = 24  ;;  %s130_s20 = sand.u32 (%p30_p3), 1, %s3920_s13  }
   0xf   : > { %s3770_s21 = sshll.u32 (%p30_p3), %s3924_s14, 8  ;;  %s3859_s22 = smul.u32 (%p30_p3), 2304, %s130_s20 }
  0x10   : > { %s3989_s25 = scalar_lea.vmem (%p30_p3), %s5496_s0, %s3770_s21 }
  0x11   : > { %v737_v0 = vld [vmem:[%s3989_s25] sm:$0xff] (%p30_p3)  ;;  %v739_v1 = vld [vmem:[%s3989_s25 + $0x8] sm:$0xff] (%p30_p3)  ;;  %v741_v2 = vld [vmem:[%s3989_s25 + $0x10] sm:$0xff] (%p30_p3)  ;;  %s3997_s26 = scalar_lea.vmem (%p30_p3), [#allocation3], %s3859_s22 }
  0x12   : > { %v743_v3 = vld [vmem:[%s3989_s25 + $0x18] sm:$0xff] (%p30_p3)  ;;  %v745_v4 = vld [vmem:[%s3989_s25 + $0x20] sm:$0xff] (%p30_p3)  ;;  %v747_v5 = vld [vmem:[%s3989_s25 + $0x28] sm:$0xff] (%p30_p3)  ;;  %738 = vst [vmem:[%s3997_s26] sm:$0xff] (%p30_p3), %v737_v0 }
  0x13   : > { %740 = vst [vmem:[%s3997_s26 + $0x8] sm:$0xff] (%p30_p3), %v739_v1  ;;  %742 = vst [vmem:[%s3997_s26 + $0x10] sm:$0xff] (%p30_p3), %v741_v2  ;;  %v749_v6 = vld [vmem:[%s3989_s25 + $0x30] sm:$0xff] (%p30_p3)  ;;  %v751_v7 = vld [vmem:[%s3989_s25 + $0x38] sm:$0xff] (%p30_p3) }
  0x14   : > { %744 = vst [vmem:[%s3997_s26 + $0x18] sm:$0xff] (%p30_p3), %v743_v3  ;;  %746 = vst [vmem:[%s3997_s26 + $0x20] sm:$0xff] (%p30_p3), %v745_v4  ;;  %v753_v8 = vld [vmem:[%s3989_s25 + $0x40] sm:$0xff] (%p30_p3)  ;;  %v755_v9 = vld [vmem:[%s3989_s25 + $0x48] sm:$0xff] (%p30_p3) }
  0x15   : > { %748 = vst [vmem:[%s3997_s26 + $0x28] sm:$0xff] %v747_v5  ;;  %750 = vst [vmem:[%s3997_s26 + $0x30] sm:$0xff] %v749_v6  ;;  %v757_v10 = vld [vmem:[%s3989_s25 + $0x50] sm:$0xff]  ;;  %v759_v11 = vld [vmem:[%s3989_s25 + $0x58] sm:$0xff] }
  0x16   : > { %752 = vst [vmem:[%s3997_s26 + $0x38] sm:$0xff] %v751_v7  ;;  %754 = vst [vmem:[%s3997_s26 + $0x40] sm:$0xff] %v753_v8  ;;  %v761_v12 = vld [vmem:[%s3989_s25 + $0x60] sm:$0xff]  ;;  %v763_v13 = vld [vmem:[%s3989_s25 + $0x68] sm:$0xff] }
  0x17   : > { %756 = vst [vmem:[%s3997_s26 + $0x48] sm:$0xff] %v755_v9  ;;  %758 = vst [vmem:[%s3997_s26 + $0x50] sm:$0xff] %v757_v10  ;;  %v765_v14 = vld [vmem:[%s3989_s25 + $0x70] sm:$0xff]  ;;  %v767_v15 = vld [vmem:[%s3989_s25 + $0x78] sm:$0xff] }
  0x18   : > { %760 = vst [vmem:[%s3997_s26 + $0x58] sm:$0xff] %v759_v11  ;;  %762 = vst [vmem:[%s3997_s26 + $0x60] sm:$0xff] %v761_v12  ;;  %v769_v16 = vld [vmem:[%s3989_s25 + $0x80] sm:$0xff]  ;;  %v771_v17 = vld [vmem:[%s3989_s25 + $0x88] sm:$0xff] }
  0x19   : > { %764 = vst [vmem:[%s3997_s26 + $0x68] sm:$0xff] %v763_v13  ;;  %766 = vst [vmem:[%s3997_s26 + $0x70] sm:$0xff] %v765_v14  ;;  %v773_v18 = vld [vmem:[%s3989_s25 + $0x90] sm:$0xff]  ;;  %v775_v19 = vld [vmem:[%s3989_s25 + $0x98] sm:$0xff] }
  0x1a   : > { %768 = vst [vmem:[%s3997_s26 + $0x78] sm:$0xff] %v767_v15  ;;  %770 = vst [vmem:[%s3997_s26 + $0x80] sm:$0xff] %v769_v16  ;;  %v777_v20 = vld [vmem:[%s3989_s25 + $0xa0] sm:$0xff]  ;;  %v779_v21 = vld [vmem:[%s3989_s25 + $0xa8] sm:$0xff] }
  0x1b   : > { %772 = vst [vmem:[%s3997_s26 + $0x88] sm:$0xff] %v771_v17  ;;  %774 = vst [vmem:[%s3997_s26 + $0x90] sm:$0xff] %v773_v18  ;;  %v781_v22 = vld [vmem:[%s3989_s25 + $0xb0] sm:$0xff]  ;;  %v783_v23 = vld [vmem:[%s3989_s25 + $0xb8] sm:$0xff] }
  0x1c   : > { %776 = vst [vmem:[%s3997_s26 + $0x98] sm:$0xff] %v775_v19  ;;  %778 = vst [vmem:[%s3997_s26 + $0xa0] sm:$0xff] %v777_v20  ;;  %v785_v24 = vld [vmem:[%s3989_s25 + $0xc0] sm:$0xff]  ;;  %v787_v25 = vld [vmem:[%s3989_s25 + $0xc8] sm:$0xff] }
  0x1d   : > { %780 = vst [vmem:[%s3997_s26 + $0xa8] sm:$0xff] %v779_v21  ;;  %782 = vst [vmem:[%s3997_s26 + $0xb0] sm:$0xff] %v781_v22  ;;  %v789_v26 = vld [vmem:[%s3989_s25 + $0xd0] sm:$0xff]  ;;  %v791_v27 = vld [vmem:[%s3989_s25 + $0xd8] sm:$0xff] }
  0x1e   : > { %784 = vst [vmem:[%s3997_s26 + $0xb8] sm:$0xff] %v783_v23  ;;  %786 = vst [vmem:[%s3997_s26 + $0xc0] sm:$0xff] %v785_v24  ;;  %v793_v28 = vld [vmem:[%s3989_s25 + $0xe0] sm:$0xff]  ;;  %v795_v29 = vld [vmem:[%s3989_s25 + $0xe8] sm:$0xff] }
  0x1f   : > { %788 = vst [vmem:[%s3997_s26 + $0xc8] sm:$0xff] %v787_v25  ;;  %790 = vst [vmem:[%s3997_s26 + $0xd0] sm:$0xff] %v789_v26  ;;  %v797_v30 = vld [vmem:[%s3989_s25 + $0xf0] sm:$0xff]  ;;  %v799_v31 = vld [vmem:[%s3989_s25 + $0xf8] sm:$0xff] }
  0x20   : > { %792 = vst [vmem:[%s3997_s26 + $0xd8] sm:$0xff] %v791_v27  ;;  %794 = vst [vmem:[%s3997_s26 + $0xe0] sm:$0xff] %v793_v28  ;;  %v801_v32 = vld [vmem:[%s3989_s25 + $0x200] sm:$0xff]  ;;  %v803_v33 = vld [vmem:[%s3989_s25 + $0x208] sm:$0xff] }
  0x21   : > { %796 = vst [vmem:[%s3997_s26 + $0xe8] sm:$0xff] %v795_v29  ;;  %798 = vst [vmem:[%s3997_s26 + $0xf0] sm:$0xff] %v797_v30  ;;  %v805_v34 = vld [vmem:[%s3989_s25 + $0x210] sm:$0xff]  ;;  %v807_v35 = vld [vmem:[%s3989_s25 + $0x218] sm:$0xff] }
  0x22   : > { %800 = vst [vmem:[%s3997_s26 + $0xf8] sm:$0xff] %v799_v31  ;;  %802 = vst [vmem:[%s3997_s26 + $0x100] sm:$0xff] %v801_v32  ;;  %v809_v36 = vld [vmem:[%s3989_s25 + $0x220] sm:$0xff]  ;;  %v811_v37 = vld [vmem:[%s3989_s25 + $0x228] sm:$0xff] }
  0x23   : > { %804 = vst [vmem:[%s3997_s26 + $0x108] sm:$0xff] %v803_v33  ;;  %806 = vst [vmem:[%s3997_s26 + $0x110] sm:$0xff] %v805_v34  ;;  %v813_v38 = vld [vmem:[%s3989_s25 + $0x230] sm:$0xff]  ;;  %v815_v39 = vld [vmem:[%s3989_s25 + $0x238] sm:$0xff] }
  0x24   : > { %808 = vst [vmem:[%s3997_s26 + $0x118] sm:$0xff] %v807_v35  ;;  %810 = vst [vmem:[%s3997_s26 + $0x120] sm:$0xff] %v809_v36  ;;  %v817_v40 = vld [vmem:[%s3989_s25 + $0x240] sm:$0xff]  ;;  %v819_v41 = vld [vmem:[%s3989_s25 + $0x248] sm:$0xff] }
  0x25   : > { %812 = vst [vmem:[%s3997_s26 + $0x128] sm:$0xff] %v811_v37  ;;  %814 = vst [vmem:[%s3997_s26 + $0x130] sm:$0xff] %v813_v38  ;;  %v821_v42 = vld [vmem:[%s3989_s25 + $0x250] sm:$0xff]  ;;  %v823_v43 = vld [vmem:[%s3989_s25 + $0x258] sm:$0xff] }
  0x26   : > { %816 = vst [vmem:[%s3997_s26 + $0x138] sm:$0xff] %v815_v39  ;;  %818 = vst [vmem:[%s3997_s26 + $0x140] sm:$0xff] %v817_v40  ;;  %v825_v44 = vld [vmem:[%s3989_s25 + $0x260] sm:$0xff]  ;;  %v827_v45 = vld [vmem:[%s3989_s25 + $0x268] sm:$0xff] }
  0x27   : > { %820 = vst [vmem:[%s3997_s26 + $0x148] sm:$0xff] %v819_v41  ;;  %822 = vst [vmem:[%s3997_s26 + $0x150] sm:$0xff] %v821_v42  ;;  %v829_v46 = vld [vmem:[%s3989_s25 + $0x270] sm:$0xff]  ;;  %v831_v47 = vld [vmem:[%s3989_s25 + $0x278] sm:$0xff] }
  0x28   : > { %824 = vst [vmem:[%s3997_s26 + $0x158] sm:$0xff] %v823_v43  ;;  %826 = vst [vmem:[%s3997_s26 + $0x160] sm:$0xff] %v825_v44  ;;  %v833_v48 = vld [vmem:[%s3989_s25 + $0x280] sm:$0xff]  ;;  %v835_v49 = vld [vmem:[%s3989_s25 + $0x288] sm:$0xff] }
  0x29   : > { %828 = vst [vmem:[%s3997_s26 + $0x168] sm:$0xff] %v827_v45  ;;  %830 = vst [vmem:[%s3997_s26 + $0x170] sm:$0xff] %v829_v46  ;;  %v837_v50 = vld [vmem:[%s3989_s25 + $0x290] sm:$0xff]  ;;  %v839_v51 = vld [vmem:[%s3989_s25 + $0x298] sm:$0xff] }
  0x2a   : > { %832 = vst [vmem:[%s3997_s26 + $0x178] sm:$0xff] %v831_v47  ;;  %834 = vst [vmem:[%s3997_s26 + $0x180] sm:$0xff] %v833_v48  ;;  %v841_v52 = vld [vmem:[%s3989_s25 + $0x2a0] sm:$0xff]  ;;  %v843_v53 = vld [vmem:[%s3989_s25 + $0x2a8] sm:$0xff] }
  0x2b   : > { %836 = vst [vmem:[%s3997_s26 + $0x188] sm:$0xff] %v835_v49  ;;  %838 = vst [vmem:[%s3997_s26 + $0x190] sm:$0xff] %v837_v50  ;;  %v845_v54 = vld [vmem:[%s3989_s25 + $0x2b0] sm:$0xff]  ;;  %v847_v55 = vld [vmem:[%s3989_s25 + $0x2b8] sm:$0xff] }
  0x2c   : > { %840 = vst [vmem:[%s3997_s26 + $0x198] sm:$0xff] %v839_v51  ;;  %842 = vst [vmem:[%s3997_s26 + $0x1a0] sm:$0xff] %v841_v52  ;;  %v849_v56 = vld [vmem:[%s3989_s25 + $0x2c0] sm:$0xff]  ;;  %v851_v57 = vld [vmem:[%s3989_s25 + $0x2c8] sm:$0xff] }
  0x2d   : > { %844 = vst [vmem:[%s3997_s26 + $0x1a8] sm:$0xff] %v843_v53  ;;  %846 = vst [vmem:[%s3997_s26 + $0x1b0] sm:$0xff] %v845_v54  ;;  %v853_v58 = vld [vmem:[%s3989_s25 + $0x2d0] sm:$0xff]  ;;  %v855_v59 = vld [vmem:[%s3989_s25 + $0x2d8] sm:$0xff] }
  0x2e   : > { %848 = vst [vmem:[%s3997_s26 + $0x1b8] sm:$0xff] %v847_v55  ;;  %850 = vst [vmem:[%s3997_s26 + $0x1c0] sm:$0xff] %v849_v56  ;;  %v857_v60 = vld [vmem:[%s3989_s25 + $0x2e0] sm:$0xff]  ;;  %v859_v61 = vld [vmem:[%s3989_s25 + $0x2e8] sm:$0xff] }
  0x2f   : > { %852 = vst [vmem:[%s3997_s26 + $0x1c8] sm:$0xff] %v851_v57  ;;  %854 = vst [vmem:[%s3997_s26 + $0x1d0] sm:$0xff] %v853_v58  ;;  %v861_v62 = vld [vmem:[%s3989_s25 + $0x2f0] sm:$0xff]  ;;  %v863_v63 = vld [vmem:[%s3989_s25 + $0x2f8] sm:$0xff] }
  0x30   : > { %856 = vst [vmem:[%s3997_s26 + $0x1d8] sm:$0xff] %v855_v59  ;;  %858 = vst [vmem:[%s3997_s26 + $0x1e0] sm:$0xff] %v857_v60  ;;  %v865_v0 = vld [vmem:[%s3989_s25 + $0x400] sm:$0xff]  ;;  %v867_v1 = vld [vmem:[%s3989_s25 + $0x408] sm:$0xff] }
  0x31   : > { %860 = vst [vmem:[%s3997_s26 + $0x1e8] sm:$0xff] %v859_v61  ;;  %862 = vst [vmem:[%s3997_s26 + $0x1f0] sm:$0xff] %v861_v62  ;;  %v869_v2 = vld [vmem:[%s3989_s25 + $0x410] sm:$0xff]  ;;  %v871_v3 = vld [vmem:[%s3989_s25 + $0x418] sm:$0xff] }
  0x32   : > { %864 = vst [vmem:[%s3997_s26 + $0x1f8] sm:$0xff] %v863_v63  ;;  %866 = vst [vmem:[%s3997_s26 + $0x200] sm:$0xff] %v865_v0  ;;  %v873_v4 = vld [vmem:[%s3989_s25 + $0x420] sm:$0xff]  ;;  %v875_v5 = vld [vmem:[%s3989_s25 + $0x428] sm:$0xff] }
  0x33   : > { %868 = vst [vmem:[%s3997_s26 + $0x208] sm:$0xff] %v867_v1  ;;  %870 = vst [vmem:[%s3997_s26 + $0x210] sm:$0xff] %v869_v2  ;;  %v877_v6 = vld [vmem:[%s3989_s25 + $0x430] sm:$0xff]  ;;  %v879_v7 = vld [vmem:[%s3989_s25 + $0x438] sm:$0xff] }
  0x34   : > { %872 = vst [vmem:[%s3997_s26 + $0x218] sm:$0xff] %v871_v3  ;;  %874 = vst [vmem:[%s3997_s26 + $0x220] sm:$0xff] %v873_v4  ;;  %v881_v8 = vld [vmem:[%s3989_s25 + $0x440] sm:$0xff]  ;;  %v883_v9 = vld [vmem:[%s3989_s25 + $0x448] sm:$0xff] }
  0x35   : > { %876 = vst [vmem:[%s3997_s26 + $0x228] sm:$0xff] %v875_v5  ;;  %878 = vst [vmem:[%s3997_s26 + $0x230] sm:$0xff] %v877_v6  ;;  %v885_v10 = vld [vmem:[%s3989_s25 + $0x450] sm:$0xff]  ;;  %v887_v11 = vld [vmem:[%s3989_s25 + $0x458] sm:$0xff] }
  0x36   : > { %880 = vst [vmem:[%s3997_s26 + $0x238] sm:$0xff] %v879_v7  ;;  %882 = vst [vmem:[%s3997_s26 + $0x240] sm:$0xff] %v881_v8  ;;  %v889_v12 = vld [vmem:[%s3989_s25 + $0x460] sm:$0xff]  ;;  %v891_v13 = vld [vmem:[%s3989_s25 + $0x468] sm:$0xff] }
  0x37   : > { %884 = vst [vmem:[%s3997_s26 + $0x248] sm:$0xff] %v883_v9  ;;  %886 = vst [vmem:[%s3997_s26 + $0x250] sm:$0xff] %v885_v10  ;;  %v893_v14 = vld [vmem:[%s3989_s25 + $0x470] sm:$0xff]  ;;  %v895_v15 = vld [vmem:[%s3989_s25 + $0x478] sm:$0xff] }
  0x38   : > { %888 = vst [vmem:[%s3997_s26 + $0x258] sm:$0xff] %v887_v11  ;;  %890 = vst [vmem:[%s3997_s26 + $0x260] sm:$0xff] %v889_v12  ;;  %v897_v16 = vld [vmem:[%s3989_s25 + $0x480] sm:$0xff]  ;;  %v899_v17 = vld [vmem:[%s3989_s25 + $0x488] sm:$0xff] }
  0x39   : > { %892 = vst [vmem:[%s3997_s26 + $0x268] sm:$0xff] %v891_v13  ;;  %894 = vst [vmem:[%s3997_s26 + $0x270] sm:$0xff] %v893_v14  ;;  %v901_v18 = vld [vmem:[%s3989_s25 + $0x490] sm:$0xff]  ;;  %v903_v19 = vld [vmem:[%s3989_s25 + $0x498] sm:$0xff] }
  0x3a   : > { %896 = vst [vmem:[%s3997_s26 + $0x278] sm:$0xff] %v895_v15  ;;  %898 = vst [vmem:[%s3997_s26 + $0x280] sm:$0xff] %v897_v16  ;;  %v905_v20 = vld [vmem:[%s3989_s25 + $0x4a0] sm:$0xff]  ;;  %v907_v21 = vld [vmem:[%s3989_s25 + $0x4a8] sm:$0xff] }
  0x3b   : > { %900 = vst [vmem:[%s3997_s26 + $0x288] sm:$0xff] %v899_v17  ;;  %902 = vst [vmem:[%s3997_s26 + $0x290] sm:$0xff] %v901_v18  ;;  %v909_v22 = vld [vmem:[%s3989_s25 + $0x4b0] sm:$0xff]  ;;  %v911_v23 = vld [vmem:[%s3989_s25 + $0x4b8] sm:$0xff] }
  0x3c   : > { %904 = vst [vmem:[%s3997_s26 + $0x298] sm:$0xff] %v903_v19  ;;  %906 = vst [vmem:[%s3997_s26 + $0x2a0] sm:$0xff] %v905_v20  ;;  %v913_v24 = vld [vmem:[%s3989_s25 + $0x4c0] sm:$0xff]  ;;  %v915_v25 = vld [vmem:[%s3989_s25 + $0x4c8] sm:$0xff] }
  0x3d   : > { %908 = vst [vmem:[%s3997_s26 + $0x2a8] sm:$0xff] %v907_v21  ;;  %910 = vst [vmem:[%s3997_s26 + $0x2b0] sm:$0xff] %v909_v22  ;;  %v917_v26 = vld [vmem:[%s3989_s25 + $0x4d0] sm:$0xff]  ;;  %v919_v27 = vld [vmem:[%s3989_s25 + $0x4d8] sm:$0xff] }
  0x3e   : > { %912 = vst [vmem:[%s3997_s26 + $0x2b8] sm:$0xff] %v911_v23  ;;  %914 = vst [vmem:[%s3997_s26 + $0x2c0] sm:$0xff] %v913_v24  ;;  %v921_v28 = vld [vmem:[%s3989_s25 + $0x4e0] sm:$0xff]  ;;  %v923_v29 = vld [vmem:[%s3989_s25 + $0x4e8] sm:$0xff] }
  0x3f   : > { %916 = vst [vmem:[%s3997_s26 + $0x2c8] sm:$0xff] %v915_v25  ;;  %918 = vst [vmem:[%s3997_s26 + $0x2d0] sm:$0xff] %v917_v26  ;;  %v925_v30 = vld [vmem:[%s3989_s25 + $0x4f0] sm:$0xff]  ;;  %v927_v31 = vld [vmem:[%s3989_s25 + $0x4f8] sm:$0xff] }
  0x40   : > { %920 = vst [vmem:[%s3997_s26 + $0x2d8] sm:$0xff] %v919_v27  ;;  %922 = vst [vmem:[%s3997_s26 + $0x2e0] sm:$0xff] %v921_v28  ;;  %v929_v32 = vld [vmem:[%s3989_s25 + $0x600] sm:$0xff]  ;;  %v931_v33 = vld [vmem:[%s3989_s25 + $0x608] sm:$0xff] }
  0x41   : > { %924 = vst [vmem:[%s3997_s26 + $0x2e8] sm:$0xff] %v923_v29  ;;  %926 = vst [vmem:[%s3997_s26 + $0x2f0] sm:$0xff] %v925_v30  ;;  %v933_v34 = vld [vmem:[%s3989_s25 + $0x610] sm:$0xff]  ;;  %v935_v35 = vld [vmem:[%s3989_s25 + $0x618] sm:$0xff] }
  0x42   : > { %928 = vst [vmem:[%s3997_s26 + $0x2f8] sm:$0xff] %v927_v31  ;;  %930 = vst [vmem:[%s3997_s26 + $0x300] sm:$0xff] %v929_v32  ;;  %v937_v36 = vld [vmem:[%s3989_s25 + $0x620] sm:$0xff]  ;;  %v939_v37 = vld [vmem:[%s3989_s25 + $0x628] sm:$0xff] }
  0x43   : > { %932 = vst [vmem:[%s3997_s26 + $0x308] sm:$0xff] %v931_v33  ;;  %934 = vst [vmem:[%s3997_s26 + $0x310] sm:$0xff] %v933_v34  ;;  %v941_v38 = vld [vmem:[%s3989_s25 + $0x630] sm:$0xff]  ;;  %v943_v39 = vld [vmem:[%s3989_s25 + $0x638] sm:$0xff] }
  0x44   : > { %936 = vst [vmem:[%s3997_s26 + $0x318] sm:$0xff] %v935_v35  ;;  %938 = vst [vmem:[%s3997_s26 + $0x320] sm:$0xff] %v937_v36  ;;  %v945_v40 = vld [vmem:[%s3989_s25 + $0x640] sm:$0xff]  ;;  %v947_v41 = vld [vmem:[%s3989_s25 + $0x648] sm:$0xff] }
  0x45   : > { %940 = vst [vmem:[%s3997_s26 + $0x328] sm:$0xff] %v939_v37  ;;  %942 = vst [vmem:[%s3997_s26 + $0x330] sm:$0xff] %v941_v38  ;;  %v949_v42 = vld [vmem:[%s3989_s25 + $0x650] sm:$0xff]  ;;  %v951_v43 = vld [vmem:[%s3989_s25 + $0x658] sm:$0xff] }
  0x46   : > { %944 = vst [vmem:[%s3997_s26 + $0x338] sm:$0xff] %v943_v39  ;;  %946 = vst [vmem:[%s3997_s26 + $0x340] sm:$0xff] %v945_v40  ;;  %v953_v44 = vld [vmem:[%s3989_s25 + $0x660] sm:$0xff]  ;;  %v955_v45 = vld [vmem:[%s3989_s25 + $0x668] sm:$0xff] }
  0x47   : > { %948 = vst [vmem:[%s3997_s26 + $0x348] sm:$0xff] %v947_v41  ;;  %950 = vst [vmem:[%s3997_s26 + $0x350] sm:$0xff] %v949_v42  ;;  %v957_v46 = vld [vmem:[%s3989_s25 + $0x670] sm:$0xff]  ;;  %v959_v47 = vld [vmem:[%s3989_s25 + $0x678] sm:$0xff] }
  0x48   : > { %952 = vst [vmem:[%s3997_s26 + $0x358] sm:$0xff] %v951_v43  ;;  %954 = vst [vmem:[%s3997_s26 + $0x360] sm:$0xff] %v953_v44  ;;  %v961_v48 = vld [vmem:[%s3989_s25 + $0x680] sm:$0xff]  ;;  %v963_v49 = vld [vmem:[%s3989_s25 + $0x688] sm:$0xff] }
  0x49   : > { %956 = vst [vmem:[%s3997_s26 + $0x368] sm:$0xff] %v955_v45  ;;  %958 = vst [vmem:[%s3997_s26 + $0x370] sm:$0xff] %v957_v46  ;;  %v965_v50 = vld [vmem:[%s3989_s25 + $0x690] sm:$0xff]  ;;  %v967_v51 = vld [vmem:[%s3989_s25 + $0x698] sm:$0xff] }
  0x4a   : > { %960 = vst [vmem:[%s3997_s26 + $0x378] sm:$0xff] %v959_v47  ;;  %962 = vst [vmem:[%s3997_s26 + $0x380] sm:$0xff] %v961_v48  ;;  %v969_v52 = vld [vmem:[%s3989_s25 + $0x6a0] sm:$0xff]  ;;  %v971_v53 = vld [vmem:[%s3989_s25 + $0x6a8] sm:$0xff] }
  0x4b   : > { %964 = vst [vmem:[%s3997_s26 + $0x388] sm:$0xff] %v963_v49  ;;  %966 = vst [vmem:[%s3997_s26 + $0x390] sm:$0xff] %v965_v50  ;;  %v973_v54 = vld [vmem:[%s3989_s25 + $0x6b0] sm:$0xff]  ;;  %v975_v55 = vld [vmem:[%s3989_s25 + $0x6b8] sm:$0xff] }
  0x4c   : > { %968 = vst [vmem:[%s3997_s26 + $0x398] sm:$0xff] %v967_v51  ;;  %970 = vst [vmem:[%s3997_s26 + $0x3a0] sm:$0xff] %v969_v52  ;;  %v977_v56 = vld [vmem:[%s3989_s25 + $0x6c0] sm:$0xff]  ;;  %v979_v57 = vld [vmem:[%s3989_s25 + $0x6c8] sm:$0xff] }
  0x4d   : > { %972 = vst [vmem:[%s3997_s26 + $0x3a8] sm:$0xff] %v971_v53  ;;  %974 = vst [vmem:[%s3997_s26 + $0x3b0] sm:$0xff] %v973_v54  ;;  %v981_v58 = vld [vmem:[%s3989_s25 + $0x6d0] sm:$0xff]  ;;  %v983_v59 = vld [vmem:[%s3989_s25 + $0x6d8] sm:$0xff] }
  0x4e   : > { %976 = vst [vmem:[%s3997_s26 + $0x3b8] sm:$0xff] %v975_v55  ;;  %978 = vst [vmem:[%s3997_s26 + $0x3c0] sm:$0xff] %v977_v56  ;;  %v985_v60 = vld [vmem:[%s3989_s25 + $0x6e0] sm:$0xff]  ;;  %v987_v61 = vld [vmem:[%s3989_s25 + $0x6e8] sm:$0xff] }
  0x4f   : > { %980 = vst [vmem:[%s3997_s26 + $0x3c8] sm:$0xff] %v979_v57  ;;  %982 = vst [vmem:[%s3997_s26 + $0x3d0] sm:$0xff] %v981_v58  ;;  %v989_v62 = vld [vmem:[%s3989_s25 + $0x6f0] sm:$0xff]  ;;  %v991_v63 = vld [vmem:[%s3989_s25 + $0x6f8] sm:$0xff] }
  0x50   : > { %984 = vst [vmem:[%s3997_s26 + $0x3d8] sm:$0xff] %v983_v59  ;;  %986 = vst [vmem:[%s3997_s26 + $0x3e0] sm:$0xff] %v985_v60  ;;  %v993_v0 = vld [vmem:[%s3989_s25 + $0x800] sm:$0xff]  ;;  %v995_v1 = vld [vmem:[%s3989_s25 + $0x808] sm:$0xff] }
  0x51   : > { %988 = vst [vmem:[%s3997_s26 + $0x3e8] sm:$0xff] %v987_v61  ;;  %990 = vst [vmem:[%s3997_s26 + $0x3f0] sm:$0xff] %v989_v62  ;;  %v997_v2 = vld [vmem:[%s3989_s25 + $0x810] sm:$0xff]  ;;  %v999_v3 = vld [vmem:[%s3989_s25 + $0x818] sm:$0xff] }
  0x52   : > { %992 = vst [vmem:[%s3997_s26 + $0x3f8] sm:$0xff] %v991_v63  ;;  %994 = vst [vmem:[%s3997_s26 + $0x400] sm:$0xff] %v993_v0  ;;  %v1001_v4 = vld [vmem:[%s3989_s25 + $0x820] sm:$0xff]  ;;  %v1003_v5 = vld [vmem:[%s3989_s25 + $0x828] sm:$0xff] }
  0x53   : > { %996 = vst [vmem:[%s3997_s26 + $0x408] sm:$0xff] %v995_v1  ;;  %998 = vst [vmem:[%s3997_s26 + $0x410] sm:$0xff] %v997_v2  ;;  %v1005_v6 = vld [vmem:[%s3989_s25 + $0x830] sm:$0xff]  ;;  %v1007_v7 = vld [vmem:[%s3989_s25 + $0x838] sm:$0xff] }
  0x54   : > { %1000 = vst [vmem:[%s3997_s26 + $0x418] sm:$0xff] %v999_v3  ;;  %1002 = vst [vmem:[%s3997_s26 + $0x420] sm:$0xff] %v1001_v4  ;;  %v1009_v8 = vld [vmem:[%s3989_s25 + $0x840] sm:$0xff]  ;;  %v1011_v9 = vld [vmem:[%s3989_s25 + $0x848] sm:$0xff] }
  0x55   : > { %1004 = vst [vmem:[%s3997_s26 + $0x428] sm:$0xff] %v1003_v5  ;;  %1006 = vst [vmem:[%s3997_s26 + $0x430] sm:$0xff] %v1005_v6  ;;  %v1013_v10 = vld [vmem:[%s3989_s25 + $0x850] sm:$0xff]  ;;  %v1015_v11 = vld [vmem:[%s3989_s25 + $0x858] sm:$0xff] }
  0x56   : > { %1008 = vst [vmem:[%s3997_s26 + $0x438] sm:$0xff] %v1007_v7  ;;  %1010 = vst [vmem:[%s3997_s26 + $0x440] sm:$0xff] %v1009_v8  ;;  %v1017_v12 = vld [vmem:[%s3989_s25 + $0x860] sm:$0xff]  ;;  %v1019_v13 = vld [vmem:[%s3989_s25 + $0x868] sm:$0xff] }
  0x57   : > { %1012 = vst [vmem:[%s3997_s26 + $0x448] sm:$0xff] %v1011_v9  ;;  %1014 = vst [vmem:[%s3997_s26 + $0x450] sm:$0xff] %v1013_v10  ;;  %v1021_v14 = vld [vmem:[%s3989_s25 + $0x870] sm:$0xff]  ;;  %v1023_v15 = vld [vmem:[%s3989_s25 + $0x878] sm:$0xff] }
  0x58   : > { %1016 = vst [vmem:[%s3997_s26 + $0x458] sm:$0xff] %v1015_v11  ;;  %1018 = vst [vmem:[%s3997_s26 + $0x460] sm:$0xff] %v1017_v12  ;;  %v1025_v16 = vld [vmem:[%s3989_s25 + $0x880] sm:$0xff]  ;;  %v1027_v17 = vld [vmem:[%s3989_s25 + $0x888] sm:$0xff] }
  0x59   : > { %1020 = vst [vmem:[%s3997_s26 + $0x468] sm:$0xff] %v1019_v13  ;;  %1022 = vst [vmem:[%s3997_s26 + $0x470] sm:$0xff] %v1021_v14  ;;  %v1029_v18 = vld [vmem:[%s3989_s25 + $0x890] sm:$0xff]  ;;  %v1031_v19 = vld [vmem:[%s3989_s25 + $0x898] sm:$0xff] }
  0x5a   : > { %1024 = vst [vmem:[%s3997_s26 + $0x478] sm:$0xff] %v1023_v15  ;;  %1026 = vst [vmem:[%s3997_s26 + $0x480] sm:$0xff] %v1025_v16  ;;  %v1033_v20 = vld [vmem:[%s3989_s25 + $0x8a0] sm:$0xff]  ;;  %v1035_v21 = vld [vmem:[%s3989_s25 + $0x8a8] sm:$0xff] }
  0x5b   : > { %1028 = vst [vmem:[%s3997_s26 + $0x488] sm:$0xff] %v1027_v17  ;;  %1030 = vst [vmem:[%s3997_s26 + $0x490] sm:$0xff] %v1029_v18  ;;  %v1037_v22 = vld [vmem:[%s3989_s25 + $0x8b0] sm:$0xff]  ;;  %v1039_v23 = vld [vmem:[%s3989_s25 + $0x8b8] sm:$0xff] }
  0x5c   : > { %1032 = vst [vmem:[%s3997_s26 + $0x498] sm:$0xff] %v1031_v19  ;;  %1034 = vst [vmem:[%s3997_s26 + $0x4a0] sm:$0xff] %v1033_v20  ;;  %v1041_v24 = vld [vmem:[%s3989_s25 + $0x8c0] sm:$0xff]  ;;  %v1043_v25 = vld [vmem:[%s3989_s25 + $0x8c8] sm:$0xff] }
  0x5d   : > { %1036 = vst [vmem:[%s3997_s26 + $0x4a8] sm:$0xff] %v1035_v21  ;;  %1038 = vst [vmem:[%s3997_s26 + $0x4b0] sm:$0xff] %v1037_v22  ;;  %v1045_v26 = vld [vmem:[%s3989_s25 + $0x8d0] sm:$0xff]  ;;  %v1047_v27 = vld [vmem:[%s3989_s25 + $0x8d8] sm:$0xff] }
  0x5e   : > { %1040 = vst [vmem:[%s3997_s26 + $0x4b8] sm:$0xff] %v1039_v23  ;;  %1042 = vst [vmem:[%s3997_s26 + $0x4c0] sm:$0xff] %v1041_v24  ;;  %v1049_v28 = vld [vmem:[%s3989_s25 + $0x8e0] sm:$0xff]  ;;  %v1051_v29 = vld [vmem:[%s3989_s25 + $0x8e8] sm:$0xff] }
  0x5f   : > { %1044 = vst [vmem:[%s3997_s26 + $0x4c8] sm:$0xff] %v1043_v25  ;;  %1046 = vst [vmem:[%s3997_s26 + $0x4d0] sm:$0xff] %v1045_v26  ;;  %v1053_v30 = vld [vmem:[%s3989_s25 + $0x8f0] sm:$0xff]  ;;  %v1055_v31 = vld [vmem:[%s3989_s25 + $0x8f8] sm:$0xff] }
  0x60   : > { %1048 = vst [vmem:[%s3997_s26 + $0x4d8] sm:$0xff] %v1047_v27  ;;  %1050 = vst [vmem:[%s3997_s26 + $0x4e0] sm:$0xff] %v1049_v28  ;;  %v1057_v32 = vld [vmem:[%s3989_s25 + $0xa00] sm:$0xff]  ;;  %v1059_v33 = vld [vmem:[%s3989_s25 + $0xa08] sm:$0xff] }
  0x61   : > { %1052 = vst [vmem:[%s3997_s26 + $0x4e8] sm:$0xff] %v1051_v29  ;;  %1054 = vst [vmem:[%s3997_s26 + $0x4f0] sm:$0xff] %v1053_v30  ;;  %v1061_v34 = vld [vmem:[%s3989_s25 + $0xa10] sm:$0xff]  ;;  %v1063_v35 = vld [vmem:[%s3989_s25 + $0xa18] sm:$0xff] }
  0x62   : > { %1056 = vst [vmem:[%s3997_s26 + $0x4f8] sm:$0xff] %v1055_v31  ;;  %1058 = vst [vmem:[%s3997_s26 + $0x500] sm:$0xff] %v1057_v32  ;;  %v1065_v36 = vld [vmem:[%s3989_s25 + $0xa20] sm:$0xff]  ;;  %v1067_v37 = vld [vmem:[%s3989_s25 + $0xa28] sm:$0xff] }
  0x63   : > { %1060 = vst [vmem:[%s3997_s26 + $0x508] sm:$0xff] %v1059_v33  ;;  %1062 = vst [vmem:[%s3997_s26 + $0x510] sm:$0xff] %v1061_v34  ;;  %v1069_v38 = vld [vmem:[%s3989_s25 + $0xa30] sm:$0xff]  ;;  %v1071_v39 = vld [vmem:[%s3989_s25 + $0xa38] sm:$0xff] }
  0x64   : > { %1064 = vst [vmem:[%s3997_s26 + $0x518] sm:$0xff] %v1063_v35  ;;  %1066 = vst [vmem:[%s3997_s26 + $0x520] sm:$0xff] %v1065_v36  ;;  %v1073_v40 = vld [vmem:[%s3989_s25 + $0xa40] sm:$0xff]  ;;  %v1075_v41 = vld [vmem:[%s3989_s25 + $0xa48] sm:$0xff] }
  0x65   : > { %1068 = vst [vmem:[%s3997_s26 + $0x528] sm:$0xff] %v1067_v37  ;;  %1070 = vst [vmem:[%s3997_s26 + $0x530] sm:$0xff] %v1069_v38  ;;  %v1077_v42 = vld [vmem:[%s3989_s25 + $0xa50] sm:$0xff]  ;;  %v1079_v43 = vld [vmem:[%s3989_s25 + $0xa58] sm:$0xff] }
  0x66   : > { %1072 = vst [vmem:[%s3997_s26 + $0x538] sm:$0xff] %v1071_v39  ;;  %1074 = vst [vmem:[%s3997_s26 + $0x540] sm:$0xff] %v1073_v40  ;;  %v1081_v44 = vld [vmem:[%s3989_s25 + $0xa60] sm:$0xff]  ;;  %v1083_v45 = vld [vmem:[%s3989_s25 + $0xa68] sm:$0xff] }
  0x67   : > { %1076 = vst [vmem:[%s3997_s26 + $0x548] sm:$0xff] %v1075_v41  ;;  %1078 = vst [vmem:[%s3997_s26 + $0x550] sm:$0xff] %v1077_v42  ;;  %v1085_v46 = vld [vmem:[%s3989_s25 + $0xa70] sm:$0xff]  ;;  %v1087_v47 = vld [vmem:[%s3989_s25 + $0xa78] sm:$0xff] }
  0x68   : > { %1080 = vst [vmem:[%s3997_s26 + $0x558] sm:$0xff] %v1079_v43  ;;  %1082 = vst [vmem:[%s3997_s26 + $0x560] sm:$0xff] %v1081_v44  ;;  %v1089_v48 = vld [vmem:[%s3989_s25 + $0xa80] sm:$0xff]  ;;  %v1091_v49 = vld [vmem:[%s3989_s25 + $0xa88] sm:$0xff] }
  0x69   : > { %1084 = vst [vmem:[%s3997_s26 + $0x568] sm:$0xff] %v1083_v45  ;;  %1086 = vst [vmem:[%s3997_s26 + $0x570] sm:$0xff] %v1085_v46  ;;  %v1093_v50 = vld [vmem:[%s3989_s25 + $0xa90] sm:$0xff]  ;;  %v1095_v51 = vld [vmem:[%s3989_s25 + $0xa98] sm:$0xff] }
  0x6a   : > { %1088 = vst [vmem:[%s3997_s26 + $0x578] sm:$0xff] %v1087_v47  ;;  %1090 = vst [vmem:[%s3997_s26 + $0x580] sm:$0xff] %v1089_v48  ;;  %v1097_v52 = vld [vmem:[%s3989_s25 + $0xaa0] sm:$0xff]  ;;  %v1099_v53 = vld [vmem:[%s3989_s25 + $0xaa8] sm:$0xff] }
  0x6b   : > { %1092 = vst [vmem:[%s3997_s26 + $0x588] sm:$0xff] %v1091_v49  ;;  %1094 = vst [vmem:[%s3997_s26 + $0x590] sm:$0xff] %v1093_v50  ;;  %v1101_v54 = vld [vmem:[%s3989_s25 + $0xab0] sm:$0xff]  ;;  %v1103_v55 = vld [vmem:[%s3989_s25 + $0xab8] sm:$0xff] }
  0x6c   : > { %1096 = vst [vmem:[%s3997_s26 + $0x598] sm:$0xff] %v1095_v51  ;;  %1098 = vst [vmem:[%s3997_s26 + $0x5a0] sm:$0xff] %v1097_v52  ;;  %v1105_v56 = vld [vmem:[%s3989_s25 + $0xac0] sm:$0xff]  ;;  %v1107_v57 = vld [vmem:[%s3989_s25 + $0xac8] sm:$0xff] }
  0x6d   : > { %1100 = vst [vmem:[%s3997_s26 + $0x5a8] sm:$0xff] %v1099_v53  ;;  %1102 = vst [vmem:[%s3997_s26 + $0x5b0] sm:$0xff] %v1101_v54  ;;  %v1109_v58 = vld [vmem:[%s3989_s25 + $0xad0] sm:$0xff]  ;;  %v1111_v59 = vld [vmem:[%s3989_s25 + $0xad8] sm:$0xff] }
  0x6e   : > { %1104 = vst [vmem:[%s3997_s26 + $0x5b8] sm:$0xff] %v1103_v55  ;;  %1106 = vst [vmem:[%s3997_s26 + $0x5c0] sm:$0xff] %v1105_v56  ;;  %v1113_v60 = vld [vmem:[%s3989_s25 + $0xae0] sm:$0xff]  ;;  %v1115_v61 = vld [vmem:[%s3989_s25 + $0xae8] sm:$0xff] }
  0x6f   : > { %1108 = vst [vmem:[%s3997_s26 + $0x5c8] sm:$0xff] %v1107_v57  ;;  %1110 = vst [vmem:[%s3997_s26 + $0x5d0] sm:$0xff] %v1109_v58  ;;  %v1117_v62 = vld [vmem:[%s3989_s25 + $0xaf0] sm:$0xff]  ;;  %v1119_v63 = vld [vmem:[%s3989_s25 + $0xaf8] sm:$0xff] }
  0x70   : > { %1112 = vst [vmem:[%s3997_s26 + $0x5d8] sm:$0xff] %v1111_v59  ;;  %1114 = vst [vmem:[%s3997_s26 + $0x5e0] sm:$0xff] %v1113_v60  ;;  %v1121_v0 = vld [vmem:[%s3989_s25 + $0xc00] sm:$0xff]  ;;  %v1123_v1 = vld [vmem:[%s3989_s25 + $0xc08] sm:$0xff] }
  0x71   : > { %1116 = vst [vmem:[%s3997_s26 + $0x5e8] sm:$0xff] %v1115_v61  ;;  %1118 = vst [vmem:[%s3997_s26 + $0x5f0] sm:$0xff] %v1117_v62  ;;  %v1125_v2 = vld [vmem:[%s3989_s25 + $0xc10] sm:$0xff]  ;;  %v1127_v3 = vld [vmem:[%s3989_s25 + $0xc18] sm:$0xff] }
  0x72   : > { %1120 = vst [vmem:[%s3997_s26 + $0x5f8] sm:$0xff] %v1119_v63  ;;  %1122 = vst [vmem:[%s3997_s26 + $0x600] sm:$0xff] %v1121_v0  ;;  %v1129_v4 = vld [vmem:[%s3989_s25 + $0xc20] sm:$0xff]  ;;  %v1131_v5 = vld [vmem:[%s3989_s25 + $0xc28] sm:$0xff] }
  0x73   : > { %1124 = vst [vmem:[%s3997_s26 + $0x608] sm:$0xff] %v1123_v1  ;;  %1126 = vst [vmem:[%s3997_s26 + $0x610] sm:$0xff] %v1125_v2  ;;  %v1133_v6 = vld [vmem:[%s3989_s25 + $0xc30] sm:$0xff]  ;;  %v1135_v7 = vld [vmem:[%s3989_s25 + $0xc38] sm:$0xff] }
  0x74   : > { %1128 = vst [vmem:[%s3997_s26 + $0x618] sm:$0xff] %v1127_v3  ;;  %1130 = vst [vmem:[%s3997_s26 + $0x620] sm:$0xff] %v1129_v4  ;;  %v1137_v8 = vld [vmem:[%s3989_s25 + $0xc40] sm:$0xff]  ;;  %v1139_v9 = vld [vmem:[%s3989_s25 + $0xc48] sm:$0xff] }
  0x75   : > { %1132 = vst [vmem:[%s3997_s26 + $0x628] sm:$0xff] %v1131_v5  ;;  %1134 = vst [vmem:[%s3997_s26 + $0x630] sm:$0xff] %v1133_v6  ;;  %v1141_v10 = vld [vmem:[%s3989_s25 + $0xc50] sm:$0xff]  ;;  %v1143_v11 = vld [vmem:[%s3989_s25 + $0xc58] sm:$0xff] }
  0x76   : > { %1136 = vst [vmem:[%s3997_s26 + $0x638] sm:$0xff] %v1135_v7  ;;  %1138 = vst [vmem:[%s3997_s26 + $0x640] sm:$0xff] %v1137_v8  ;;  %v1145_v12 = vld [vmem:[%s3989_s25 + $0xc60] sm:$0xff]  ;;  %v1147_v13 = vld [vmem:[%s3989_s25 + $0xc68] sm:$0xff] }
  0x77   : > { %1140 = vst [vmem:[%s3997_s26 + $0x648] sm:$0xff] %v1139_v9  ;;  %1142 = vst [vmem:[%s3997_s26 + $0x650] sm:$0xff] %v1141_v10  ;;  %v1149_v14 = vld [vmem:[%s3989_s25 + $0xc70] sm:$0xff]  ;;  %v1151_v15 = vld [vmem:[%s3989_s25 + $0xc78] sm:$0xff] }
  0x78   : > { %1144 = vst [vmem:[%s3997_s26 + $0x658] sm:$0xff] %v1143_v11  ;;  %1146 = vst [vmem:[%s3997_s26 + $0x660] sm:$0xff] %v1145_v12  ;;  %v1153_v16 = vld [vmem:[%s3989_s25 + $0xc80] sm:$0xff]  ;;  %v1155_v17 = vld [vmem:[%s3989_s25 + $0xc88] sm:$0xff] }
  0x79   : > { %1148 = vst [vmem:[%s3997_s26 + $0x668] sm:$0xff] %v1147_v13  ;;  %1150 = vst [vmem:[%s3997_s26 + $0x670] sm:$0xff] %v1149_v14  ;;  %v1157_v18 = vld [vmem:[%s3989_s25 + $0xc90] sm:$0xff]  ;;  %v1159_v19 = vld [vmem:[%s3989_s25 + $0xc98] sm:$0xff] }
  0x7a   : > { %1152 = vst [vmem:[%s3997_s26 + $0x678] sm:$0xff] %v1151_v15  ;;  %1154 = vst [vmem:[%s3997_s26 + $0x680] sm:$0xff] %v1153_v16  ;;  %v1161_v20 = vld [vmem:[%s3989_s25 + $0xca0] sm:$0xff]  ;;  %v1163_v21 = vld [vmem:[%s3989_s25 + $0xca8] sm:$0xff] }
  0x7b   : > { %1156 = vst [vmem:[%s3997_s26 + $0x688] sm:$0xff] %v1155_v17  ;;  %1158 = vst [vmem:[%s3997_s26 + $0x690] sm:$0xff] %v1157_v18  ;;  %v1165_v22 = vld [vmem:[%s3989_s25 + $0xcb0] sm:$0xff]  ;;  %v1167_v23 = vld [vmem:[%s3989_s25 + $0xcb8] sm:$0xff] }
  0x7c   : > { %1160 = vst [vmem:[%s3997_s26 + $0x698] sm:$0xff] %v1159_v19  ;;  %1162 = vst [vmem:[%s3997_s26 + $0x6a0] sm:$0xff] %v1161_v20  ;;  %v1169_v24 = vld [vmem:[%s3989_s25 + $0xcc0] sm:$0xff]  ;;  %v1171_v25 = vld [vmem:[%s3989_s25 + $0xcc8] sm:$0xff] }
  0x7d   : > { %1164 = vst [vmem:[%s3997_s26 + $0x6a8] sm:$0xff] %v1163_v21  ;;  %1166 = vst [vmem:[%s3997_s26 + $0x6b0] sm:$0xff] %v1165_v22  ;;  %v1173_v26 = vld [vmem:[%s3989_s25 + $0xcd0] sm:$0xff]  ;;  %v1175_v27 = vld [vmem:[%s3989_s25 + $0xcd8] sm:$0xff] }
  0x7e   : > { %1168 = vst [vmem:[%s3997_s26 + $0x6b8] sm:$0xff] %v1167_v23  ;;  %1170 = vst [vmem:[%s3997_s26 + $0x6c0] sm:$0xff] %v1169_v24  ;;  %v1177_v28 = vld [vmem:[%s3989_s25 + $0xce0] sm:$0xff]  ;;  %v1179_v29 = vld [vmem:[%s3989_s25 + $0xce8] sm:$0xff] }
  0x7f   : > { %1172 = vst [vmem:[%s3997_s26 + $0x6c8] sm:$0xff] %v1171_v25  ;;  %1174 = vst [vmem:[%s3997_s26 + $0x6d0] sm:$0xff] %v1173_v26  ;;  %v1181_v30 = vld [vmem:[%s3989_s25 + $0xcf0] sm:$0xff]  ;;  %v1183_v31 = vld [vmem:[%s3989_s25 + $0xcf8] sm:$0xff] }
  0x80   : > { %1176 = vst [vmem:[%s3997_s26 + $0x6d8] sm:$0xff] %v1175_v27  ;;  %1178 = vst [vmem:[%s3997_s26 + $0x6e0] sm:$0xff] %v1177_v28  ;;  %v1185_v32 = vld [vmem:[%s3989_s25 + $0xe00] sm:$0xff]  ;;  %v1187_v33 = vld [vmem:[%s3989_s25 + $0xe08] sm:$0xff] }
  0x81   : > { %1180 = vst [vmem:[%s3997_s26 + $0x6e8] sm:$0xff] %v1179_v29  ;;  %1182 = vst [vmem:[%s3997_s26 + $0x6f0] sm:$0xff] %v1181_v30  ;;  %v1189_v34 = vld [vmem:[%s3989_s25 + $0xe10] sm:$0xff]  ;;  %v1191_v35 = vld [vmem:[%s3989_s25 + $0xe18] sm:$0xff] }
  0x82   : > { %1184 = vst [vmem:[%s3997_s26 + $0x6f8] sm:$0xff] %v1183_v31  ;;  %1186 = vst [vmem:[%s3997_s26 + $0x700] sm:$0xff] %v1185_v32  ;;  %v1193_v36 = vld [vmem:[%s3989_s25 + $0xe20] sm:$0xff]  ;;  %v1195_v37 = vld [vmem:[%s3989_s25 + $0xe28] sm:$0xff] }
  0x83   : > { %1188 = vst [vmem:[%s3997_s26 + $0x708] sm:$0xff] %v1187_v33  ;;  %1190 = vst [vmem:[%s3997_s26 + $0x710] sm:$0xff] %v1189_v34  ;;  %v1197_v38 = vld [vmem:[%s3989_s25 + $0xe30] sm:$0xff]  ;;  %v1199_v39 = vld [vmem:[%s3989_s25 + $0xe38] sm:$0xff] }
  0x84   : > { %1192 = vst [vmem:[%s3997_s26 + $0x718] sm:$0xff] %v1191_v35  ;;  %1194 = vst [vmem:[%s3997_s26 + $0x720] sm:$0xff] %v1193_v36  ;;  %v1201_v40 = vld [vmem:[%s3989_s25 + $0xe40] sm:$0xff]  ;;  %v1203_v41 = vld [vmem:[%s3989_s25 + $0xe48] sm:$0xff] }
  0x85   : > { %1196 = vst [vmem:[%s3997_s26 + $0x728] sm:$0xff] %v1195_v37  ;;  %1198 = vst [vmem:[%s3997_s26 + $0x730] sm:$0xff] %v1197_v38  ;;  %v1205_v42 = vld [vmem:[%s3989_s25 + $0xe50] sm:$0xff]  ;;  %v1207_v43 = vld [vmem:[%s3989_s25 + $0xe58] sm:$0xff] }
  0x86   : > { %1200 = vst [vmem:[%s3997_s26 + $0x738] sm:$0xff] %v1199_v39  ;;  %1202 = vst [vmem:[%s3997_s26 + $0x740] sm:$0xff] %v1201_v40  ;;  %v1209_v44 = vld [vmem:[%s3989_s25 + $0xe60] sm:$0xff]  ;;  %v1211_v45 = vld [vmem:[%s3989_s25 + $0xe68] sm:$0xff] }
  0x87   : > { %1204 = vst [vmem:[%s3997_s26 + $0x748] sm:$0xff] %v1203_v41  ;;  %1206 = vst [vmem:[%s3997_s26 + $0x750] sm:$0xff] %v1205_v42  ;;  %v1213_v46 = vld [vmem:[%s3989_s25 + $0xe70] sm:$0xff]  ;;  %v1215_v47 = vld [vmem:[%s3989_s25 + $0xe78] sm:$0xff] }
  0x88   : > { %1208 = vst [vmem:[%s3997_s26 + $0x758] sm:$0xff] %v1207_v43  ;;  %1210 = vst [vmem:[%s3997_s26 + $0x760] sm:$0xff] %v1209_v44  ;;  %v1217_v48 = vld [vmem:[%s3989_s25 + $0xe80] sm:$0xff]  ;;  %v1219_v49 = vld [vmem:[%s3989_s25 + $0xe88] sm:$0xff] }
  0x89   : > { %1212 = vst [vmem:[%s3997_s26 + $0x768] sm:$0xff] %v1211_v45  ;;  %1214 = vst [vmem:[%s3997_s26 + $0x770] sm:$0xff] %v1213_v46  ;;  %v1221_v50 = vld [vmem:[%s3989_s25 + $0xe90] sm:$0xff]  ;;  %v1223_v51 = vld [vmem:[%s3989_s25 + $0xe98] sm:$0xff] }
  0x8a   : > { %1216 = vst [vmem:[%s3997_s26 + $0x778] sm:$0xff] %v1215_v47  ;;  %1218 = vst [vmem:[%s3997_s26 + $0x780] sm:$0xff] %v1217_v48  ;;  %v1225_v52 = vld [vmem:[%s3989_s25 + $0xea0] sm:$0xff]  ;;  %v1227_v53 = vld [vmem:[%s3989_s25 + $0xea8] sm:$0xff] }
  0x8b   : > { %1220 = vst [vmem:[%s3997_s26 + $0x788] sm:$0xff] %v1219_v49  ;;  %1222 = vst [vmem:[%s3997_s26 + $0x790] sm:$0xff] %v1221_v50  ;;  %v1229_v54 = vld [vmem:[%s3989_s25 + $0xeb0] sm:$0xff]  ;;  %v1231_v55 = vld [vmem:[%s3989_s25 + $0xeb8] sm:$0xff] }
  0x8c   : > { %1224 = vst [vmem:[%s3997_s26 + $0x798] sm:$0xff] %v1223_v51  ;;  %1226 = vst [vmem:[%s3997_s26 + $0x7a0] sm:$0xff] %v1225_v52  ;;  %v1233_v56 = vld [vmem:[%s3989_s25 + $0xec0] sm:$0xff]  ;;  %v1235_v57 = vld [vmem:[%s3989_s25 + $0xec8] sm:$0xff] }
  0x8d   : > { %1228 = vst [vmem:[%s3997_s26 + $0x7a8] sm:$0xff] %v1227_v53  ;;  %1230 = vst [vmem:[%s3997_s26 + $0x7b0] sm:$0xff] %v1229_v54  ;;  %v1237_v58 = vld [vmem:[%s3989_s25 + $0xed0] sm:$0xff]  ;;  %v1239_v59 = vld [vmem:[%s3989_s25 + $0xed8] sm:$0xff] }
  0x8e   : > { %1232 = vst [vmem:[%s3997_s26 + $0x7b8] sm:$0xff] %v1231_v55  ;;  %1234 = vst [vmem:[%s3997_s26 + $0x7c0] sm:$0xff] %v1233_v56  ;;  %v1241_v60 = vld [vmem:[%s3989_s25 + $0xee0] sm:$0xff]  ;;  %v1243_v61 = vld [vmem:[%s3989_s25 + $0xee8] sm:$0xff] }
  0x8f   : > { %1236 = vst [vmem:[%s3997_s26 + $0x7c8] sm:$0xff] %v1235_v57  ;;  %1238 = vst [vmem:[%s3997_s26 + $0x7d0] sm:$0xff] %v1237_v58  ;;  %v1245_v62 = vld [vmem:[%s3989_s25 + $0xef0] sm:$0xff]  ;;  %v1247_v63 = vld [vmem:[%s3989_s25 + $0xef8] sm:$0xff] }
  0x90   : > { %1240 = vst [vmem:[%s3997_s26 + $0x7d8] sm:$0xff] %v1239_v59  ;;  %1242 = vst [vmem:[%s3997_s26 + $0x7e0] sm:$0xff] %v1241_v60  ;;  %v1249_v0 = vld [vmem:[%s3989_s25 + $0x1000] sm:$0xff]  ;;  %v1251_v1 = vld [vmem:[%s3989_s25 + $0x1008] sm:$0xff] }
  0x91   : > { %1244 = vst [vmem:[%s3997_s26 + $0x7e8] sm:$0xff] %v1243_v61  ;;  %1246 = vst [vmem:[%s3997_s26 + $0x7f0] sm:$0xff] %v1245_v62  ;;  %v1253_v2 = vld [vmem:[%s3989_s25 + $0x1010] sm:$0xff]  ;;  %v1255_v3 = vld [vmem:[%s3989_s25 + $0x1018] sm:$0xff] }
  0x92   : > { %1248 = vst [vmem:[%s3997_s26 + $0x7f8] sm:$0xff] %v1247_v63  ;;  %1250 = vst [vmem:[%s3997_s26 + $0x800] sm:$0xff] %v1249_v0  ;;  %v1257_v4 = vld [vmem:[%s3989_s25 + $0x1020] sm:$0xff]  ;;  %v1259_v5 = vld [vmem:[%s3989_s25 + $0x1028] sm:$0xff] }
  0x93   : > { %1252 = vst [vmem:[%s3997_s26 + $0x808] sm:$0xff] %v1251_v1  ;;  %1254 = vst [vmem:[%s3997_s26 + $0x810] sm:$0xff] %v1253_v2  ;;  %v1261_v6 = vld [vmem:[%s3989_s25 + $0x1030] sm:$0xff]  ;;  %v1263_v7 = vld [vmem:[%s3989_s25 + $0x1038] sm:$0xff] }
  0x94   : > { %1256 = vst [vmem:[%s3997_s26 + $0x818] sm:$0xff] %v1255_v3  ;;  %1258 = vst [vmem:[%s3997_s26 + $0x820] sm:$0xff] %v1257_v4  ;;  %v1265_v8 = vld [vmem:[%s3989_s25 + $0x1040] sm:$0xff]  ;;  %v1267_v9 = vld [vmem:[%s3989_s25 + $0x1048] sm:$0xff] }
  0x95   : > { %1260 = vst [vmem:[%s3997_s26 + $0x828] sm:$0xff] %v1259_v5  ;;  %1262 = vst [vmem:[%s3997_s26 + $0x830] sm:$0xff] %v1261_v6  ;;  %v1269_v10 = vld [vmem:[%s3989_s25 + $0x1050] sm:$0xff]  ;;  %v1271_v11 = vld [vmem:[%s3989_s25 + $0x1058] sm:$0xff] }
  0x96   : > { %1264 = vst [vmem:[%s3997_s26 + $0x838] sm:$0xff] %v1263_v7  ;;  %1266 = vst [vmem:[%s3997_s26 + $0x840] sm:$0xff] %v1265_v8  ;;  %v1273_v12 = vld [vmem:[%s3989_s25 + $0x1060] sm:$0xff]  ;;  %v1275_v13 = vld [vmem:[%s3989_s25 + $0x1068] sm:$0xff] }
  0x97   : > { %1268 = vst [vmem:[%s3997_s26 + $0x848] sm:$0xff] %v1267_v9  ;;  %1270 = vst [vmem:[%s3997_s26 + $0x850] sm:$0xff] %v1269_v10  ;;  %v1277_v14 = vld [vmem:[%s3989_s25 + $0x1070] sm:$0xff]  ;;  %v1279_v15 = vld [vmem:[%s3989_s25 + $0x1078] sm:$0xff] }
  0x98   : > { %1272 = vst [vmem:[%s3997_s26 + $0x858] sm:$0xff] %v1271_v11  ;;  %1274 = vst [vmem:[%s3997_s26 + $0x860] sm:$0xff] %v1273_v12  ;;  %v1281_v16 = vld [vmem:[%s3989_s25 + $0x1080] sm:$0xff]  ;;  %v1283_v17 = vld [vmem:[%s3989_s25 + $0x1088] sm:$0xff] }
  0x99   : > { %1276 = vst [vmem:[%s3997_s26 + $0x868] sm:$0xff] %v1275_v13  ;;  %1278 = vst [vmem:[%s3997_s26 + $0x870] sm:$0xff] %v1277_v14  ;;  %v1285_v18 = vld [vmem:[%s3989_s25 + $0x1090] sm:$0xff]  ;;  %v1287_v19 = vld [vmem:[%s3989_s25 + $0x1098] sm:$0xff] }
  0x9a   : > { %1280 = vst [vmem:[%s3997_s26 + $0x878] sm:$0xff] %v1279_v15  ;;  %1282 = vst [vmem:[%s3997_s26 + $0x880] sm:$0xff] %v1281_v16  ;;  %v1289_v20 = vld [vmem:[%s3989_s25 + $0x10a0] sm:$0xff]  ;;  %v1291_v21 = vld [vmem:[%s3989_s25 + $0x10a8] sm:$0xff] }
  0x9b   : > { %1284 = vst [vmem:[%s3997_s26 + $0x888] sm:$0xff] %v1283_v17  ;;  %1286 = vst [vmem:[%s3997_s26 + $0x890] sm:$0xff] %v1285_v18  ;;  %v1293_v22 = vld [vmem:[%s3989_s25 + $0x10b0] sm:$0xff]  ;;  %v1295_v23 = vld [vmem:[%s3989_s25 + $0x10b8] sm:$0xff] }
  0x9c   : > { %1288 = vst [vmem:[%s3997_s26 + $0x898] sm:$0xff] %v1287_v19  ;;  %1290 = vst [vmem:[%s3997_s26 + $0x8a0] sm:$0xff] %v1289_v20  ;;  %v1297_v24 = vld [vmem:[%s3989_s25 + $0x10c0] sm:$0xff]  ;;  %v1299_v25 = vld [vmem:[%s3989_s25 + $0x10c8] sm:$0xff] }
  0x9d   : > { %1292 = vst [vmem:[%s3997_s26 + $0x8a8] sm:$0xff] %v1291_v21  ;;  %1294 = vst [vmem:[%s3997_s26 + $0x8b0] sm:$0xff] %v1293_v22  ;;  %v1301_v26 = vld [vmem:[%s3989_s25 + $0x10d0] sm:$0xff]  ;;  %v1303_v27 = vld [vmem:[%s3989_s25 + $0x10d8] sm:$0xff] }
  0x9e   : > { %1296 = vst [vmem:[%s3997_s26 + $0x8b8] sm:$0xff] %v1295_v23  ;;  %1298 = vst [vmem:[%s3997_s26 + $0x8c0] sm:$0xff] %v1297_v24  ;;  %v1305_v28 = vld [vmem:[%s3989_s25 + $0x10e0] sm:$0xff]  ;;  %v1307_v29 = vld [vmem:[%s3989_s25 + $0x10e8] sm:$0xff] }
  0x9f   : > { %1300 = vst [vmem:[%s3997_s26 + $0x8c8] sm:$0xff] %v1299_v25  ;;  %1302 = vst [vmem:[%s3997_s26 + $0x8d0] sm:$0xff] %v1301_v26  ;;  %v1309_v30 = vld [vmem:[%s3989_s25 + $0x10f0] sm:$0xff]  ;;  %v1311_v31 = vld [vmem:[%s3989_s25 + $0x10f8] sm:$0xff] }
  0xa0   : > { %1304 = vst [vmem:[%s3997_s26 + $0x8d8] sm:$0xff] %v1303_v27  ;;  %1306 = vst [vmem:[%s3997_s26 + $0x8e0] sm:$0xff] %v1305_v28 }
  0xa1   : > { %1308 = vst [vmem:[%s3997_s26 + $0x8e8] sm:$0xff] %v1307_v29  ;;  %1310 = vst [vmem:[%s3997_s26 + $0x8f0] sm:$0xff] %v1309_v30 }
  0xa2   : > { %1312 = vst [vmem:[%s3997_s26 + $0x8f8] sm:$0xff] %v1311_v31 }
  0xa3 PF: > { %p3500_p5 = scmp.ge.s32.totalorder %s3924_s14, 1  ;;  %p1317_p6 = scmp.lt.s32.totalorder %s3924_s14, 3 }
  0xa5   : > { %p1318_p7 = pnand %p3500_p5, %p1317_p6 }
  0xa6   : > { %s1324_s27 = sand.u32 (!%p1318_p7), 1, %s3916_s12   ;;  %s3501_s28 = sshll.u32 (!%p1318_p7), %s3494_s15, 5 }
  0xa7   : > { %1321 = sbr.rel (%p1318_p7) target bundleno = 1066 (0x42a), region = 62  ;;  %p1349_p8 = scmp.lt.s32.totalorder (!%p1318_p7), %s3501_s28, 63 }
  0xa8   : > { %s3860_s29 = smul.u32 (!%p1318_p7), 2304, %s1324_s27  ;;  %p3503_p9 = scmp.ne.s32.totalorder (!%p1318_p7), %s3494_s15, 0 }
  0xaa   : > { %s4579_s7 = scalar_lea.vmem (!%p1318_p7), [#allocation3], %s3860_s29 }
  0xae   : > { %s5504_s28 = smov (!%p1349_p8, %s3501_s28), 63  ;;  %1358 = sbr.rel (%p3503_p9) target bundleno = 193 (0xc1), region = 70 }
  0xaf   : > { %s3502_s30 = sshll.u32 %s5504_s28, 3  ;;  %v3926_v32 = vmov (!%p3503_p9), 0.0  }
  0xb0   : > { %s4577_s6 = scalar_lea.vmem %s5498_s2, %s3502_s30  ;;  %1359 = vst [vmem:[#allocation2] sm:$0xff] (!%p3503_p9), %v3926_v32  ;;  %1360 = vst [vmem:[#allocation2 + $0x8] sm:$0xff] (!%p3503_p9), %v3926_v32 }
  0xb1   : > { %1361 = vst [vmem:[#allocation2 + $0x10] sm:$0xff] (!%p3503_p9), %v3926_v32  ;;  %1362 = vst [vmem:[#allocation2 + $0x18] sm:$0xff] (!%p3503_p9), %v3926_v32 }
  0xb2   : > { %1363 = vst [vmem:[#allocation2 + $0x20] sm:$0xff] (!%p3503_p9), %v3926_v32  ;;  %1364 = vst [vmem:[#allocation2 + $0x28] sm:$0xff] (!%p3503_p9), %v3926_v32 }
  0xb3   : > { %1365 = vst [vmem:[#allocation2 + $0x30] sm:$0xff] (!%p3503_p9), %v3926_v32  ;;  %1366 = vst [vmem:[#allocation2 + $0x38] sm:$0xff] (!%p3503_p9), %v3926_v32 }
  0xb4   : > { %1367 = vst [vmem:[#allocation2 + $0x40] sm:$0xff] (!%p3503_p9), %v3926_v32  ;;  %1368 = vst [vmem:[#allocation2 + $0x48] sm:$0xff] (!%p3503_p9), %v3926_v32 }
  0xb5   : > { %1369 = vst [vmem:[#allocation2 + $0x50] sm:$0xff] %v3926_v32  ;;  %1370 = vst [vmem:[#allocation2 + $0x58] sm:$0xff] %v3926_v32 }
  0xb6   : > { %1371 = vst [vmem:[#allocation2 + $0x60] sm:$0xff] %v3926_v32  ;;  %1372 = vst [vmem:[#allocation2 + $0x68] sm:$0xff] %v3926_v32 }
  0xb7   : > { %1373 = vst [vmem:[#allocation2 + $0x70] sm:$0xff] %v3926_v32  ;;  %1374 = vst [vmem:[#allocation2 + $0x78] sm:$0xff] %v3926_v32 }
  0xb8   : > { %1375 = vst [vmem:[#allocation2 + $0x80] sm:$0xff] %v3926_v32  ;;  %1376 = vst [vmem:[#allocation2 + $0x88] sm:$0xff] %v3926_v32 }
  0xb9   : > { %1377 = vst [vmem:[#allocation2 + $0x90] sm:$0xff] %v3926_v32  ;;  %1378 = vst [vmem:[#allocation2 + $0x98] sm:$0xff] %v3926_v32 }
  0xba   : > { %1379 = vst [vmem:[#allocation2 + $0xa0] sm:$0xff] %v3926_v32  ;;  %1380 = vst [vmem:[#allocation2 + $0xa8] sm:$0xff] %v3926_v32 }
  0xbb   : > { %1381 = vst [vmem:[#allocation2 + $0xb0] sm:$0xff] %v3926_v32  ;;  %1382 = vst [vmem:[#allocation2 + $0xb8] sm:$0xff] %v3926_v32 }
  0xbc   : > { %1383 = vst [vmem:[#allocation2 + $0xc0] sm:$0xff] %v3926_v32  ;;  %1384 = vst [vmem:[#allocation2 + $0xc8] sm:$0xff] %v3926_v32 }
  0xbd   : > { %1385 = vst [vmem:[#allocation2 + $0xd0] sm:$0xff] %v3926_v32  ;;  %1386 = vst [vmem:[#allocation2 + $0xd8] sm:$0xff] %v3926_v32 }
  0xbe   : > { %1387 = vst [vmem:[#allocation2 + $0xe0] sm:$0xff] %v3926_v32  ;;  %1388 = vst [vmem:[#allocation2 + $0xe8] sm:$0xff] %v3926_v32 }
  0xbf   : > { %1389 = vst [vmem:[#allocation2 + $0xf0] sm:$0xff] %v3926_v32  ;;  %1390 = vst [vmem:[#allocation2 + $0xf8] sm:$0xff] %v3926_v32 }
  0xc0   : > { %1391 = vst [vmem:[%s5499_s3] sm:$0x3] %v3926_v32 }
  0xc1 PF: > { %v3506_v33 = vld [vmem:[%s4579_s7 + $0x110] sm:$0xff]  ;;  %v3504_v34 = vld [vmem:[%s4579_s7 + $0x100] sm:$0xff]  ;;  %s3927_s10 = smov 4   ;;  %v3507_v35 = vld [vmem:[%s4579_s7 + $0x118] sm:$0xff]  ;;  %vm1424_vm0 = vcmask 31744   ;;  %s3928_s11 = smov 8  }
  0xc2   : > { %1526 = vrot.lane.b32.xlu1 %v3506_v33, %s3927_s10  ;;  %1522 = vrot.lane.b32.xlu0 %v3504_v34, %s3927_s10  ;;  %v3505_v36 = vld [vmem:[%s4579_s7 + $0x108] sm:$0xff]  ;;  %v3508_v38 = vld [vmem:[%s4579_s7 + $0x120] sm:$0xff]  ;;  %vm1618_vm1 = vcmask 64544   ;;  %s3929_s12 = smov 12   ;;  %s3930_s14 = smov 16   ;;  %vm1812_vm2 = vcmask 97344  }
  0xc3   : > { %v3509_v37 = vld [vmem:[%s4579_s7 + $0x128] sm:$0xff]  ;;  %v3511_v39 = vld [vmem:[%s4579_s7 + $0x138] sm:$0xff]  ;;  %v3510_v40 = vld [vmem:[%s4579_s7 + $0x130] sm:$0xff]  ;;  %s3931_s21 = smov 20   ;;  %s3932_s26 = smov 24   ;;  %vm2006_vm3 = vcmask 130144  }
  0xc4   : > { %v3513_v41 = vld [vmem:[%s4579_s7 + $0x148] sm:$0xff]  ;;  %v3512_v42 = vld [vmem:[%s4579_s7 + $0x140] sm:$0xff]  ;;  %v3515_v43 = vld [vmem:[%s4579_s7 + $0x158] sm:$0xff]  ;;  %s3933_s4 = smov 28   ;;  %vm2200_vm4 = vcmask 162944   ;;  %vm2394_vm5 = vcmask 195744  }
  0xc5   : > { %v3514_v44 = vld [vmem:[%s4579_s7 + $0x150] sm:$0xff]  ;;  %v1392_v46 = vld [vmem:[%s4579_s7] sm:$0xff]  ;;  %v3517_v47 = vld [vmem:[%s4579_s7 + $0x168] sm:$0xff]  ;;  %vm2588_vm6 = vcmask 228544   ;;  %vm2782_vm7 = vcmask 261344   ;;  %vm2976_vm8 = vcmask 294144  }
  0xc6   : > { %1528 = vrot.lane.b32.xlu1 %v3507_v35, %s3927_s10  ;;  %1524 = vrot.lane.b32.xlu0 %v3505_v36, %s3927_s10  ;;  %v1394_v45 = vld [vmem:[%s4579_s7 + $0x10] sm:$0xff]  ;;  %v3516_v48 = vld [vmem:[%s4579_s7 + $0x160] sm:$0xff]  ;;  %1425 = vst.msk [vmem:[#allocation2] sm:$0xff] %vm1424_vm0, %v1392_v46 }
  0xc7   : > { %1427 = vst.msk [vmem:[#allocation2 + $0x10] sm:$0xff] %vm1424_vm0, %v1394_v45  ;;  %v1395_v49 = vld [vmem:[%s4579_s7 + $0x18] sm:$0xff]  ;;  %v1393_v50 = vld [vmem:[%s4579_s7 + $0x8] sm:$0xff]  ;;  %v1396_v52 = vld [vmem:[%s4579_s7 + $0x20] sm:$0xff] }
  0xc8   : > { %1428 = vst.msk [vmem:[#allocation2 + $0x18] sm:$0xff] %vm1424_vm0, %v1395_v49  ;;  %1426 = vst.msk [vmem:[#allocation2 + $0x8] sm:$0xff] %vm1424_vm0, %v1393_v50  ;;  %v1397_v51 = vld [vmem:[%s4579_s7 + $0x28] sm:$0xff]  ;;  %v1399_v53 = vld [vmem:[%s4579_s7 + $0x38] sm:$0xff] }
  0xc9   : > { %1430 = vst.msk [vmem:[#allocation2 + $0x28] sm:$0xff] %vm1424_vm0, %v1397_v51  ;;  %1429 = vst.msk [vmem:[#allocation2 + $0x20] sm:$0xff] %vm1424_vm0, %v1396_v52  ;;  %v3519_v54 = vld [vmem:[%s4579_s7 + $0x178] sm:$0xff]  ;;  %v3518_v55 = vld [vmem:[%s4579_s7 + $0x170] sm:$0xff] }
  0xca   : > { %1532 = vrot.lane.b32.xlu1 %v3509_v37, %s3927_s10  ;;  %1530 = vrot.lane.b32.xlu0 %v3508_v38, %s3927_s10  ;;  %1432 = vst.msk [vmem:[#allocation2 + $0x38] sm:$0xff] %vm1424_vm0, %v1399_v53  ;;  %v1398_v56 = vld [vmem:[%s4579_s7 + $0x30] sm:$0xff]  ;;  %v1401_v57 = vld [vmem:[%s4579_s7 + $0x48] sm:$0xff] }
  0xcb   : > { %1431 = vst.msk [vmem:[#allocation2 + $0x30] sm:$0xff] %vm1424_vm0, %v1398_v56  ;;  %v1400_v58 = vld [vmem:[%s4579_s7 + $0x40] sm:$0xff]  ;;  %1434 = vst.msk [vmem:[#allocation2 + $0x48] sm:$0xff] %vm1424_vm0, %v1401_v57  ;;  %v1403_v59 = vld [vmem:[%s4579_s7 + $0x58] sm:$0xff] }
  0xcc   : > { %1433 = vst.msk [vmem:[#allocation2 + $0x40] sm:$0xff] %vm1424_vm0, %v1400_v58  ;;  %v1402_v60 = vld [vmem:[%s4579_s7 + $0x50] sm:$0xff]  ;;  %v3521_v61 = vld [vmem:[%s4579_s7 + $0x188] sm:$0xff]  ;;  %1436 = vst.msk [vmem:[#allocation2 + $0x58] sm:$0xff] %vm1424_vm0, %v1403_v59 }
  0xcd   : > { %1435 = vst.msk [vmem:[#allocation2 + $0x50] sm:$0xff] %vm1424_vm0, %v1402_v60  ;;  %v3520_v62 = vld [vmem:[%s4579_s7 + $0x180] sm:$0xff]  ;;  %v1405_v63 = vld [vmem:[%s4579_s7 + $0x68] sm:$0xff]  ;;  %v1407_v1 = vld [vmem:[%s4579_s7 + $0x78] sm:$0xff] }
  0xce   : > { %1536 = vrot.lane.b32.xlu1 %v3511_v39, %s3927_s10  ;;  %1534 = vrot.lane.b32.xlu0 %v3510_v40, %s3927_s10  ;;  %v1404_v0 = vld [vmem:[%s4579_s7 + $0x60] sm:$0xff]  ;;  %1438 = vst.msk [vmem:[#allocation2 + $0x68] sm:$0xff] %vm1424_vm0, %v1405_v63  ;;  %v1406_v2 = vld [vmem:[%s4579_s7 + $0x70] sm:$0xff]  ;;  %1440 = vst.msk [vmem:[#allocation2 + $0x78] sm:$0xff] %vm1424_vm0, %v1407_v1 }
  0xcf   : > { %1437 = vst.msk [vmem:[#allocation2 + $0x60] sm:$0xff] %vm1424_vm0, %v1404_v0  ;;  %1439 = vst.msk [vmem:[#allocation2 + $0x70] sm:$0xff] %vm1424_vm0, %v1406_v2  ;;  %v1409_v3 = vld [vmem:[%s4579_s7 + $0x88] sm:$0xff]  ;;  %v3523_v4 = vld [vmem:[%s4579_s7 + $0x198] sm:$0xff] }
  0xd0   : > { %1442 = vst.msk [vmem:[#allocation2 + $0x88] sm:$0xff] %vm1424_vm0, %v1409_v3  ;;  %v1408_v5 = vld [vmem:[%s4579_s7 + $0x80] sm:$0xff]  ;;  %v3522_v6 = vld [vmem:[%s4579_s7 + $0x190] sm:$0xff]  ;;  %v1411_v7 = vld [vmem:[%s4579_s7 + $0x98] sm:$0xff] }
  0xd1   : > { %1441 = vst.msk [vmem:[#allocation2 + $0x80] sm:$0xff] %vm1424_vm0, %v1408_v5  ;;  %v1410_v8 = vld [vmem:[%s4579_s7 + $0x90] sm:$0xff]  ;;  %1444 = vst.msk [vmem:[#allocation2 + $0x98] sm:$0xff] %vm1424_vm0, %v1411_v7  ;;  %v1413_v9 = vld [vmem:[%s4579_s7 + $0xa8] sm:$0xff] }
  0xd2   : > { %1540 = vrot.lane.b32.xlu1 %v3513_v41, %s3927_s10  ;;  %1538 = vrot.lane.b32.xlu0 %v3512_v42, %s3927_s10  ;;  %1443 = vst.msk [vmem:[#allocation2 + $0x90] sm:$0xff] %vm1424_vm0, %v1410_v8  ;;  %1446 = vst.msk [vmem:[#allocation2 + $0xa8] sm:$0xff] %vm1424_vm0, %v1413_v9  ;;  %v1412_v10 = vld [vmem:[%s4579_s7 + $0xa0] sm:$0xff]  ;;  %v1415_v11 = vld [vmem:[%s4579_s7 + $0xb8] sm:$0xff] }
  0xd3   : > { %1445 = vst.msk [vmem:[#allocation2 + $0xa0] sm:$0xff] %vm1424_vm0, %v1412_v10  ;;  %v1414_v12 = vld [vmem:[%s4579_s7 + $0xb0] sm:$0xff]  ;;  %v3525_v13 = vld [vmem:[%s4579_s7 + $0x1a8] sm:$0xff]  ;;  %v3524_v14 = vld [vmem:[%s4579_s7 + $0x1a0] sm:$0xff] }
  0xd4   : > { %1448 = vst.msk [vmem:[#allocation2 + $0xb8] sm:$0xff] %vm1424_vm0, %v1415_v11  ;;  %1447 = vst.msk [vmem:[#allocation2 + $0xb0] sm:$0xff] %vm1424_vm0, %v1414_v12  ;;  %v1417_v15 = vld [vmem:[%s4579_s7 + $0xc8] sm:$0xff]  ;;  %v1416_v16 = vld [vmem:[%s4579_s7 + $0xc0] sm:$0xff] }
  0xd5   : > { %1450 = vst.msk [vmem:[#allocation2 + $0xc8] sm:$0xff] %vm1424_vm0, %v1417_v15  ;;  %v3527_v17 = vld [vmem:[%s4579_s7 + $0x1b8] sm:$0xff]  ;;  %1449 = vst.msk [vmem:[#allocation2 + $0xc0] sm:$0xff] %vm1424_vm0, %v1416_v16  ;;  %v1418_v19 = vld [vmem:[%s4579_s7 + $0xd0] sm:$0xff] }
  0xd6   : > { %1544 = vrot.lane.b32.xlu1 %v3515_v43, %s3927_s10  ;;  %1542 = vrot.lane.b32.xlu0 %v3514_v44, %s3927_s10  ;;  %v1419_v18 = vld [vmem:[%s4579_s7 + $0xd8] sm:$0xff]  ;;  %v3526_v20 = vld [vmem:[%s4579_s7 + $0x1b0] sm:$0xff]  ;;  %1451 = vst.msk [vmem:[#allocation2 + $0xd0] sm:$0xff] %vm1424_vm0, %v1418_v19 }
  0xd7   : > { %1452 = vst.msk [vmem:[#allocation2 + $0xd8] sm:$0xff] %vm1424_vm0, %v1419_v18  ;;  %v1421_v21 = vld [vmem:[%s4579_s7 + $0xe8] sm:$0xff]  ;;  %v1420_v22 = vld [vmem:[%s4579_s7 + $0xe0] sm:$0xff]  ;;  %v1423_v25 = vld [vmem:[%s4579_s7 + $0xf8] sm:$0xff] }
  0xd8   : > { %1454 = vst.msk [vmem:[#allocation2 + $0xe8] sm:$0xff] %vm1424_vm0, %v1421_v21  ;;  %1453 = vst.msk [vmem:[#allocation2 + $0xe0] sm:$0xff] %vm1424_vm0, %v1420_v22  ;;  %v3529_v23 = vld [vmem:[%s4579_s7 + $0x1c8] sm:$0xff]  ;;  %v3528_v24 = vld [vmem:[%s4579_s7 + $0x1c0] sm:$0xff] }
  0xd9   : > { %v1422_v26 = vld [vmem:[%s4579_s7 + $0xf0] sm:$0xff]  ;;  %1456 = vst.msk [vmem:[#allocation2 + $0xf8] sm:$0xff] %vm1424_vm0, %v1423_v25  ;;  %v3531_v27 = vld [vmem:[%s4579_s7 + $0x1d8] sm:$0xff]  ;;  %v3533_v29 = vld [vmem:[%s4579_s7 + $0x1e8] sm:$0xff] }
  0xda   : > { %1548 = vrot.lane.b32.xlu1 %v3517_v47, %s3927_s10  ;;  %1546 = vrot.lane.b32.xlu0 %v3516_v48, %s3927_s10  ;;  %1455 = vst.msk [vmem:[#allocation2 + $0xf0] sm:$0xff] %vm1424_vm0, %v1422_v26  ;;  %v3530_v28 = vld [vmem:[%s4579_s7 + $0x1d0] sm:$0xff]  ;;  %v3532_v30 = vld [vmem:[%s4579_s7 + $0x1e0] sm:$0xff] }
  0xdb   : > { %v3535_v31 = vld [vmem:[%s4579_s7 + $0x1f8] sm:$0xff]  ;;  %v3534_v32 = vld [vmem:[%s4579_s7 + $0x1f0] sm:$0xff]  ;;  %v3537_v33 = vld [vmem:[%s4579_s7 + $0x208] sm:$0xff] }
  0xdc   : > { %v3536_v34 = vld [vmem:[%s4579_s7 + $0x200] sm:$0xff]  ;;  %v3539_v35 = vld [vmem:[%s4579_s7 + $0x218] sm:$0xff]  ;;  %v3538_v36 = vld [vmem:[%s4579_s7 + $0x210] sm:$0xff] }
  0xdd   : > { %v3541_v37 = vld [vmem:[%s4579_s7 + $0x228] sm:$0xff]  ;;  %v3540_v38 = vld [vmem:[%s4579_s7 + $0x220] sm:$0xff]  ;;  %v3543_v39 = vld [vmem:[%s4579_s7 + $0x238] sm:$0xff] }
  0xde   : > { %1552 = vrot.lane.b32.xlu1 %v3519_v54, %s3927_s10  ;;  %1550 = vrot.lane.b32.xlu0 %v3518_v55, %s3927_s10  ;;  %v3542_v40 = vld [vmem:[%s4579_s7 + $0x230] sm:$0xff]  ;;  %v3545_v41 = vld [vmem:[%s4579_s7 + $0x248] sm:$0xff] }
  0xdf   : > { %v3544_v42 = vld [vmem:[%s4579_s7 + $0x240] sm:$0xff]  ;;  %v3547_v43 = vld [vmem:[%s4579_s7 + $0x258] sm:$0xff]  ;;  %v3546_v44 = vld [vmem:[%s4579_s7 + $0x250] sm:$0xff] }
  0xe0   : > { %v3549_v45 = vld [vmem:[%s4579_s7 + $0x268] sm:$0xff]  ;;  %v3548_v46 = vld [vmem:[%s4579_s7 + $0x260] sm:$0xff]  ;;  %v3551_v47 = vld [vmem:[%s4579_s7 + $0x278] sm:$0xff] }
  0xe1   : > { %v3550_v48 = vld [vmem:[%s4579_s7 + $0x270] sm:$0xff]  ;;  %v3553_v49 = vld [vmem:[%s4579_s7 + $0x288] sm:$0xff]  ;;  %v3552_v50 = vld [vmem:[%s4579_s7 + $0x280] sm:$0xff] }
  0xe2   : > { %1556 = vrot.lane.b32.xlu1 %v3521_v61, %s3927_s10  ;;  %1554 = vrot.lane.b32.xlu0 %v3520_v62, %s3927_s10  ;;  %v3555_v51 = vld [vmem:[%s4579_s7 + $0x298] sm:$0xff]  ;;  %v3554_v52 = vld [vmem:[%s4579_s7 + $0x290] sm:$0xff] }
  0xe3   : > { %v3557_v53 = vld [vmem:[%s4579_s7 + $0x2a8] sm:$0xff]  ;;  %v3556_v54 = vld [vmem:[%s4579_s7 + $0x2a0] sm:$0xff]  ;;  %v3559_v55 = vld [vmem:[%s4579_s7 + $0x2b8] sm:$0xff] }
  0xe4   : > { %v3558_v56 = vld [vmem:[%s4579_s7 + $0x2b0] sm:$0xff]  ;;  %v3561_v57 = vld [vmem:[%s4579_s7 + $0x2c8] sm:$0xff]  ;;  %v3560_v58 = vld [vmem:[%s4579_s7 + $0x2c0] sm:$0xff] }
  0xe5   : > { %v3563_v59 = vld [vmem:[%s4579_s7 + $0x2d8] sm:$0xff]  ;;  %v3562_v60 = vld [vmem:[%s4579_s7 + $0x2d0] sm:$0xff]  ;;  %v3565_v63 = vld [vmem:[%s4579_s7 + $0x2e8] sm:$0xff] }
  0xe6   : > { %1560 = vrot.lane.b32.xlu1 %v3523_v4, %s3927_s10  ;;  %1558 = vrot.lane.b32.xlu0 %v3522_v6, %s3927_s10  ;;  %v3564_v0 = vld [vmem:[%s4579_s7 + $0x2e0] sm:$0xff]  ;;  %v3567_v3 = vld [vmem:[%s4579_s7 + $0x2f8] sm:$0xff] }
  0xe7   : > { %v3566_v4 = vld [vmem:[%s4579_s7 + $0x2f0] sm:$0xff]  ;;  %v3569_v7 = vld [vmem:[%s4579_s7 + $0x308] sm:$0xff]  ;;  %v3568_v8 = vld [vmem:[%s4579_s7 + $0x300] sm:$0xff] }
  0xe8   : > { %v3571_v11 = vld [vmem:[%s4579_s7 + $0x318] sm:$0xff]  ;;  %v3570_v12 = vld [vmem:[%s4579_s7 + $0x310] sm:$0xff]  ;;  %v3573_v15 = vld [vmem:[%s4579_s7 + $0x328] sm:$0xff] }
  0xe9   : > { %v3572_v16 = vld [vmem:[%s4579_s7 + $0x320] sm:$0xff]  ;;  %v3575_v19 = vld [vmem:[%s4579_s7 + $0x338] sm:$0xff] }
  0xea   : > { %1564 = vrot.lane.b32.xlu1 %v3525_v13, %s3927_s10  ;;  %1562 = vrot.lane.b32.xlu0 %v3524_v14, %s3927_s10 }
  0xee   : > { %1568 = vrot.lane.b32.xlu1 %v3527_v17, %s3927_s10  ;;  %1566 = vrot.lane.b32.xlu0 %v3526_v20, %s3927_s10  ;;  %v3574_v20 = vld [vmem:[%s4579_s7 + $0x330] sm:$0xff] }
  0xf2   : > { %1572 = vrot.lane.b32.xlu1 %v3529_v23, %s3927_s10  ;;  %1570 = vrot.lane.b32.xlu0 %v3528_v24, %s3927_s10  ;;  %v3600_v23 = vld [vmem:[%s4579_s7 + $0x400] sm:$0xff] }
  0xf3   : > { %v3576_v24 = vld [vmem:[%s4579_s7 + $0x340] sm:$0xff] }
  0xf6   : > { %1576 = vrot.lane.b32.xlu1 %v3531_v27, %s3927_s10  ;;  %1574 = vrot.lane.b32.xlu0 %v3530_v28, %s3927_s10  ;;  %v3602_v27 = vld [vmem:[%s4579_s7 + $0x410] sm:$0xff]  ;;  %v3601_v28 = vld [vmem:[%s4579_s7 + $0x408] sm:$0xff] }
  0xfa   : > { %1580 = vrot.lane.b32.xlu1 %v3533_v29, %s3927_s10  ;;  %1578 = vrot.lane.b32.xlu0 %v3532_v30, %s3927_s10 }
  0xfe   : > { %1584 = vrot.lane.b32.xlu1 %v3535_v31, %s3927_s10  ;;  %1582 = vrot.lane.b32.xlu0 %v3534_v32, %s3927_s10  ;;  %v3894_v31 = vld [vmem:[%s5497_s1] sm:$0xff]  }
  0xff   : > { %v3632_v32 = vld [vmem:[%s4579_s7 + $0x500] sm:$0xff]  ;;  %3795 = vmatprep.subr.bf16.mxu0 %v3894_v31  ;;  %3843 = vmatprep.subr.bf16.mxu1 %v3894_v31 }
 0x100   : > { %3796 = vmatpush3.bf16.msra.mxu0 %v3894_v31  ;;  %3851 = vmatpush3.bf16.msra.mxu1 %v3894_v31  ;;  %v3700_v31 = vld [vmem:[%s4579_s7 + $0x720] sm:$0xff] }
 0x102   : > { %1718 = vrot.lane.b32.xlu1 %v3537_v33, %s3928_s11  ;;  %1716 = vrot.lane.b32.xlu0 %v3536_v34, %s3928_s11  ;;  %v3603_v33 = vld [vmem:[%s4579_s7 + $0x418] sm:$0xff] }
 0x106   : > { %1722 = vrot.lane.b32.xlu1 %v3539_v35, %s3928_s11  ;;  %1720 = vrot.lane.b32.xlu0 %v3538_v36, %s3928_s11  ;;  %v3895_v36 = vld [vmem:[%s5497_s1 + $0x8] sm:$0xff]  }
 0x107   : > { %3797 = vmatprep.subr.bf16.mxu0 %v3895_v36  ;;  %3844 = vmatprep.subr.bf16.mxu1 %v3895_v36 }
 0x108   : > { %3798 = vmatpush3.bf16.msra.mxu0 %v3895_v36  ;;  %3852 = vmatpush3.bf16.msra.mxu1 %v3895_v36  ;;  %v3701_v36 = vld [vmem:[%s4579_s7 + $0x728] sm:$0xff] }
 0x10a   : > { %1726 = vrot.lane.b32.xlu1 %v3541_v37, %s3928_s11  ;;  %1724 = vrot.lane.b32.xlu0 %v3540_v38, %s3928_s11  ;;  %v3634_v37 = vld [vmem:[%s4579_s7 + $0x510] sm:$0xff]  ;;  %v3633_v38 = vld [vmem:[%s4579_s7 + $0x508] sm:$0xff] }
 0x10e   : > { %1730 = vrot.lane.b32.xlu1 %v3543_v39, %s3928_s11  ;;  %1728 = vrot.lane.b32.xlu0 %v3542_v40, %s3928_s11 }
 0x112   : > { %1734 = vrot.lane.b32.xlu1 %v3545_v41, %s3928_s11  ;;  %1732 = vrot.lane.b32.xlu0 %v3544_v42, %s3928_s11  ;;  %v3896_v41 = vld [vmem:[%s5497_s1 + $0x10] sm:$0xff]   ;;  %v3664_v42 = vld [vmem:[%s4579_s7 + $0x600] sm:$0xff] }
 0x113   : > { %3799 = vmatprep.subr.bf16.mxu0 %v3896_v41  ;;  %3845 = vmatprep.subr.bf16.mxu1 %v3896_v41 }
 0x114   : > { %3800 = vmatpush3.bf16.msra.mxu0 %v3896_v41  ;;  %3853 = vmatpush3.bf16.msra.mxu1 %v3896_v41 }
 0x116   : > { %1738 = vrot.lane.b32.xlu1 %v3547_v43, %s3928_s11  ;;  %1736 = vrot.lane.b32.xlu0 %v3546_v44, %s3928_s11  ;;  %v3635_v43 = vld [vmem:[%s4579_s7 + $0x518] sm:$0xff] }
 0x11a   : > { %1742 = vrot.lane.b32.xlu1 %v3549_v45, %s3928_s11  ;;  %1740 = vrot.lane.b32.xlu0 %v3548_v46, %s3928_s11  ;;  %v3897_v46 = vld [vmem:[%s5497_s1 + $0x18] sm:$0xff]  }
 0x11b   : > { %3801 = vmatprep.subr.bf16.mxu0 %v3897_v46  ;;  %3846 = vmatprep.subr.bf16.mxu1 %v3897_v46 }
 0x11c   : > { %3802 = vmatpush3.bf16.msra.mxu0 %v3897_v46  ;;  %3854 = vmatpush3.bf16.msra.mxu1 %v3897_v46 }
 0x11e   : > { %1746 = vrot.lane.b32.xlu1 %v3551_v47, %s3928_s11  ;;  %1744 = vrot.lane.b32.xlu0 %v3550_v48, %s3928_s11  ;;  %v3666_v47 = vld [vmem:[%s4579_s7 + $0x610] sm:$0xff]  ;;  %v3665_v48 = vld [vmem:[%s4579_s7 + $0x608] sm:$0xff] }
 0x122   : > { %1750 = vrot.lane.b32.xlu1 %v3553_v49, %s3928_s11  ;;  %1748 = vrot.lane.b32.xlu0 %v3552_v50, %s3928_s11 }
 0x126   : > { %1754 = vrot.lane.b32.xlu1 %v3555_v51, %s3928_s11  ;;  %1752 = vrot.lane.b32.xlu0 %v3554_v52, %s3928_s11  ;;  %v3898_v51 = vld [vmem:[%s5497_s1 + $0x20] sm:$0xff]  }
 0x127   : > { %v3696_v52 = vld [vmem:[%s4579_s7 + $0x700] sm:$0xff]  ;;  %3803 = vmatprep.subr.bf16.mxu0 %v3898_v51  ;;  %3847 = vmatprep.subr.bf16.mxu1 %v3898_v51 }
 0x128   : > { %3804 = vmatpush3.bf16.msra.mxu0 %v3898_v51  ;;  %3855 = vmatpush3.bf16.msra.mxu1 %v3898_v51  ;;  %v3579_v51 = vld [vmem:[%s4579_s7 + $0x358] sm:$0xff] }
 0x12a   : > { %1758 = vrot.lane.b32.xlu1 %v3557_v53, %s3928_s11  ;;  %1756 = vrot.lane.b32.xlu0 %v3556_v54, %s3928_s11  ;;  %v3667_v53 = vld [vmem:[%s4579_s7 + $0x618] sm:$0xff] }
 0x12e   : > { %1762 = vrot.lane.b32.xlu1 %v3559_v55, %s3928_s11  ;;  %1760 = vrot.lane.b32.xlu0 %v3558_v56, %s3928_s11  ;;  %v3899_v56 = vld [vmem:[%s5497_s1 + $0x28] sm:$0xff]  }
 0x12f   : > { %3805 = vmatprep.subr.bf16.mxu0 %v3899_v56  ;;  %3848 = vmatprep.subr.bf16.mxu1 %v3899_v56 }
 0x130   : > { %3806 = vmatpush3.bf16.msra.mxu0 %v3899_v56  ;;  %3856 = vmatpush3.bf16.msra.mxu1 %v3899_v56  ;;  %v3608_v56 = vld [vmem:[%s4579_s7 + $0x440] sm:$0xff] }
 0x132   : > { %1766 = vrot.lane.b32.xlu1 %v3561_v57, %s3928_s11  ;;  %1764 = vrot.lane.b32.xlu0 %v3560_v58, %s3928_s11  ;;  %v3698_v57 = vld [vmem:[%s4579_s7 + $0x710] sm:$0xff]  ;;  %v3697_v58 = vld [vmem:[%s4579_s7 + $0x708] sm:$0xff] }
 0x134   : > { %v1527_v61 = vpop.permute.xlu1 %1526  ;;  %v1523_v62 = vpop.permute.xlu0 %1522 }
 0x135   : > { %1621 = vst.msk [vmem:[#allocation2 + $0x10] sm:$0xff] %vm1618_vm1, %v1527_v61  ;;  %1619 = vst.msk [vmem:[#allocation2] sm:$0xff] %vm1618_vm1, %v1523_v62  ;;  %v3900_v61 = vld [vmem:[%s5497_s1 + $0x30] sm:$0xff]   ;;  %v3728_v62 = vld [vmem:[%s4579_s7 + $0x800] sm:$0xff] }
 0x136   : > { %1770 = vrot.lane.b32.xlu1 %v3563_v59, %s3928_s11  ;;  %1768 = vrot.lane.b32.xlu0 %v3562_v60, %s3928_s11 }
 0x137   : > { %3807 = vmatprep.subr.bf16.mxu0 %v3900_v61  ;;  %3849 = vmatprep.subr.bf16.mxu1 %v3900_v61 }
 0x138   : > { %v1529_v1 = vpop.permute.xlu1 %1528  ;;  %v1525_v2 = vpop.permute.xlu0 %1524  ;;  %3808 = vmatpush3.bf16.msra.mxu0 %v3900_v61  ;;  %3857 = vmatpush3.bf16.msra.mxu1 %v3900_v61 }
 0x139   : > { %1622 = vst.msk [vmem:[#allocation2 + $0x18] sm:$0xff] %vm1618_vm1, %v1529_v1  ;;  %1620 = vst.msk [vmem:[#allocation2 + $0x8] sm:$0xff] %vm1618_vm1, %v1525_v2  ;;  %v3901_v2 = vld [vmem:[%s5497_s1 + $0x38] sm:$0xff]  }
 0x13a   : > { %1774 = vrot.lane.b32.xlu1 %v3565_v63, %s3928_s11  ;;  %1772 = vrot.lane.b32.xlu0 %v3564_v0, %s3928_s11  ;;  %v3699_v63 = vld [vmem:[%s4579_s7 + $0x718] sm:$0xff] }
 0x13b   : > { %3809 = vmatprep.subr.bf16.mxu0 %v3901_v2  ;;  %3850 = vmatprep.subr.bf16.mxu1 %v3901_v2 }
 0x13c   : > { %v1533_v5 = vpop.permute.xlu1 %1532  ;;  %v1531_v6 = vpop.permute.xlu0 %1530  ;;  %3810 = vmatpush3.bf16.msra.mxu0 %v3901_v2  ;;  %3858 = vmatpush3.bf16.msra.mxu1 %v3901_v2 }
 0x13d   : > { %1624 = vst.msk [vmem:[#allocation2 + $0x28] sm:$0xff] %vm1618_vm1, %v1533_v5  ;;  %1623 = vst.msk [vmem:[#allocation2 + $0x20] sm:$0xff] %vm1618_vm1, %v1531_v6 }
 0x13e   : > { %1778 = vrot.lane.b32.xlu1 %v3567_v3, %s3928_s11  ;;  %1776 = vrot.lane.b32.xlu0 %v3566_v4, %s3928_s11  ;;  %s3934_s11 = smov 32   ;;  %v3730_v3 = vld [vmem:[%s4579_s7 + $0x810] sm:$0xff]  ;;  %v3729_v4 = vld [vmem:[%s4579_s7 + $0x808] sm:$0xff] }
 0x140   : > { %v1537_v9 = vpop.permute.xlu1 %1536  ;;  %v1535_v10 = vpop.permute.xlu0 %1534 }
 0x141   : > { %1626 = vst.msk [vmem:[#allocation2 + $0x38] sm:$0xff] %vm1618_vm1, %v1537_v9  ;;  %1625 = vst.msk [vmem:[#allocation2 + $0x30] sm:$0xff] %vm1618_vm1, %v1535_v10 }
 0x142   : > { %1912 = vrot.lane.b32.xlu1 %v3569_v7, %s3929_s12  ;;  %1910 = vrot.lane.b32.xlu0 %v3568_v8, %s3929_s12  ;;  %v3604_v7 = vld [vmem:[%s4579_s7 + $0x420] sm:$0xff]  ;;  %v3731_v8 = vld [vmem:[%s4579_s7 + $0x818] sm:$0xff] }
 0x144   : > { %v1541_v13 = vpop.permute.xlu1 %1540  ;;  %v1539_v14 = vpop.permute.xlu0 %1538 }
 0x145   : > { %1628 = vst.msk [vmem:[#allocation2 + $0x48] sm:$0xff] %vm1618_vm1, %v1541_v13  ;;  %1627 = vst.msk [vmem:[#allocation2 + $0x40] sm:$0xff] %vm1618_vm1, %v1539_v14 }
 0x146   : > { %1916 = vrot.lane.b32.xlu1 %v3571_v11, %s3929_s12  ;;  %1914 = vrot.lane.b32.xlu0 %v3570_v12, %s3929_s12  ;;  %v3606_v11 = vld [vmem:[%s4579_s7 + $0x430] sm:$0xff]  ;;  %v3605_v12 = vld [vmem:[%s4579_s7 + $0x428] sm:$0xff] }
 0x148   : > { %v1545_v17 = vpop.permute.xlu1 %1544  ;;  %v1543_v18 = vpop.permute.xlu0 %1542 }
 0x149   : > { %1630 = vst.msk [vmem:[#allocation2 + $0x58] sm:$0xff] %vm1618_vm1, %v1545_v17  ;;  %1629 = vst.msk [vmem:[#allocation2 + $0x50] sm:$0xff] %vm1618_vm1, %v1543_v18 }
 0x14a   : > { %1920 = vrot.lane.b32.xlu1 %v3573_v15, %s3929_s12  ;;  %1918 = vrot.lane.b32.xlu0 %v3572_v16, %s3929_s12  ;;  %v3636_v15 = vld [vmem:[%s4579_s7 + $0x520] sm:$0xff]  ;;  %v3607_v16 = vld [vmem:[%s4579_s7 + $0x438] sm:$0xff] }
 0x14c   : > { %v1549_v21 = vpop.permute.xlu1 %1548  ;;  %v1547_v22 = vpop.permute.xlu0 %1546 }
 0x14d   : > { %1632 = vst.msk [vmem:[#allocation2 + $0x68] sm:$0xff] %vm1618_vm1, %v1549_v21  ;;  %1631 = vst.msk [vmem:[#allocation2 + $0x60] sm:$0xff] %vm1618_vm1, %v1547_v22 }
 0x14e   : > { %1924 = vrot.lane.b32.xlu1 %v3575_v19, %s3929_s12  ;;  %1922 = vrot.lane.b32.xlu0 %v3574_v20, %s3929_s12  ;;  %v3638_v19 = vld [vmem:[%s4579_s7 + $0x530] sm:$0xff]  ;;  %v3637_v20 = vld [vmem:[%s4579_s7 + $0x528] sm:$0xff] }
 0x150   : > { %v1553_v25 = vpop.permute.xlu1 %1552  ;;  %v1551_v26 = vpop.permute.xlu0 %1550 }
 0x151   : > { %1634 = vst.msk [vmem:[#allocation2 + $0x78] sm:$0xff] %vm1618_vm1, %v1553_v25  ;;  %1633 = vst.msk [vmem:[#allocation2 + $0x70] sm:$0xff] %vm1618_vm1, %v1551_v26 }
 0x152   : > { %2104 = vrot.lane.b32.xlu1 %v3600_v23, %s3930_s14  ;;  %1926 = vrot.lane.b32.xlu0 %v3576_v24, %s3929_s12  ;;  %v3668_v23 = vld [vmem:[%s4579_s7 + $0x620] sm:$0xff]  ;;  %v3639_v24 = vld [vmem:[%s4579_s7 + $0x538] sm:$0xff] }
 0x154   : > { %v1557_v29 = vpop.permute.xlu1 %1556  ;;  %v1555_v30 = vpop.permute.xlu0 %1554 }
 0x155   : > { %1636 = vst.msk [vmem:[#allocation2 + $0x88] sm:$0xff] %vm1618_vm1, %v1557_v29  ;;  %1635 = vst.msk [vmem:[#allocation2 + $0x80] sm:$0xff] %vm1618_vm1, %v1555_v30 }
 0x156   : > { %2108 = vrot.lane.b32.xlu1 %v3602_v27, %s3930_s14  ;;  %2106 = vrot.lane.b32.xlu0 %v3601_v28, %s3930_s14  ;;  %v3670_v27 = vld [vmem:[%s4579_s7 + $0x630] sm:$0xff]  ;;  %v3669_v28 = vld [vmem:[%s4579_s7 + $0x628] sm:$0xff] }
 0x158   : > { %v1561_v34 = vpop.permute.xlu1 %1560  ;;  %v1559_v35 = vpop.permute.xlu0 %1558 }
 0x159   : > { %1638 = vst.msk [vmem:[#allocation2 + $0x98] sm:$0xff] %vm1618_vm1, %v1561_v34  ;;  %1637 = vst.msk [vmem:[#allocation2 + $0x90] sm:$0xff] %vm1618_vm1, %v1559_v35  ;;  %v3702_v35 = vld [vmem:[%s4579_s7 + $0x730] sm:$0xff] }
 0x15a   : > { %2298 = vrot.lane.b32.xlu1 %v3632_v32, %s3931_s21  ;;  %2110 = vrot.lane.b32.xlu0 %v3603_v33, %s3930_s14  ;;  %v3671_v32 = vld [vmem:[%s4579_s7 + $0x638] sm:$0xff] }
 0x15c   : > { %v1565_v39 = vpop.permute.xlu1 %1564  ;;  %v1563_v40 = vpop.permute.xlu0 %1562 }
 0x15d   : > { %1640 = vst.msk [vmem:[#allocation2 + $0xa8] sm:$0xff] %vm1618_vm1, %v1565_v39  ;;  %1639 = vst.msk [vmem:[#allocation2 + $0xa0] sm:$0xff] %vm1618_vm1, %v1563_v40  ;;  %v3732_v39 = vld [vmem:[%s4579_s7 + $0x820] sm:$0xff]  ;;  %v3703_v40 = vld [vmem:[%s4579_s7 + $0x738] sm:$0xff] }
 0x15e   : > { %2302 = vrot.lane.b32.xlu1 %v3634_v37, %s3931_s21  ;;  %2300 = vrot.lane.b32.xlu0 %v3633_v38, %s3931_s21 }
 0x160   : > { %v1569_v44 = vpop.permute.xlu1 %1568  ;;  %v1567_v45 = vpop.permute.xlu0 %1566 }
 0x161   : > { %1642 = vst.msk [vmem:[#allocation2 + $0xb8] sm:$0xff] %vm1618_vm1, %v1569_v44  ;;  %1641 = vst.msk [vmem:[#allocation2 + $0xb0] sm:$0xff] %vm1618_vm1, %v1567_v45  ;;  %v3733_v44 = vld [vmem:[%s4579_s7 + $0x828] sm:$0xff] }
 0x162   : > { %2492 = vrot.lane.b32.xlu1 %v3664_v42, %s3932_s26  ;;  %2304 = vrot.lane.b32.xlu0 %v3635_v43, %s3931_s21  ;;  %v3734_v43 = vld [vmem:[%s4579_s7 + $0x830] sm:$0xff] }
 0x164   : > { %v1573_v49 = vpop.permute.xlu1 %1572  ;;  %v1571_v50 = vpop.permute.xlu0 %1570 }
 0x165   : > { %1644 = vst.msk [vmem:[#allocation2 + $0xc8] sm:$0xff] %vm1618_vm1, %v1573_v49  ;;  %1643 = vst.msk [vmem:[#allocation2 + $0xc0] sm:$0xff] %vm1618_vm1, %v1571_v50 }
 0x166   : > { %2496 = vrot.lane.b32.xlu1 %v3666_v47, %s3932_s26  ;;  %2494 = vrot.lane.b32.xlu0 %v3665_v48, %s3932_s26  ;;  %v3577_v47 = vld [vmem:[%s4579_s7 + $0x348] sm:$0xff]  ;;  %v3735_v48 = vld [vmem:[%s4579_s7 + $0x838] sm:$0xff] }
 0x168   : > { %v1577_v54 = vpop.permute.xlu1 %1576  ;;  %v1575_v55 = vpop.permute.xlu0 %1574 }
 0x169   : > { %1646 = vst.msk [vmem:[#allocation2 + $0xd8] sm:$0xff] %vm1618_vm1, %v1577_v54  ;;  %1645 = vst.msk [vmem:[#allocation2 + $0xd0] sm:$0xff] %vm1618_vm1, %v1575_v55  ;;  %v3609_v55 = vld [vmem:[%s4579_s7 + $0x448] sm:$0xff] }
 0x16a   : > { %2686 = vrot.lane.b32.xlu1 %v3696_v52, %s3933_s4  ;;  %2498 = vrot.lane.b32.xlu0 %v3667_v53, %s3932_s26  ;;  %v3578_v52 = vld [vmem:[%s4579_s7 + $0x350] sm:$0xff] }
 0x16c   : > { %v1581_v59 = vpop.permute.xlu1 %1580  ;;  %v1579_v60 = vpop.permute.xlu0 %1578 }
 0x16d   : > { %1648 = vst.msk [vmem:[#allocation2 + $0xe8] sm:$0xff] %vm1618_vm1, %v1581_v59  ;;  %1647 = vst.msk [vmem:[#allocation2 + $0xe0] sm:$0xff] %vm1618_vm1, %v1579_v60  ;;  %v3611_v59 = vld [vmem:[%s4579_s7 + $0x458] sm:$0xff]  ;;  %v3610_v60 = vld [vmem:[%s4579_s7 + $0x450] sm:$0xff] }
 0x16e   : > { %2690 = vrot.lane.b32.xlu1 %v3698_v57, %s3933_s4  ;;  %2688 = vrot.lane.b32.xlu0 %v3697_v58, %s3933_s4 }
 0x170   : > { %v1585_v0 = vpop.permute.xlu1 %1584  ;;  %v1583_v1 = vpop.permute.xlu0 %1582 }
 0x171   : > { %1650 = vst.msk [vmem:[#allocation2 + $0xf8] sm:$0xff] %vm1618_vm1, %v1585_v0  ;;  %1649 = vst.msk [vmem:[#allocation2 + $0xf0] sm:$0xff] %vm1618_vm1, %v1583_v1  ;;  %v3640_v0 = vld [vmem:[%s4579_s7 + $0x540] sm:$0xff] }
 0x172   : > { %2880 = vrot.lane.b32.xlu1 %v3728_v62, %s3934_s11  ;;  %2692 = vrot.lane.b32.xlu0 %v3699_v63, %s3933_s4  ;;  %v3641_v63 = vld [vmem:[%s4579_s7 + $0x548] sm:$0xff] }
 0x174   : > { %v1719_v5 = vpop.permute.xlu1 %1718  ;;  %v1717_v6 = vpop.permute.xlu0 %1716 }
 0x175   : > { %1814 = vst.msk [vmem:[#allocation2 + $0x8] sm:$0xff] %vm1812_vm2, %v1719_v5  ;;  %1813 = vst.msk [vmem:[#allocation2] sm:$0xff] %vm1812_vm2, %v1717_v6 }
 0x176   : > { %2884 = vrot.lane.b32.xlu1 %v3730_v3, %s3934_s11  ;;  %2882 = vrot.lane.b32.xlu0 %v3729_v4, %s3934_s11  ;;  %v3643_v3 = vld [vmem:[%s4579_s7 + $0x558] sm:$0xff]  ;;  %v3642_v4 = vld [vmem:[%s4579_s7 + $0x550] sm:$0xff] }
 0x178   : > { %v1723_v9 = vpop.permute.xlu1 %1722  ;;  %v1721_v10 = vpop.permute.xlu0 %1720 }
 0x179   : > { %1816 = vst.msk [vmem:[#allocation2 + $0x18] sm:$0xff] %vm1812_vm2, %v1723_v9  ;;  %1815 = vst.msk [vmem:[#allocation2 + $0x10] sm:$0xff] %vm1812_vm2, %v1721_v10 }
 0x17a   : > { %2112 = vrot.lane.b32.xlu1 %v3604_v7, %s3930_s14  ;;  %2886 = vrot.lane.b32.xlu0 %v3731_v8, %s3934_s11  ;;  %v3673_v7 = vld [vmem:[%s4579_s7 + $0x648] sm:$0xff]  ;;  %v3672_v8 = vld [vmem:[%s4579_s7 + $0x640] sm:$0xff] }
 0x17c   : > { %v1727_v13 = vpop.permute.xlu1 %1726  ;;  %v1725_v14 = vpop.permute.xlu0 %1724 }
 0x17d   : > { %1818 = vst.msk [vmem:[#allocation2 + $0x28] sm:$0xff] %vm1812_vm2, %v1727_v13  ;;  %1817 = vst.msk [vmem:[#allocation2 + $0x20] sm:$0xff] %vm1812_vm2, %v1725_v14 }
 0x17e   : > { %2116 = vrot.lane.b32.xlu1 %v3606_v11, %s3930_s14  ;;  %2114 = vrot.lane.b32.xlu0 %v3605_v12, %s3930_s14  ;;  %v3675_v11 = vld [vmem:[%s4579_s7 + $0x658] sm:$0xff]  ;;  %v3674_v12 = vld [vmem:[%s4579_s7 + $0x650] sm:$0xff] }
 0x180   : > { %v1731_v17 = vpop.permute.xlu1 %1730  ;;  %v1729_v18 = vpop.permute.xlu0 %1728 }
 0x181   : > { %1820 = vst.msk [vmem:[#allocation2 + $0x38] sm:$0xff] %vm1812_vm2, %v1731_v17  ;;  %1819 = vst.msk [vmem:[#allocation2 + $0x30] sm:$0xff] %vm1812_vm2, %v1729_v18 }
 0x182   : > { %2306 = vrot.lane.b32.xlu1 %v3636_v15, %s3931_s21  ;;  %2118 = vrot.lane.b32.xlu0 %v3607_v16, %s3930_s14  ;;  %v3705_v15 = vld [vmem:[%s4579_s7 + $0x748] sm:$0xff]  ;;  %v3704_v16 = vld [vmem:[%s4579_s7 + $0x740] sm:$0xff] }
 0x184   : > { %v1735_v21 = vpop.permute.xlu1 %1734  ;;  %v1733_v22 = vpop.permute.xlu0 %1732 }
 0x185   : > { %1822 = vst.msk [vmem:[#allocation2 + $0x48] sm:$0xff] %vm1812_vm2, %v1735_v21  ;;  %1821 = vst.msk [vmem:[#allocation2 + $0x40] sm:$0xff] %vm1812_vm2, %v1733_v22 }
 0x186   : > { %2310 = vrot.lane.b32.xlu1 %v3638_v19, %s3931_s21  ;;  %2308 = vrot.lane.b32.xlu0 %v3637_v20, %s3931_s21  ;;  %v3707_v19 = vld [vmem:[%s4579_s7 + $0x758] sm:$0xff]  ;;  %v3706_v20 = vld [vmem:[%s4579_s7 + $0x750] sm:$0xff] }
 0x188   : > { %v1739_v25 = vpop.permute.xlu1 %1738  ;;  %v1737_v26 = vpop.permute.xlu0 %1736 }
 0x189   : > { %1824 = vst.msk [vmem:[#allocation2 + $0x58] sm:$0xff] %vm1812_vm2, %v1739_v25  ;;  %1823 = vst.msk [vmem:[#allocation2 + $0x50] sm:$0xff] %vm1812_vm2, %v1737_v26 }
 0x18a   : > { %2500 = vrot.lane.b32.xlu1 %v3668_v23, %s3932_s26  ;;  %2312 = vrot.lane.b32.xlu0 %v3639_v24, %s3931_s21  ;;  %v3737_v23 = vld [vmem:[%s4579_s7 + $0x848] sm:$0xff]  ;;  %v3736_v24 = vld [vmem:[%s4579_s7 + $0x840] sm:$0xff] }
 0x18c   : > { %v1743_v29 = vpop.permute.xlu1 %1742  ;;  %v1741_v30 = vpop.permute.xlu0 %1740 }
 0x18d   : > { %1826 = vst.msk [vmem:[#allocation2 + $0x68] sm:$0xff] %vm1812_vm2, %v1743_v29  ;;  %1825 = vst.msk [vmem:[#allocation2 + $0x60] sm:$0xff] %vm1812_vm2, %v1741_v30 }
 0x18e   : > { %2504 = vrot.lane.b32.xlu1 %v3670_v27, %s3932_s26  ;;  %2502 = vrot.lane.b32.xlu0 %v3669_v28, %s3932_s26  ;;  %v3739_v27 = vld [vmem:[%s4579_s7 + $0x858] sm:$0xff]  ;;  %v3738_v28 = vld [vmem:[%s4579_s7 + $0x850] sm:$0xff] }
 0x190   : > { %v1747_v33 = vpop.permute.xlu1 %1746  ;;  %v1745_v34 = vpop.permute.xlu0 %1744 }
 0x191   : > { %1828 = vst.msk [vmem:[#allocation2 + $0x78] sm:$0xff] %vm1812_vm2, %v1747_v33  ;;  %1827 = vst.msk [vmem:[#allocation2 + $0x70] sm:$0xff] %vm1812_vm2, %v1745_v34 }
 0x192   : > { %2694 = vrot.lane.b32.xlu1 %v3700_v31, %s3933_s4  ;;  %2506 = vrot.lane.b32.xlu0 %v3671_v32, %s3932_s26  ;;  %v3581_v31 = vld [vmem:[%s4579_s7 + $0x368] sm:$0xff]  ;;  %v3580_v32 = vld [vmem:[%s4579_s7 + $0x360] sm:$0xff] }
 0x194   : > { %v1751_v37 = vpop.permute.xlu1 %1750  ;;  %v1749_v38 = vpop.permute.xlu0 %1748 }
 0x195   : > { %1830 = vst.msk [vmem:[#allocation2 + $0x88] sm:$0xff] %vm1812_vm2, %v1751_v37  ;;  %1829 = vst.msk [vmem:[#allocation2 + $0x80] sm:$0xff] %vm1812_vm2, %v1749_v38 }
 0x196   : > { %2698 = vrot.lane.b32.xlu1 %v3702_v35, %s3933_s4  ;;  %2696 = vrot.lane.b32.xlu0 %v3701_v36, %s3933_s4  ;;  %v3583_v35 = vld [vmem:[%s4579_s7 + $0x378] sm:$0xff]  ;;  %v3582_v36 = vld [vmem:[%s4579_s7 + $0x370] sm:$0xff] }
 0x198   : > { %v1755_v41 = vpop.permute.xlu1 %1754  ;;  %v1753_v42 = vpop.permute.xlu0 %1752 }
 0x199   : > { %1832 = vst.msk [vmem:[#allocation2 + $0x98] sm:$0xff] %vm1812_vm2, %v1755_v41  ;;  %1831 = vst.msk [vmem:[#allocation2 + $0x90] sm:$0xff] %vm1812_vm2, %v1753_v42 }
 0x19a   : > { %2888 = vrot.lane.b32.xlu1 %v3732_v39, %s3934_s11  ;;  %2700 = vrot.lane.b32.xlu0 %v3703_v40, %s3933_s4  ;;  %v3613_v39 = vld [vmem:[%s4579_s7 + $0x468] sm:$0xff]  ;;  %v3612_v40 = vld [vmem:[%s4579_s7 + $0x460] sm:$0xff] }
 0x19c   : > { %v1759_v45 = vpop.permute.xlu1 %1758  ;;  %v1757_v46 = vpop.permute.xlu0 %1756 }
 0x19d   : > { %1834 = vst.msk [vmem:[#allocation2 + $0xa8] sm:$0xff] %vm1812_vm2, %v1759_v45  ;;  %1833 = vst.msk [vmem:[#allocation2 + $0xa0] sm:$0xff] %vm1812_vm2, %v1757_v46 }
 0x19e   : > { %2892 = vrot.lane.b32.xlu1 %v3734_v43, %s3934_s11  ;;  %2890 = vrot.lane.b32.xlu0 %v3733_v44, %s3934_s11  ;;  %v3615_v43 = vld [vmem:[%s4579_s7 + $0x478] sm:$0xff]  ;;  %v3614_v44 = vld [vmem:[%s4579_s7 + $0x470] sm:$0xff] }
 0x1a0   : > { %v1763_v49 = vpop.permute.xlu1 %1762  ;;  %v1761_v50 = vpop.permute.xlu0 %1760 }
 0x1a1   : > { %1836 = vst.msk [vmem:[#allocation2 + $0xb8] sm:$0xff] %vm1812_vm2, %v1763_v49  ;;  %1835 = vst.msk [vmem:[#allocation2 + $0xb0] sm:$0xff] %vm1812_vm2, %v1761_v50 }
 0x1a2   : > { %1928 = vrot.lane.b32.xlu1 %v3577_v47, %s3929_s12  ;;  %2894 = vrot.lane.b32.xlu0 %v3735_v48, %s3934_s11  ;;  %v3645_v47 = vld [vmem:[%s4579_s7 + $0x568] sm:$0xff]  ;;  %v3644_v48 = vld [vmem:[%s4579_s7 + $0x560] sm:$0xff] }
 0x1a4   : > { %v1767_v53 = vpop.permute.xlu1 %1766  ;;  %v1765_v54 = vpop.permute.xlu0 %1764 }
 0x1a5   : > { %1838 = vst.msk [vmem:[#allocation2 + $0xc8] sm:$0xff] %vm1812_vm2, %v1767_v53  ;;  %1837 = vst.msk [vmem:[#allocation2 + $0xc0] sm:$0xff] %vm1812_vm2, %v1765_v54 }
 0x1a6   : > { %1932 = vrot.lane.b32.xlu1 %v3579_v51, %s3929_s12  ;;  %1930 = vrot.lane.b32.xlu0 %v3578_v52, %s3929_s12  ;;  %v3647_v51 = vld [vmem:[%s4579_s7 + $0x578] sm:$0xff]  ;;  %v3646_v52 = vld [vmem:[%s4579_s7 + $0x570] sm:$0xff] }
 0x1a8   : > { %v1771_v57 = vpop.permute.xlu1 %1770  ;;  %v1769_v58 = vpop.permute.xlu0 %1768 }
 0x1a9   : > { %1840 = vst.msk [vmem:[#allocation2 + $0xd8] sm:$0xff] %vm1812_vm2, %v1771_v57  ;;  %1839 = vst.msk [vmem:[#allocation2 + $0xd0] sm:$0xff] %vm1812_vm2, %v1769_v58 }
 0x1aa   : > { %2122 = vrot.lane.b32.xlu1 %v3609_v55, %s3930_s14  ;;  %2120 = vrot.lane.b32.xlu0 %v3608_v56, %s3930_s14  ;;  %v3677_v55 = vld [vmem:[%s4579_s7 + $0x668] sm:$0xff]  ;;  %v3676_v56 = vld [vmem:[%s4579_s7 + $0x660] sm:$0xff] }
 0x1ac   : > { %v1775_v61 = vpop.permute.xlu1 %1774  ;;  %v1773_v62 = vpop.permute.xlu0 %1772 }
 0x1ad   : > { %1842 = vst.msk [vmem:[#allocation2 + $0xe8] sm:$0xff] %vm1812_vm2, %v1775_v61  ;;  %1841 = vst.msk [vmem:[#allocation2 + $0xe0] sm:$0xff] %vm1812_vm2, %v1773_v62 }
 0x1ae   : > { %2126 = vrot.lane.b32.xlu1 %v3611_v59, %s3930_s14  ;;  %2124 = vrot.lane.b32.xlu0 %v3610_v60, %s3930_s14  ;;  %v3679_v59 = vld [vmem:[%s4579_s7 + $0x678] sm:$0xff]  ;;  %v3678_v60 = vld [vmem:[%s4579_s7 + $0x670] sm:$0xff] }
 0x1b0   : > { %v1779_v1 = vpop.permute.xlu1 %1778  ;;  %v1777_v2 = vpop.permute.xlu0 %1776 }
 0x1b1   : > { %1844 = vst.msk [vmem:[#allocation2 + $0xf8] sm:$0xff] %vm1812_vm2, %v1779_v1  ;;  %1843 = vst.msk [vmem:[#allocation2 + $0xf0] sm:$0xff] %vm1812_vm2, %v1777_v2 }
 0x1b2   : > { %2316 = vrot.lane.b32.xlu1 %v3641_v63, %s3931_s21  ;;  %2314 = vrot.lane.b32.xlu0 %v3640_v0, %s3931_s21  ;;  %v3709_v63 = vld [vmem:[%s4579_s7 + $0x768] sm:$0xff]  ;;  %v3708_v0 = vld [vmem:[%s4579_s7 + $0x760] sm:$0xff] }
 0x1b4   : > { %v1913_v5 = vpop.permute.xlu1 %1912  ;;  %v1911_v6 = vpop.permute.xlu0 %1910 }
 0x1b5   : > { %2008 = vst.msk [vmem:[#allocation2 + $0x8] sm:$0xff] %vm2006_vm3, %v1913_v5  ;;  %2007 = vst.msk [vmem:[#allocation2] sm:$0xff] %vm2006_vm3, %v1911_v6  ;;  %v3711_v6 = vld [vmem:[%s4579_s7 + $0x778] sm:$0xff] }
 0x1b6   : > { %2320 = vrot.lane.b32.xlu1 %v3643_v3, %s3931_s21  ;;  %2318 = vrot.lane.b32.xlu0 %v3642_v4, %s3931_s21 }
 0x1b8   : > { %v1917_v9 = vpop.permute.xlu1 %1916  ;;  %v1915_v10 = vpop.permute.xlu0 %1914 }
 0x1b9   : > { %2010 = vst.msk [vmem:[#allocation2 + $0x18] sm:$0xff] %vm2006_vm3, %v1917_v9  ;;  %2009 = vst.msk [vmem:[#allocation2 + $0x10] sm:$0xff] %vm2006_vm3, %v1915_v10 }
 0x1ba   : > { %2510 = vrot.lane.b32.xlu1 %v3673_v7, %s3932_s26  ;;  %2508 = vrot.lane.b32.xlu0 %v3672_v8, %s3932_s26  ;;  %v3710_v7 = vld [vmem:[%s4579_s7 + $0x770] sm:$0xff] }
 0x1bc   : > { %v1921_v13 = vpop.permute.xlu1 %1920  ;;  %v1919_v14 = vpop.permute.xlu0 %1918 }
 0x1bd   : > { %2012 = vst.msk [vmem:[#allocation2 + $0x28] sm:$0xff] %vm2006_vm3, %v1921_v13  ;;  %2011 = vst.msk [vmem:[#allocation2 + $0x20] sm:$0xff] %vm2006_vm3, %v1919_v14  ;;  %v3741_v13 = vld [vmem:[%s4579_s7 + $0x868] sm:$0xff]  ;;  %v3740_v14 = vld [vmem:[%s4579_s7 + $0x860] sm:$0xff] }
 0x1be   : > { %2514 = vrot.lane.b32.xlu1 %v3675_v11, %s3932_s26  ;;  %2512 = vrot.lane.b32.xlu0 %v3674_v12, %s3932_s26 }
 0x1c0   : > { %v1925_v17 = vpop.permute.xlu1 %1924  ;;  %v1923_v18 = vpop.permute.xlu0 %1922 }
 0x1c1   : > { %2014 = vst.msk [vmem:[#allocation2 + $0x38] sm:$0xff] %vm2006_vm3, %v1925_v17  ;;  %2013 = vst.msk [vmem:[#allocation2 + $0x30] sm:$0xff] %vm2006_vm3, %v1923_v18  ;;  %v3743_v17 = vld [vmem:[%s4579_s7 + $0x878] sm:$0xff]  ;;  %v3742_v18 = vld [vmem:[%s4579_s7 + $0x870] sm:$0xff] }
 0x1c2   : > { %2704 = vrot.lane.b32.xlu1 %v3705_v15, %s3933_s4  ;;  %2702 = vrot.lane.b32.xlu0 %v3704_v16, %s3933_s4 }
 0x1c4   : > { %v2105_v21 = vpop.permute.xlu1 %2104  ;;  %v1927_v22 = vpop.permute.xlu0 %1926 }
 0x1c5   : > { %2201 = vst.msk [vmem:[#allocation2] sm:$0xff] %vm2200_vm4, %v2105_v21  ;;  %v3585_v21 = vld [vmem:[%s4579_s7 + $0x388] sm:$0xff] }
 0x1c6   : > { %2015 = vst.msk [vmem:[#allocation2 + $0x40] sm:$0xff] %vm2006_vm3, %v1927_v22  ;;  %2708 = vrot.lane.b32.xlu1 %v3707_v19, %s3933_s4  ;;  %2706 = vrot.lane.b32.xlu0 %v3706_v20, %s3933_s4  ;;  %v3584_v22 = vld [vmem:[%s4579_s7 + $0x380] sm:$0xff] }
 0x1c8   : > { %v2109_v25 = vpop.permute.xlu1 %2108  ;;  %v2107_v26 = vpop.permute.xlu0 %2106 }
 0x1c9   : > { %2203 = vst.msk [vmem:[#allocation2 + $0x10] sm:$0xff] %vm2200_vm4, %v2109_v25  ;;  %2202 = vst.msk [vmem:[#allocation2 + $0x8] sm:$0xff] %vm2200_vm4, %v2107_v26  ;;  %v3587_v25 = vld [vmem:[%s4579_s7 + $0x398] sm:$0xff]  ;;  %v3586_v26 = vld [vmem:[%s4579_s7 + $0x390] sm:$0xff] }
 0x1ca   : > { %2898 = vrot.lane.b32.xlu1 %v3737_v23, %s3934_s11  ;;  %2896 = vrot.lane.b32.xlu0 %v3736_v24, %s3934_s11 }
 0x1cc   : > { %v2299_v29 = vpop.permute.xlu1 %2298  ;;  %v2111_v30 = vpop.permute.xlu0 %2110 }
 0x1cd   : > { %2395 = vst.msk [vmem:[#allocation2] sm:$0xff] %vm2394_vm5, %v2299_v29  ;;  %v3617_v29 = vld [vmem:[%s4579_s7 + $0x488] sm:$0xff] }
 0x1ce   : > { %2204 = vst.msk [vmem:[#allocation2 + $0x18] sm:$0xff] %vm2200_vm4, %v2111_v30  ;;  %2902 = vrot.lane.b32.xlu1 %v3739_v27, %s3934_s11  ;;  %2900 = vrot.lane.b32.xlu0 %v3738_v28, %s3934_s11  ;;  %v3616_v30 = vld [vmem:[%s4579_s7 + $0x480] sm:$0xff] }
 0x1d0   : > { %v2303_v33 = vpop.permute.xlu1 %2302  ;;  %v2301_v34 = vpop.permute.xlu0 %2300 }
 0x1d1   : > { %2397 = vst.msk [vmem:[#allocation2 + $0x10] sm:$0xff] %vm2394_vm5, %v2303_v33  ;;  %2396 = vst.msk [vmem:[#allocation2 + $0x8] sm:$0xff] %vm2394_vm5, %v2301_v34  ;;  %v3619_v33 = vld [vmem:[%s4579_s7 + $0x498] sm:$0xff]  ;;  %v3618_v34 = vld [vmem:[%s4579_s7 + $0x490] sm:$0xff] }
 0x1d2   : > { %1936 = vrot.lane.b32.xlu1 %v3581_v31, %s3929_s12  ;;  %1934 = vrot.lane.b32.xlu0 %v3580_v32, %s3929_s12 }
 0x1d4   : > { %v2493_v37 = vpop.permute.xlu1 %2492  ;;  %v2305_v38 = vpop.permute.xlu0 %2304 }
 0x1d5   : > { %2589 = vst.msk [vmem:[#allocation2] sm:$0xff] %vm2588_vm6, %v2493_v37  ;;  %v3649_v37 = vld [vmem:[%s4579_s7 + $0x588] sm:$0xff] }
 0x1d6   : > { %2398 = vst.msk [vmem:[#allocation2 + $0x18] sm:$0xff] %vm2394_vm5, %v2305_v38  ;;  %1940 = vrot.lane.b32.xlu1 %v3583_v35, %s3929_s12  ;;  %1938 = vrot.lane.b32.xlu0 %v3582_v36, %s3929_s12  ;;  %v3648_v38 = vld [vmem:[%s4579_s7 + $0x580] sm:$0xff] }
 0x1d8   : > { %v2497_v41 = vpop.permute.xlu1 %2496  ;;  %v2495_v42 = vpop.permute.xlu0 %2494 }
 0x1d9   : > { %2591 = vst.msk [vmem:[#allocation2 + $0x10] sm:$0xff] %vm2588_vm6, %v2497_v41  ;;  %2590 = vst.msk [vmem:[#allocation2 + $0x8] sm:$0xff] %vm2588_vm6, %v2495_v42  ;;  %v3651_v41 = vld [vmem:[%s4579_s7 + $0x598] sm:$0xff]  ;;  %v3650_v42 = vld [vmem:[%s4579_s7 + $0x590] sm:$0xff] }
 0x1da   : > { %2130 = vrot.lane.b32.xlu1 %v3613_v39, %s3930_s14  ;;  %2128 = vrot.lane.b32.xlu0 %v3612_v40, %s3930_s14 }
 0x1dc   : > { %v2687_v45 = vpop.permute.xlu1 %2686  ;;  %v2499_v46 = vpop.permute.xlu0 %2498 }
 0x1dd   : > { %2783 = vst.msk [vmem:[#allocation2] sm:$0xff] %vm2782_vm7, %v2687_v45  ;;  %v3681_v45 = vld [vmem:[%s4579_s7 + $0x688] sm:$0xff] }
 0x1de   : > { %2592 = vst.msk [vmem:[#allocation2 + $0x18] sm:$0xff] %vm2588_vm6, %v2499_v46  ;;  %2134 = vrot.lane.b32.xlu1 %v3615_v43, %s3930_s14  ;;  %2132 = vrot.lane.b32.xlu0 %v3614_v44, %s3930_s14  ;;  %v3680_v46 = vld [vmem:[%s4579_s7 + $0x680] sm:$0xff] }
 0x1e0   : > { %v2691_v49 = vpop.permute.xlu1 %2690  ;;  %v2689_v50 = vpop.permute.xlu0 %2688 }
 0x1e1   : > { %2785 = vst.msk [vmem:[#allocation2 + $0x10] sm:$0xff] %vm2782_vm7, %v2691_v49  ;;  %2784 = vst.msk [vmem:[#allocation2 + $0x8] sm:$0xff] %vm2782_vm7, %v2689_v50 }
 0x1e2   : > { %2324 = vrot.lane.b32.xlu1 %v3645_v47, %s3931_s21  ;;  %2322 = vrot.lane.b32.xlu0 %v3644_v48, %s3931_s21 }
 0x1e4   : > { %v2881_v53 = vpop.permute.xlu1 %2880  ;;  %v2693_v54 = vpop.permute.xlu0 %2692 }
 0x1e5   : > { %2977 = vst.msk [vmem:[#allocation2] sm:$0xff] %vm2976_vm8, %v2881_v53  ;;  %v3682_v53 = vld [vmem:[%s4579_s7 + $0x690] sm:$0xff] }
 0x1e6   : > { %2786 = vst.msk [vmem:[#allocation2 + $0x18] sm:$0xff] %vm2782_vm7, %v2693_v54  ;;  %2328 = vrot.lane.b32.xlu1 %v3647_v51, %s3931_s21  ;;  %2326 = vrot.lane.b32.xlu0 %v3646_v52, %s3931_s21  ;;  %v3683_v52 = vld [vmem:[%s4579_s7 + $0x698] sm:$0xff] }
 0x1e8   : > { %v2885_v57 = vpop.permute.xlu1 %2884  ;;  %v2883_v58 = vpop.permute.xlu0 %2882 }
 0x1e9   : > { %2979 = vst.msk [vmem:[#allocation2 + $0x10] sm:$0xff] %vm2976_vm8, %v2885_v57  ;;  %2978 = vst.msk [vmem:[#allocation2 + $0x8] sm:$0xff] %vm2976_vm8, %v2883_v58 }
 0x1ea   : > { %2518 = vrot.lane.b32.xlu1 %v3677_v55, %s3932_s26  ;;  %2516 = vrot.lane.b32.xlu0 %v3676_v56, %s3932_s26 }
 0x1ec   : > { %v2113_v61 = vpop.permute.xlu1 %2112  ;;  %v2887_v62 = vpop.permute.xlu0 %2886  ;;  %v3009_v3 = vld [vmem:[#allocation2] sm:$0xff] }
 0x1ed   : > { %2205 = vst.msk [vmem:[#allocation2 + $0x20] sm:$0xff] %vm2200_vm4, %v2113_v61 }
 0x1ee   : > { %2980 = vst.msk [vmem:[#allocation2 + $0x18] sm:$0xff] %vm2976_vm8, %v2887_v62  ;;  %2522 = vrot.lane.b32.xlu1 %v3679_v59, %s3932_s26  ;;  %2520 = vrot.lane.b32.xlu0 %v3678_v60, %s3932_s26  ;;  %v3713_v59 = vld [vmem:[%s4579_s7 + $0x788] sm:$0xff]  ;;  %v3712_v60 = vld [vmem:[%s4579_s7 + $0x780] sm:$0xff] }
 0x1f0   : > { %v2117_v1 = vpop.permute.xlu1 %2116  ;;  %v2115_v2 = vpop.permute.xlu0 %2114  ;;  %v3010_v4 = vld [vmem:[#allocation2 + $0x8] sm:$0xff]  ;;  %v3011_v10 = vld [vmem:[#allocation2 + $0x10] sm:$0xff] }
 0x1f1   : > { %2207 = vst.msk [vmem:[#allocation2 + $0x30] sm:$0xff] %vm2200_vm4, %v2117_v1  ;;  %2206 = vst.msk [vmem:[#allocation2 + $0x28] sm:$0xff] %vm2200_vm4, %v2115_v2  ;;  %v3041_v5 = vpack.c.bf16 %v3010_v4, %v3009_v3  ;;  %v3745_v3 = vld [vmem:[%s4579_s7 + $0x888] sm:$0xff]  ;;  %v3744_v4 = vld [vmem:[%s4579_s7 + $0x880] sm:$0xff] }
 0x1f2   : > { %2712 = vrot.lane.b32.xlu1 %v3709_v63, %s3933_s4  ;;  %2710 = vrot.lane.b32.xlu0 %v3708_v0, %s3933_s4  ;;  %v3715_v63 = vld [vmem:[%s4579_s7 + $0x798] sm:$0xff]  ;;  %v3714_v0 = vld [vmem:[%s4579_s7 + $0x790] sm:$0xff] }
 0x1f3   : > { %3811 = vmatprep.mubr.bf16.mxu0 %v3041_v5 }
 0x1f4   : > { %v2307_v8 = vpop.permute.xlu1 %2306  ;;  %v2119_v9 = vpop.permute.xlu0 %2118 }
 0x1f5   : > { %v3012_v11 = vld [vmem:[#allocation2 + $0x18] sm:$0xff]  ;;  %2399 = vst.msk [vmem:[#allocation2 + $0x20] sm:$0xff] %vm2394_vm5, %v2307_v8  ;;  %v3746_v8 = vld [vmem:[%s4579_s7 + $0x890] sm:$0xff] }
 0x1f6   : > { %2208 = vst.msk [vmem:[#allocation2 + $0x38] sm:$0xff] %vm2200_vm4, %v2119_v9  ;;  %v3042_v12 = vpack.c.bf16 %v3012_v11, %v3011_v10  ;;  %2716 = vrot.lane.b32.xlu1 %v3711_v6, %s3933_s4  ;;  %2714 = vrot.lane.b32.xlu0 %v3710_v7, %s3933_s4  ;;  %v3747_v7 = vld [vmem:[%s4579_s7 + $0x898] sm:$0xff]  ;;  %v3589_v11 = vld [vmem:[%s4579_s7 + $0x3a8] sm:$0xff] }
 0x1f8   : > { %3812 = vmatmul.mubr.bf16.vlgmr.msra.gmra.mrb[0].mxu0 %v3042_v12  ;;  %v2311_v15 = vpop.permute.xlu1 %2310  ;;  %v2309_v16 = vpop.permute.xlu0 %2308  ;;  %v3588_v12 = vld [vmem:[%s4579_s7 + $0x3a0] sm:$0xff] }
 0x1f9   : > { %2401 = vst.msk [vmem:[#allocation2 + $0x30] sm:$0xff] %vm2394_vm5, %v2311_v15  ;;  %2400 = vst.msk [vmem:[#allocation2 + $0x28] sm:$0xff] %vm2394_vm5, %v2309_v16  ;;  %v3591_v15 = vld [vmem:[%s4579_s7 + $0x3b8] sm:$0xff]  ;;  %v3590_v16 = vld [vmem:[%s4579_s7 + $0x3b0] sm:$0xff] }
 0x1fa   : > { %2906 = vrot.lane.b32.xlu1 %v3741_v13, %s3934_s11  ;;  %2904 = vrot.lane.b32.xlu0 %v3740_v14, %s3934_s11 }
 0x1fc   : > { %v2501_v19 = vpop.permute.xlu1 %2500  ;;  %v2313_v20 = vpop.permute.xlu0 %2312 }
 0x1fd   : > { %2593 = vst.msk [vmem:[#allocation2 + $0x20] sm:$0xff] %vm2588_vm6, %v2501_v19  ;;  %v3621_v19 = vld [vmem:[%s4579_s7 + $0x4a8] sm:$0xff] }
 0x1fe   : > { %2402 = vst.msk [vmem:[#allocation2 + $0x38] sm:$0xff] %vm2394_vm5, %v2313_v20  ;;  %2910 = vrot.lane.b32.xlu1 %v3743_v17, %s3934_s11  ;;  %2908 = vrot.lane.b32.xlu0 %v3742_v18, %s3934_s11  ;;  %v3620_v20 = vld [vmem:[%s4579_s7 + $0x4a0] sm:$0xff] }
 0x200   : > { %v2505_v23 = vpop.permute.xlu1 %2504  ;;  %v2503_v24 = vpop.permute.xlu0 %2502 }
 0x201   : > { %2595 = vst.msk [vmem:[#allocation2 + $0x30] sm:$0xff] %vm2588_vm6, %v2505_v23  ;;  %2594 = vst.msk [vmem:[#allocation2 + $0x28] sm:$0xff] %vm2588_vm6, %v2503_v24  ;;  %v3623_v23 = vld [vmem:[%s4579_s7 + $0x4b8] sm:$0xff]  ;;  %v3622_v24 = vld [vmem:[%s4579_s7 + $0x4b0] sm:$0xff] }
 0x202   : > { %1944 = vrot.lane.b32.xlu1 %v3585_v21, %s3929_s12  ;;  %1942 = vrot.lane.b32.xlu0 %v3584_v22, %s3929_s12 }
 0x204   : > { %v2695_v27 = vpop.permute.xlu1 %2694  ;;  %v2507_v28 = vpop.permute.xlu0 %2506 }
 0x205   : > { %2787 = vst.msk [vmem:[#allocation2 + $0x20] sm:$0xff] %vm2782_vm7, %v2695_v27  ;;  %v3653_v27 = vld [vmem:[%s4579_s7 + $0x5a8] sm:$0xff] }
 0x206   : > { %2596 = vst.msk [vmem:[#allocation2 + $0x38] sm:$0xff] %vm2588_vm6, %v2507_v28  ;;  %1948 = vrot.lane.b32.xlu1 %v3587_v25, %s3929_s12  ;;  %1946 = vrot.lane.b32.xlu0 %v3586_v26, %s3929_s12  ;;  %v3652_v28 = vld [vmem:[%s4579_s7 + $0x5a0] sm:$0xff] }
 0x208   : > { %v2699_v31 = vpop.permute.xlu1 %2698  ;;  %v2697_v32 = vpop.permute.xlu0 %2696 }
 0x209   : > { %2789 = vst.msk [vmem:[#allocation2 + $0x30] sm:$0xff] %vm2782_vm7, %v2699_v31  ;;  %2788 = vst.msk [vmem:[#allocation2 + $0x28] sm:$0xff] %vm2782_vm7, %v2697_v32  ;;  %v3655_v31 = vld [vmem:[%s4579_s7 + $0x5b8] sm:$0xff]  ;;  %v3654_v32 = vld [vmem:[%s4579_s7 + $0x5b0] sm:$0xff] }
 0x20a   : > { %2138 = vrot.lane.b32.xlu1 %v3617_v29, %s3930_s14  ;;  %2136 = vrot.lane.b32.xlu0 %v3616_v30, %s3930_s14 }
 0x20c   : > { %v2889_v35 = vpop.permute.xlu1 %2888  ;;  %v2701_v36 = vpop.permute.xlu0 %2700 }
 0x20d   : > { %2981 = vst.msk [vmem:[#allocation2 + $0x20] sm:$0xff] %vm2976_vm8, %v2889_v35 }
 0x20e   : > { %2790 = vst.msk [vmem:[#allocation2 + $0x38] sm:$0xff] %vm2782_vm7, %v2701_v36  ;;  %2142 = vrot.lane.b32.xlu1 %v3619_v33, %s3930_s14  ;;  %2140 = vrot.lane.b32.xlu0 %v3618_v34, %s3930_s14 }
 0x210   : > { %v2893_v39 = vpop.permute.xlu1 %2892  ;;  %v2891_v40 = vpop.permute.xlu0 %2890 }
 0x211   : > { %2983 = vst.msk [vmem:[#allocation2 + $0x30] sm:$0xff] %vm2976_vm8, %v2893_v39  ;;  %2982 = vst.msk [vmem:[#allocation2 + $0x28] sm:$0xff] %vm2976_vm8, %v2891_v40  ;;  %v3684_v39 = vld [vmem:[%s4579_s7 + $0x6a0] sm:$0xff] }
 0x212   : > { %2332 = vrot.lane.b32.xlu1 %v3649_v37, %s3931_s21  ;;  %2330 = vrot.lane.b32.xlu0 %v3648_v38, %s3931_s21  ;;  %v3685_v38 = vld [vmem:[%s4579_s7 + $0x6a8] sm:$0xff] }
 0x214   : > { %v1929_v43 = vpop.permute.xlu1 %1928  ;;  %v2895_v44 = vpop.permute.xlu0 %2894  ;;  %v3013_v49 = vld [vmem:[#allocation2 + $0x20] sm:$0xff] }
 0x215   : > { %2016 = vst.msk [vmem:[#allocation2 + $0x48] sm:$0xff] %vm2006_vm3, %v1929_v43 }
 0x216   : > { %2984 = vst.msk [vmem:[#allocation2 + $0x38] sm:$0xff] %vm2976_vm8, %v2895_v44  ;;  %2336 = vrot.lane.b32.xlu1 %v3651_v41, %s3931_s21  ;;  %2334 = vrot.lane.b32.xlu0 %v3650_v42, %s3931_s21 }
 0x218   : > { %v1933_v47 = vpop.permute.xlu1 %1932  ;;  %v1931_v48 = vpop.permute.xlu0 %1930  ;;  %v3014_v50 = vld [vmem:[#allocation2 + $0x28] sm:$0xff]  ;;  %v3015_v56 = vld [vmem:[#allocation2 + $0x30] sm:$0xff] }
 0x219   : > { %2018 = vst.msk [vmem:[#allocation2 + $0x58] sm:$0xff] %vm2006_vm3, %v1933_v47  ;;  %2017 = vst.msk [vmem:[#allocation2 + $0x50] sm:$0xff] %vm2006_vm3, %v1931_v48  ;;  %v3043_v51 = vpack.c.bf16 %v3014_v50, %v3013_v49  ;;  %v3717_v49 = vld [vmem:[%s4579_s7 + $0x7a8] sm:$0xff]  ;;  %v3716_v50 = vld [vmem:[%s4579_s7 + $0x7a0] sm:$0xff] }
 0x21a   : > { %2526 = vrot.lane.b32.xlu1 %v3681_v45, %s3932_s26  ;;  %2524 = vrot.lane.b32.xlu0 %v3680_v46, %s3932_s26  ;;  %v3687_v45 = vld [vmem:[%s4579_s7 + $0x6b8] sm:$0xff]  ;;  %v3686_v46 = vld [vmem:[%s4579_s7 + $0x6b0] sm:$0xff] }
 0x21b   : > { %3815 = vmatprep.mubr.bf16.mxu0 %v3043_v51 }
 0x21c   : > { %v2123_v54 = vpop.permute.xlu1 %2122  ;;  %v2121_v55 = vpop.permute.xlu0 %2120 }
 0x21d   : > { %v3016_v57 = vld [vmem:[#allocation2 + $0x38] sm:$0xff]  ;;  %2210 = vst.msk [vmem:[#allocation2 + $0x48] sm:$0xff] %vm2200_vm4, %v2123_v54  ;;  %2209 = vst.msk [vmem:[#allocation2 + $0x40] sm:$0xff] %vm2200_vm4, %v2121_v55  ;;  %v3718_v54 = vld [vmem:[%s4579_s7 + $0x7b0] sm:$0xff] }
 0x21e   : > { %v3044_v58 = vpack.c.bf16 %v3016_v57, %v3015_v56  ;;  %2530 = vrot.lane.b32.xlu1 %v3683_v52, %s3932_s26  ;;  %2528 = vrot.lane.b32.xlu0 %v3682_v53, %s3932_s26  ;;  %v3719_v53 = vld [vmem:[%s4579_s7 + $0x7b8] sm:$0xff]  ;;  %v3749_v57 = vld [vmem:[%s4579_s7 + $0x8a8] sm:$0xff] }
 0x220   : > { %3816 = vmatmul.mubr.bf16.gmra.mrb[4].mxu0 %v3044_v58  ;;  %v2127_v61 = vpop.permute.xlu1 %2126  ;;  %v2125_v62 = vpop.permute.xlu0 %2124  ;;  %v3748_v58 = vld [vmem:[%s4579_s7 + $0x8a0] sm:$0xff] }
 0x221   : > { %2212 = vst.msk [vmem:[#allocation2 + $0x58] sm:$0xff] %vm2200_vm4, %v2127_v61  ;;  %2211 = vst.msk [vmem:[#allocation2 + $0x50] sm:$0xff] %vm2200_vm4, %v2125_v62  ;;  %v3751_v61 = vld [vmem:[%s4579_s7 + $0x8b8] sm:$0xff]  ;;  %v3750_v62 = vld [vmem:[%s4579_s7 + $0x8b0] sm:$0xff] }
 0x222   : > { %2720 = vrot.lane.b32.xlu1 %v3713_v59, %s3933_s4  ;;  %2718 = vrot.lane.b32.xlu0 %v3712_v60, %s3933_s4 }
 0x224   : > { %v2317_v1 = vpop.permute.xlu1 %2316  ;;  %v2315_v2 = vpop.permute.xlu0 %2314 }
 0x225   : > { %2404 = vst.msk [vmem:[#allocation2 + $0x48] sm:$0xff] %vm2394_vm5, %v2317_v1  ;;  %2403 = vst.msk [vmem:[#allocation2 + $0x40] sm:$0xff] %vm2394_vm5, %v2315_v2  ;;  %v3593_v1 = vld [vmem:[%s4579_s7 + $0x3c8] sm:$0xff]  ;;  %v3592_v2 = vld [vmem:[%s4579_s7 + $0x3c0] sm:$0xff] }
 0x226   : > { %2724 = vrot.lane.b32.xlu1 %v3715_v63, %s3933_s4  ;;  %2722 = vrot.lane.b32.xlu0 %v3714_v0, %s3933_s4 }
 0x228   : > { %v2321_v5 = vpop.permute.xlu1 %2320  ;;  %v2319_v6 = vpop.permute.xlu0 %2318 }
 0x229   : > { %2406 = vst.msk [vmem:[#allocation2 + $0x58] sm:$0xff] %vm2394_vm5, %v2321_v5  ;;  %2405 = vst.msk [vmem:[#allocation2 + $0x50] sm:$0xff] %vm2394_vm5, %v2319_v6  ;;  %v3595_v5 = vld [vmem:[%s4579_s7 + $0x3d8] sm:$0xff]  ;;  %v3594_v6 = vld [vmem:[%s4579_s7 + $0x3d0] sm:$0xff] }
 0x22a   : > { %2914 = vrot.lane.b32.xlu1 %v3745_v3, %s3934_s11  ;;  %2912 = vrot.lane.b32.xlu0 %v3744_v4, %s3934_s11 }
 0x22c   : > { %v2511_v9 = vpop.permute.xlu1 %2510  ;;  %v2509_v10 = vpop.permute.xlu0 %2508 }
 0x22d   : > { %2598 = vst.msk [vmem:[#allocation2 + $0x48] sm:$0xff] %vm2588_vm6, %v2511_v9  ;;  %2597 = vst.msk [vmem:[#allocation2 + $0x40] sm:$0xff] %vm2588_vm6, %v2509_v10  ;;  %v3625_v9 = vld [vmem:[%s4579_s7 + $0x4c8] sm:$0xff]  ;;  %v3624_v10 = vld [vmem:[%s4579_s7 + $0x4c0] sm:$0xff] }
 0x22e   : > { %2918 = vrot.lane.b32.xlu1 %v3747_v7, %s3934_s11  ;;  %2916 = vrot.lane.b32.xlu0 %v3746_v8, %s3934_s11 }
 0x230   : > { %v2515_v13 = vpop.permute.xlu1 %2514  ;;  %v2513_v14 = vpop.permute.xlu0 %2512 }
 0x231   : > { %2600 = vst.msk [vmem:[#allocation2 + $0x58] sm:$0xff] %vm2588_vm6, %v2515_v13  ;;  %2599 = vst.msk [vmem:[#allocation2 + $0x50] sm:$0xff] %vm2588_vm6, %v2513_v14  ;;  %v3627_v13 = vld [vmem:[%s4579_s7 + $0x4d8] sm:$0xff]  ;;  %v3626_v14 = vld [vmem:[%s4579_s7 + $0x4d0] sm:$0xff] }
 0x232   : > { %1952 = vrot.lane.b32.xlu1 %v3589_v11, %s3929_s12  ;;  %1950 = vrot.lane.b32.xlu0 %v3588_v12, %s3929_s12 }
 0x234   : > { %v2705_v17 = vpop.permute.xlu1 %2704  ;;  %v2703_v18 = vpop.permute.xlu0 %2702 }
 0x235   : > { %2792 = vst.msk [vmem:[#allocation2 + $0x48] sm:$0xff] %vm2782_vm7, %v2705_v17  ;;  %2791 = vst.msk [vmem:[#allocation2 + $0x40] sm:$0xff] %vm2782_vm7, %v2703_v18  ;;  %v3657_v17 = vld [vmem:[%s4579_s7 + $0x5c8] sm:$0xff]  ;;  %v3656_v18 = vld [vmem:[%s4579_s7 + $0x5c0] sm:$0xff] }
 0x236   : > { %1956 = vrot.lane.b32.xlu1 %v3591_v15, %s3929_s12  ;;  %1954 = vrot.lane.b32.xlu0 %v3590_v16, %s3929_s12 }
 0x238   : > { %v2709_v21 = vpop.permute.xlu1 %2708  ;;  %v2707_v22 = vpop.permute.xlu0 %2706 }
 0x239   : > { %2794 = vst.msk [vmem:[#allocation2 + $0x58] sm:$0xff] %vm2782_vm7, %v2709_v21  ;;  %2793 = vst.msk [vmem:[#allocation2 + $0x50] sm:$0xff] %vm2782_vm7, %v2707_v22  ;;  %v3659_v21 = vld [vmem:[%s4579_s7 + $0x5d8] sm:$0xff]  ;;  %v3658_v22 = vld [vmem:[%s4579_s7 + $0x5d0] sm:$0xff] }
 0x23a   : > { %2146 = vrot.lane.b32.xlu1 %v3621_v19, %s3930_s14  ;;  %2144 = vrot.lane.b32.xlu0 %v3620_v20, %s3930_s14 }
 0x23c   : > { %v2899_v25 = vpop.permute.xlu1 %2898  ;;  %v2897_v26 = vpop.permute.xlu0 %2896 }
 0x23d   : > { %2986 = vst.msk [vmem:[#allocation2 + $0x48] sm:$0xff] %vm2976_vm8, %v2899_v25  ;;  %2985 = vst.msk [vmem:[#allocation2 + $0x40] sm:$0xff] %vm2976_vm8, %v2897_v26 }
 0x23e   : > { %2150 = vrot.lane.b32.xlu1 %v3623_v23, %s3930_s14  ;;  %2148 = vrot.lane.b32.xlu0 %v3622_v24, %s3930_s14 }
 0x240   : > { %v2903_v29 = vpop.permute.xlu1 %2902  ;;  %v2901_v30 = vpop.permute.xlu0 %2900 }
 0x241   : > { %2988 = vst.msk [vmem:[#allocation2 + $0x58] sm:$0xff] %vm2976_vm8, %v2903_v29  ;;  %2987 = vst.msk [vmem:[#allocation2 + $0x50] sm:$0xff] %vm2976_vm8, %v2901_v30  ;;  %v3688_v29 = vld [vmem:[%s4579_s7 + $0x6c0] sm:$0xff] }
 0x242   : > { %2340 = vrot.lane.b32.xlu1 %v3653_v27, %s3931_s21  ;;  %2338 = vrot.lane.b32.xlu0 %v3652_v28, %s3931_s21  ;;  %v3689_v28 = vld [vmem:[%s4579_s7 + $0x6c8] sm:$0xff] }
 0x244   : > { %v1937_v33 = vpop.permute.xlu1 %1936  ;;  %v1935_v34 = vpop.permute.xlu0 %1934  ;;  %v3017_v35 = vld [vmem:[#allocation2 + $0x40] sm:$0xff]  ;;  %v3018_v36 = vld [vmem:[#allocation2 + $0x48] sm:$0xff] }
 0x245   : > { %2020 = vst.msk [vmem:[#allocation2 + $0x68] sm:$0xff] %vm2006_vm3, %v1937_v33  ;;  %2019 = vst.msk [vmem:[#allocation2 + $0x60] sm:$0xff] %vm2006_vm3, %v1935_v34  ;;  %v3045_v37 = vpack.c.bf16 %v3018_v36, %v3017_v35  ;;  %v3691_v35 = vld [vmem:[%s4579_s7 + $0x6d8] sm:$0xff]  ;;  %v3690_v36 = vld [vmem:[%s4579_s7 + $0x6d0] sm:$0xff] }
 0x246   : > { %2344 = vrot.lane.b32.xlu1 %v3655_v31, %s3931_s21  ;;  %2342 = vrot.lane.b32.xlu0 %v3654_v32, %s3931_s21 }
 0x247   : > { %3819 = vmatprep.mubr.bf16.mxu0 %v3045_v37 }
 0x248   : > { %v1941_v40 = vpop.permute.xlu1 %1940  ;;  %v1939_v41 = vpop.permute.xlu0 %1938  ;;  %v3019_v42 = vld [vmem:[#allocation2 + $0x50] sm:$0xff]  ;;  %v3020_v43 = vld [vmem:[#allocation2 + $0x58] sm:$0xff] }
 0x249   : > { %2022 = vst.msk [vmem:[#allocation2 + $0x78] sm:$0xff] %vm2006_vm3, %v1941_v40  ;;  %2021 = vst.msk [vmem:[#allocation2 + $0x70] sm:$0xff] %vm2006_vm3, %v1939_v41  ;;  %v3046_v44 = vpack.c.bf16 %v3020_v43, %v3019_v42  ;;  %v3720_v40 = vld [vmem:[%s4579_s7 + $0x7c0] sm:$0xff]  ;;  %v3723_v43 = vld [vmem:[%s4579_s7 + $0x7d8] sm:$0xff] }
 0x24a   : > { %2534 = vrot.lane.b32.xlu1 %v3685_v38, %s3932_s26  ;;  %2532 = vrot.lane.b32.xlu0 %v3684_v39, %s3932_s26  ;;  %v3721_v39 = vld [vmem:[%s4579_s7 + $0x7c8] sm:$0xff] }
 0x24b   : > { %3820 = vmatmul.mubr.bf16.gmra.mrb[8].mxu0 %v3046_v44  ;;  %v3722_v44 = vld [vmem:[%s4579_s7 + $0x7d0] sm:$0xff] }
 0x24c   : > { %v2131_v47 = vpop.permute.xlu1 %2130  ;;  %v2129_v48 = vpop.permute.xlu0 %2128 }
 0x24d   : > { %2214 = vst.msk [vmem:[#allocation2 + $0x68] sm:$0xff] %vm2200_vm4, %v2131_v47  ;;  %2213 = vst.msk [vmem:[#allocation2 + $0x60] sm:$0xff] %vm2200_vm4, %v2129_v48  ;;  %v3753_v47 = vld [vmem:[%s4579_s7 + $0x8c8] sm:$0xff]  ;;  %v3752_v48 = vld [vmem:[%s4579_s7 + $0x8c0] sm:$0xff] }
 0x24e   : > { %2538 = vrot.lane.b32.xlu1 %v3687_v45, %s3932_s26  ;;  %2536 = vrot.lane.b32.xlu0 %v3686_v46, %s3932_s26 }
 0x250   : > { %v2135_v51 = vpop.permute.xlu1 %2134  ;;  %v2133_v52 = vpop.permute.xlu0 %2132 }
 0x251   : > { %2216 = vst.msk [vmem:[#allocation2 + $0x78] sm:$0xff] %vm2200_vm4, %v2135_v51  ;;  %2215 = vst.msk [vmem:[#allocation2 + $0x70] sm:$0xff] %vm2200_vm4, %v2133_v52  ;;  %v3755_v51 = vld [vmem:[%s4579_s7 + $0x8d8] sm:$0xff]  ;;  %v3754_v52 = vld [vmem:[%s4579_s7 + $0x8d0] sm:$0xff] }
 0x252   : > { %2728 = vrot.lane.b32.xlu1 %v3717_v49, %s3933_s4  ;;  %2726 = vrot.lane.b32.xlu0 %v3716_v50, %s3933_s4 }
 0x254   : > { %v2325_v55 = vpop.permute.xlu1 %2324  ;;  %v2323_v56 = vpop.permute.xlu0 %2322 }
 0x255   : > { %2408 = vst.msk [vmem:[#allocation2 + $0x68] sm:$0xff] %vm2394_vm5, %v2325_v55  ;;  %2407 = vst.msk [vmem:[#allocation2 + $0x60] sm:$0xff] %vm2394_vm5, %v2323_v56  ;;  %v3597_v55 = vld [vmem:[%s4579_s7 + $0x3e8] sm:$0xff]  ;;  %v3596_v56 = vld [vmem:[%s4579_s7 + $0x3e0] sm:$0xff] }
 0x256   : > { %2732 = vrot.lane.b32.xlu1 %v3719_v53, %s3933_s4  ;;  %2730 = vrot.lane.b32.xlu0 %v3718_v54, %s3933_s4 }
 0x258   : > { %v2329_v59 = vpop.permute.xlu1 %2328  ;;  %v2327_v60 = vpop.permute.xlu0 %2326 }
 0x259   : > { %2410 = vst.msk [vmem:[#allocation2 + $0x78] sm:$0xff] %vm2394_vm5, %v2329_v59  ;;  %2409 = vst.msk [vmem:[#allocation2 + $0x70] sm:$0xff] %vm2394_vm5, %v2327_v60  ;;  %v3599_v59 = vld [vmem:[%s4579_s7 + $0x3f8] sm:$0xff]  ;;  %v3598_v60 = vld [vmem:[%s4579_s7 + $0x3f0] sm:$0xff] }
 0x25a   : > { %2922 = vrot.lane.b32.xlu1 %v3749_v57, %s3934_s11  ;;  %2920 = vrot.lane.b32.xlu0 %v3748_v58, %s3934_s11 }
 0x25c   : > { %v2519_v63 = vpop.permute.xlu1 %2518  ;;  %v2517_v0 = vpop.permute.xlu0 %2516 }
 0x25d   : > { %2602 = vst.msk [vmem:[#allocation2 + $0x68] sm:$0xff] %vm2588_vm6, %v2519_v63  ;;  %2601 = vst.msk [vmem:[#allocation2 + $0x60] sm:$0xff] %vm2588_vm6, %v2517_v0  ;;  %v3629_v63 = vld [vmem:[%s4579_s7 + $0x4e8] sm:$0xff]  ;;  %v3628_v0 = vld [vmem:[%s4579_s7 + $0x4e0] sm:$0xff] }
 0x25e   : > { %2926 = vrot.lane.b32.xlu1 %v3751_v61, %s3934_s11  ;;  %2924 = vrot.lane.b32.xlu0 %v3750_v62, %s3934_s11 }
 0x260   : > { %v2523_v3 = vpop.permute.xlu1 %2522  ;;  %v2521_v4 = vpop.permute.xlu0 %2520 }
 0x261   : > { %2604 = vst.msk [vmem:[#allocation2 + $0x78] sm:$0xff] %vm2588_vm6, %v2523_v3  ;;  %2603 = vst.msk [vmem:[#allocation2 + $0x70] sm:$0xff] %vm2588_vm6, %v2521_v4  ;;  %v3631_v3 = vld [vmem:[%s4579_s7 + $0x4f8] sm:$0xff]  ;;  %v3630_v4 = vld [vmem:[%s4579_s7 + $0x4f0] sm:$0xff] }
 0x262   : > { %1960 = vrot.lane.b32.xlu1 %v3593_v1, %s3929_s12  ;;  %1958 = vrot.lane.b32.xlu0 %v3592_v2, %s3929_s12 }
 0x264   : > { %v2713_v7 = vpop.permute.xlu1 %2712  ;;  %v2711_v8 = vpop.permute.xlu0 %2710 }
 0x265   : > { %2796 = vst.msk [vmem:[#allocation2 + $0x68] sm:$0xff] %vm2782_vm7, %v2713_v7  ;;  %2795 = vst.msk [vmem:[#allocation2 + $0x60] sm:$0xff] %vm2782_vm7, %v2711_v8  ;;  %v3661_v7 = vld [vmem:[%s4579_s7 + $0x5e8] sm:$0xff]  ;;  %v3660_v8 = vld [vmem:[%s4579_s7 + $0x5e0] sm:$0xff] }
 0x266   : > { %1964 = vrot.lane.b32.xlu1 %v3595_v5, %s3929_s12  ;;  %1962 = vrot.lane.b32.xlu0 %v3594_v6, %s3929_s12 }
 0x268   : > { %v2717_v11 = vpop.permute.xlu1 %2716  ;;  %v2715_v12 = vpop.permute.xlu0 %2714 }
 0x269   : > { %2798 = vst.msk [vmem:[#allocation2 + $0x78] sm:$0xff] %vm2782_vm7, %v2717_v11  ;;  %2797 = vst.msk [vmem:[#allocation2 + $0x70] sm:$0xff] %vm2782_vm7, %v2715_v12  ;;  %v3663_v11 = vld [vmem:[%s4579_s7 + $0x5f8] sm:$0xff]  ;;  %v3662_v12 = vld [vmem:[%s4579_s7 + $0x5f0] sm:$0xff] }
 0x26a   : > { %2154 = vrot.lane.b32.xlu1 %v3625_v9, %s3930_s14  ;;  %2152 = vrot.lane.b32.xlu0 %v3624_v10, %s3930_s14 }
 0x26c   : > { %v2907_v15 = vpop.permute.xlu1 %2906  ;;  %v2905_v16 = vpop.permute.xlu0 %2904 }
 0x26d   : > { %2990 = vst.msk [vmem:[#allocation2 + $0x68] sm:$0xff] %vm2976_vm8, %v2907_v15  ;;  %2989 = vst.msk [vmem:[#allocation2 + $0x60] sm:$0xff] %vm2976_vm8, %v2905_v16 }
 0x26e   : > { %2158 = vrot.lane.b32.xlu1 %v3627_v13, %s3930_s14  ;;  %2156 = vrot.lane.b32.xlu0 %v3626_v14, %s3930_s14 }
 0x270   : > { %v2911_v19 = vpop.permute.xlu1 %2910  ;;  %v2909_v20 = vpop.permute.xlu0 %2908 }
 0x271   : > { %2992 = vst.msk [vmem:[#allocation2 + $0x78] sm:$0xff] %vm2976_vm8, %v2911_v19  ;;  %2991 = vst.msk [vmem:[#allocation2 + $0x70] sm:$0xff] %vm2976_vm8, %v2909_v20  ;;  %v3692_v19 = vld [vmem:[%s4579_s7 + $0x6e0] sm:$0xff] }
 0x272   : > { %2348 = vrot.lane.b32.xlu1 %v3657_v17, %s3931_s21  ;;  %2346 = vrot.lane.b32.xlu0 %v3656_v18, %s3931_s21  ;;  %v3693_v18 = vld [vmem:[%s4579_s7 + $0x6e8] sm:$0xff] }
 0x274   : > { %v1945_v23 = vpop.permute.xlu1 %1944  ;;  %v1943_v24 = vpop.permute.xlu0 %1942  ;;  %v3021_v25 = vld [vmem:[#allocation2 + $0x60] sm:$0xff]  ;;  %v3022_v26 = vld [vmem:[#allocation2 + $0x68] sm:$0xff] }
 0x275   : > { %2024 = vst.msk [vmem:[#allocation2 + $0x88] sm:$0xff] %vm2006_vm3, %v1945_v23  ;;  %2023 = vst.msk [vmem:[#allocation2 + $0x80] sm:$0xff] %vm2006_vm3, %v1943_v24  ;;  %v3047_v27 = vpack.c.bf16 %v3022_v26, %v3021_v25  ;;  %v3695_v25 = vld [vmem:[%s4579_s7 + $0x6f8] sm:$0xff]  ;;  %v3694_v26 = vld [vmem:[%s4579_s7 + $0x6f0] sm:$0xff] }
 0x276   : > { %2352 = vrot.lane.b32.xlu1 %v3659_v21, %s3931_s21  ;;  %2350 = vrot.lane.b32.xlu0 %v3658_v22, %s3931_s21 }
 0x277   : > { %3823 = vmatprep.mubr.bf16.mxu0 %v3047_v27 }
 0x278   : > { %v1949_v30 = vpop.permute.xlu1 %1948  ;;  %v1947_v31 = vpop.permute.xlu0 %1946  ;;  %v3023_v32 = vld [vmem:[#allocation2 + $0x70] sm:$0xff]  ;;  %v3024_v33 = vld [vmem:[#allocation2 + $0x78] sm:$0xff] }
 0x279   : > { %2026 = vst.msk [vmem:[#allocation2 + $0x98] sm:$0xff] %vm2006_vm3, %v1949_v30  ;;  %2025 = vst.msk [vmem:[#allocation2 + $0x90] sm:$0xff] %vm2006_vm3, %v1947_v31  ;;  %v3048_v34 = vpack.c.bf16 %v3024_v33, %v3023_v32  ;;  %v3724_v30 = vld [vmem:[%s4579_s7 + $0x7e0] sm:$0xff]  ;;  %v3727_v33 = vld [vmem:[%s4579_s7 + $0x7f8] sm:$0xff] }
 0x27a   : > { %2542 = vrot.lane.b32.xlu1 %v3689_v28, %s3932_s26  ;;  %2540 = vrot.lane.b32.xlu0 %v3688_v29, %s3932_s26  ;;  %v3725_v29 = vld [vmem:[%s4579_s7 + $0x7e8] sm:$0xff] }
 0x27b   : > { %3824 = vmatmul.mubr.bf16.gmra.mrb[12].mxu0 %v3048_v34  ;;  %v3726_v34 = vld [vmem:[%s4579_s7 + $0x7f0] sm:$0xff] }
 0x27c   : > { %v2139_v37 = vpop.permute.xlu1 %2138  ;;  %v2137_v38 = vpop.permute.xlu0 %2136 }
 0x27d   : > { %2218 = vst.msk [vmem:[#allocation2 + $0x88] sm:$0xff] %vm2200_vm4, %v2139_v37  ;;  %2217 = vst.msk [vmem:[#allocation2 + $0x80] sm:$0xff] %vm2200_vm4, %v2137_v38  ;;  %v3757_v37 = vld [vmem:[%s4579_s7 + $0x8e8] sm:$0xff]  ;;  %v3756_v38 = vld [vmem:[%s4579_s7 + $0x8e0] sm:$0xff] }
 0x27e   : > { %2546 = vrot.lane.b32.xlu1 %v3691_v35, %s3932_s26  ;;  %2544 = vrot.lane.b32.xlu0 %v3690_v36, %s3932_s26 }
 0x280   : > { %v2143_v41 = vpop.permute.xlu1 %2142  ;;  %v2141_v42 = vpop.permute.xlu0 %2140 }
 0x281   : > { %2220 = vst.msk [vmem:[#allocation2 + $0x98] sm:$0xff] %vm2200_vm4, %v2143_v41  ;;  %2219 = vst.msk [vmem:[#allocation2 + $0x90] sm:$0xff] %vm2200_vm4, %v2141_v42  ;;  %v3759_v41 = vld [vmem:[%s4579_s7 + $0x8f8] sm:$0xff]  ;;  %v3758_v42 = vld [vmem:[%s4579_s7 + $0x8f0] sm:$0xff] }
 0x282   : > { %2736 = vrot.lane.b32.xlu1 %v3721_v39, %s3933_s4  ;;  %2734 = vrot.lane.b32.xlu0 %v3720_v40, %s3933_s4 }
 0x284   : > { %v2333_v45 = vpop.permute.xlu1 %2332  ;;  %v2331_v46 = vpop.permute.xlu0 %2330 }
 0x285   : > { %2412 = vst.msk [vmem:[#allocation2 + $0x88] sm:$0xff] %vm2394_vm5, %v2333_v45  ;;  %2411 = vst.msk [vmem:[#allocation2 + $0x80] sm:$0xff] %vm2394_vm5, %v2331_v46 }
 0x286   : > { %2740 = vrot.lane.b32.xlu1 %v3723_v43, %s3933_s4  ;;  %2738 = vrot.lane.b32.xlu0 %v3722_v44, %s3933_s4 }
 0x288   : > { %v2337_v49 = vpop.permute.xlu1 %2336  ;;  %v2335_v50 = vpop.permute.xlu0 %2334 }
 0x289   : > { %2414 = vst.msk [vmem:[#allocation2 + $0x98] sm:$0xff] %vm2394_vm5, %v2337_v49  ;;  %2413 = vst.msk [vmem:[#allocation2 + $0x90] sm:$0xff] %vm2394_vm5, %v2335_v50 }
 0x28a   : > { %2930 = vrot.lane.b32.xlu1 %v3753_v47, %s3934_s11  ;;  %2928 = vrot.lane.b32.xlu0 %v3752_v48, %s3934_s11 }
 0x28c   : > { %v2527_v53 = vpop.permute.xlu1 %2526  ;;  %v2525_v54 = vpop.permute.xlu0 %2524 }
 0x28d   : > { %2606 = vst.msk [vmem:[#allocation2 + $0x88] sm:$0xff] %vm2588_vm6, %v2527_v53  ;;  %2605 = vst.msk [vmem:[#allocation2 + $0x80] sm:$0xff] %vm2588_vm6, %v2525_v54 }
 0x28e   : > { %2934 = vrot.lane.b32.xlu1 %v3755_v51, %s3934_s11  ;;  %2932 = vrot.lane.b32.xlu0 %v3754_v52, %s3934_s11 }
 0x290   : > { %v2531_v57 = vpop.permute.xlu1 %2530  ;;  %v2529_v58 = vpop.permute.xlu0 %2528 }
 0x291   : > { %2608 = vst.msk [vmem:[#allocation2 + $0x98] sm:$0xff] %vm2588_vm6, %v2531_v57  ;;  %2607 = vst.msk [vmem:[#allocation2 + $0x90] sm:$0xff] %vm2588_vm6, %v2529_v58 }
 0x292   : > { %1968 = vrot.lane.b32.xlu1 %v3597_v55, %s3929_s12  ;;  %1966 = vrot.lane.b32.xlu0 %v3596_v56, %s3929_s12 }
 0x294   : > { %v2721_v61 = vpop.permute.xlu1 %2720  ;;  %v2719_v62 = vpop.permute.xlu0 %2718 }
 0x295   : > { %2800 = vst.msk [vmem:[#allocation2 + $0x88] sm:$0xff] %vm2782_vm7, %v2721_v61  ;;  %2799 = vst.msk [vmem:[#allocation2 + $0x80] sm:$0xff] %vm2782_vm7, %v2719_v62 }
 0x296   : > { %1972 = vrot.lane.b32.xlu1 %v3599_v59, %s3929_s12  ;;  %1970 = vrot.lane.b32.xlu0 %v3598_v60, %s3929_s12 }
 0x298   : > { %v2725_v1 = vpop.permute.xlu1 %2724  ;;  %v2723_v2 = vpop.permute.xlu0 %2722 }
 0x299   : > { %2802 = vst.msk [vmem:[#allocation2 + $0x98] sm:$0xff] %vm2782_vm7, %v2725_v1  ;;  %2801 = vst.msk [vmem:[#allocation2 + $0x90] sm:$0xff] %vm2782_vm7, %v2723_v2 }
 0x29a   : > { %2162 = vrot.lane.b32.xlu1 %v3629_v63, %s3930_s14  ;;  %2160 = vrot.lane.b32.xlu0 %v3628_v0, %s3930_s14 }
 0x29c   : > { %v2915_v5 = vpop.permute.xlu1 %2914  ;;  %v2913_v6 = vpop.permute.xlu0 %2912 }
 0x29d   : > { %2994 = vst.msk [vmem:[#allocation2 + $0x88] sm:$0xff] %vm2976_vm8, %v2915_v5  ;;  %2993 = vst.msk [vmem:[#allocation2 + $0x80] sm:$0xff] %vm2976_vm8, %v2913_v6 }
 0x29e   : > { %2166 = vrot.lane.b32.xlu1 %v3631_v3, %s3930_s14  ;;  %2164 = vrot.lane.b32.xlu0 %v3630_v4, %s3930_s14 }
 0x2a0   : > { %v2919_v9 = vpop.permute.xlu1 %2918  ;;  %v2917_v10 = vpop.permute.xlu0 %2916 }
 0x2a1   : > { %2996 = vst.msk [vmem:[#allocation2 + $0x98] sm:$0xff] %vm2976_vm8, %v2919_v9  ;;  %2995 = vst.msk [vmem:[#allocation2 + $0x90] sm:$0xff] %vm2976_vm8, %v2917_v10 }
 0x2a2   : > { %2356 = vrot.lane.b32.xlu1 %v3661_v7, %s3931_s21  ;;  %2354 = vrot.lane.b32.xlu0 %v3660_v8, %s3931_s21 }
 0x2a4   : > { %v1953_v13 = vpop.permute.xlu1 %1952  ;;  %v1951_v14 = vpop.permute.xlu0 %1950  ;;  %v3025_v15 = vld [vmem:[#allocation2 + $0x80] sm:$0xff]  ;;  %v3026_v16 = vld [vmem:[#allocation2 + $0x88] sm:$0xff] }
 0x2a5   : > { %2028 = vst.msk [vmem:[#allocation2 + $0xa8] sm:$0xff] %vm2006_vm3, %v1953_v13  ;;  %2027 = vst.msk [vmem:[#allocation2 + $0xa0] sm:$0xff] %vm2006_vm3, %v1951_v14  ;;  %v3049_v17 = vpack.c.bf16 %v3026_v16, %v3025_v15 }
 0x2a6   : > { %2360 = vrot.lane.b32.xlu1 %v3663_v11, %s3931_s21  ;;  %2358 = vrot.lane.b32.xlu0 %v3662_v12, %s3931_s21 }
 0x2a7   : > { %3827 = vmatprep.mubr.bf16.mxu1 %v3049_v17 }
 0x2a8   : > { %v1957_v20 = vpop.permute.xlu1 %1956  ;;  %v1955_v21 = vpop.permute.xlu0 %1954  ;;  %v3027_v22 = vld [vmem:[#allocation2 + $0x90] sm:$0xff]  ;;  %v3028_v23 = vld [vmem:[#allocation2 + $0x98] sm:$0xff] }
 0x2a9   : > { %2030 = vst.msk [vmem:[#allocation2 + $0xb8] sm:$0xff] %vm2006_vm3, %v1957_v20  ;;  %2029 = vst.msk [vmem:[#allocation2 + $0xb0] sm:$0xff] %vm2006_vm3, %v1955_v21  ;;  %v3050_v24 = vpack.c.bf16 %v3028_v23, %v3027_v22 }
 0x2aa   : > { %2550 = vrot.lane.b32.xlu1 %v3693_v18, %s3932_s26  ;;  %2548 = vrot.lane.b32.xlu0 %v3692_v19, %s3932_s26 }
 0x2ab   : > { %3828 = vmatmul.mubr.bf16.vlgmr.msra.gmra.mrb[0].mxu1 %v3050_v24 }
 0x2ac   : > { %v2147_v27 = vpop.permute.xlu1 %2146  ;;  %v2145_v28 = vpop.permute.xlu0 %2144 }
 0x2ad   : > { %2222 = vst.msk [vmem:[#allocation2 + $0xa8] sm:$0xff] %vm2200_vm4, %v2147_v27  ;;  %2221 = vst.msk [vmem:[#allocation2 + $0xa0] sm:$0xff] %vm2200_vm4, %v2145_v28 }
 0x2ae   : > { %2554 = vrot.lane.b32.xlu1 %v3695_v25, %s3932_s26  ;;  %2552 = vrot.lane.b32.xlu0 %v3694_v26, %s3932_s26 }
 0x2b0   : > { %v2151_v31 = vpop.permute.xlu1 %2150  ;;  %v2149_v32 = vpop.permute.xlu0 %2148 }
 0x2b1   : > { %2224 = vst.msk [vmem:[#allocation2 + $0xb8] sm:$0xff] %vm2200_vm4, %v2151_v31  ;;  %2223 = vst.msk [vmem:[#allocation2 + $0xb0] sm:$0xff] %vm2200_vm4, %v2149_v32 }
 0x2b2   : > { %2744 = vrot.lane.b32.xlu1 %v3725_v29, %s3933_s4  ;;  %2742 = vrot.lane.b32.xlu0 %v3724_v30, %s3933_s4 }
 0x2b4   : > { %v2341_v35 = vpop.permute.xlu1 %2340  ;;  %v2339_v36 = vpop.permute.xlu0 %2338 }
 0x2b5   : > { %2416 = vst.msk [vmem:[#allocation2 + $0xa8] sm:$0xff] %vm2394_vm5, %v2341_v35  ;;  %2415 = vst.msk [vmem:[#allocation2 + $0xa0] sm:$0xff] %vm2394_vm5, %v2339_v36 }
 0x2b6   : > { %2748 = vrot.lane.b32.xlu1 %v3727_v33, %s3933_s4  ;;  %2746 = vrot.lane.b32.xlu0 %v3726_v34, %s3933_s4 }
 0x2b8   : > { %v2345_v39 = vpop.permute.xlu1 %2344  ;;  %v2343_v40 = vpop.permute.xlu0 %2342 }
 0x2b9   : > { %2418 = vst.msk [vmem:[#allocation2 + $0xb8] sm:$0xff] %vm2394_vm5, %v2345_v39  ;;  %2417 = vst.msk [vmem:[#allocation2 + $0xb0] sm:$0xff] %vm2394_vm5, %v2343_v40 }
 0x2ba   : > { %2938 = vrot.lane.b32.xlu1 %v3757_v37, %s3934_s11  ;;  %2936 = vrot.lane.b32.xlu0 %v3756_v38, %s3934_s11 }
 0x2bc   : > { %v2535_v43 = vpop.permute.xlu1 %2534  ;;  %v2533_v44 = vpop.permute.xlu0 %2532 }
 0x2bd   : > { %2610 = vst.msk [vmem:[#allocation2 + $0xa8] sm:$0xff] %vm2588_vm6, %v2535_v43  ;;  %2609 = vst.msk [vmem:[#allocation2 + $0xa0] sm:$0xff] %vm2588_vm6, %v2533_v44 }
 0x2be   : > { %2942 = vrot.lane.b32.xlu1 %v3759_v41, %s3934_s11  ;;  %2940 = vrot.lane.b32.xlu0 %v3758_v42, %s3934_s11 }
 0x2c0   : > { %v2539_v45 = vpop.permute.xlu1 %2538  ;;  %v2537_v46 = vpop.permute.xlu0 %2536 }
 0x2c1   : > { %2612 = vst.msk [vmem:[#allocation2 + $0xb8] sm:$0xff] %vm2588_vm6, %v2539_v45  ;;  %2611 = vst.msk [vmem:[#allocation2 + $0xb0] sm:$0xff] %vm2588_vm6, %v2537_v46 }
 0x2c4   : > { %v2729_v47 = vpop.permute.xlu1 %2728  ;;  %v2727_v48 = vpop.permute.xlu0 %2726 }
 0x2c5   : > { %2804 = vst.msk [vmem:[#allocation2 + $0xa8] sm:$0xff] %vm2782_vm7, %v2729_v47  ;;  %2803 = vst.msk [vmem:[#allocation2 + $0xa0] sm:$0xff] %vm2782_vm7, %v2727_v48 }
 0x2c8   : > { %v2733_v49 = vpop.permute.xlu1 %2732  ;;  %v2731_v50 = vpop.permute.xlu0 %2730 }
 0x2c9   : > { %2806 = vst.msk [vmem:[#allocation2 + $0xb8] sm:$0xff] %vm2782_vm7, %v2733_v49  ;;  %2805 = vst.msk [vmem:[#allocation2 + $0xb0] sm:$0xff] %vm2782_vm7, %v2731_v50 }
 0x2cb   : > { %v3813_v51 = vpop.f32.mrb[0].mxu0 }
 0x2cc   : > { %3284 = vst [vmem:[%s4577_s6 + $0x10] sm:$0xff] %v3813_v51  ;;  %v3155_v52 = vpop.f32.mrb[1].mxu0  ;;  %v2923_v53 = vpop.permute.xlu1 %2922  ;;  %v3357_v62 = vmul.f32 %v3813_v51, %v3813_v51 }
 0x2cd   : > { %3282 = vst [vmem:[%s4577_s6] sm:$0xff] %v3155_v52  ;;  %v2921_v54 = vpop.permute.xlu0 %2920  ;;  %2998 = vst.msk [vmem:[#allocation2 + $0xa8] sm:$0xff] %vm2976_vm8, %v2923_v53  ;;  %v3814_v55 = vpop.f32.mrb[2].mxu0  ;;  %v3355_v57 = vmul.f32 %v3155_v52, %v3155_v52 }
 0x2ce   : > { %2997 = vst.msk [vmem:[#allocation2 + $0xa0] sm:$0xff] %vm2976_vm8, %v2921_v54  ;;  %3285 = vst [vmem:[%s4577_s6 + $0x18] sm:$0xff] %v3814_v55  ;;  %v3158_v56 = vpop.f32.mrb[3].mxu0  ;;  %v3358_v1 = vmul.f32 %v3814_v55, %v3814_v55 }
 0x2cf   : > { %3283 = vst [vmem:[%s4577_s6 + $0x8] sm:$0xff] %v3158_v56  ;;  %v3315_v58 = vadd.f32 %v3158_v56, %v3155_v52  ;;  %v3356_v59 = vmul.f32 %v3158_v56, %v3158_v56 }
 0x2d0   : > { %v2927_v60 = vpop.permute.xlu1 %2926 }
 0x2d1   : > { %v2925_v61 = vpop.permute.xlu0 %2924  ;;  %v3316_v63 = vadd.f32 %v3813_v51, %v3315_v58  ;;  %v3387_v0 = vadd.f32 %v3356_v59, %v3355_v57  ;;  %3000 = vst.msk [vmem:[#allocation2 + $0xb8] sm:$0xff] %vm2976_vm8, %v2927_v60 }
 0x2d2   : > { %2999 = vst.msk [vmem:[#allocation2 + $0xb0] sm:$0xff] %vm2976_vm8, %v2925_v61 }
 0x2d3   : > { %v3388_v2 = vadd.f32 %v3387_v0, %v3357_v62  ;;  %v3317_v3 = vadd.f32 %v3814_v55, %v3316_v63 }
 0x2d4   : > { %v1961_v4 = vpop.permute.xlu1 %1960  ;;  %v3030_v7 = vld [vmem:[#allocation2 + $0xa8] sm:$0xff] }
 0x2d5   : > { %v1959_v5 = vpop.permute.xlu0 %1958  ;;  %v3029_v6 = vld [vmem:[#allocation2 + $0xa0] sm:$0xff]  ;;  %2032 = vst.msk [vmem:[#allocation2 + $0xc8] sm:$0xff] %vm2006_vm3, %v1961_v4  ;;  %v3389_v9 = vadd.f32 %v3388_v2, %v3358_v1 }
 0x2d6   : > { %2031 = vst.msk [vmem:[#allocation2 + $0xc0] sm:$0xff] %vm2006_vm3, %v1959_v5  ;;  %v3051_v8 = vpack.c.bf16 %v3030_v7, %v3029_v6 }
 0x2d8   : > { %3831 = vmatprep.mubr.bf16.mxu1 %v3051_v8  ;;  %v1965_v10 = vpop.permute.xlu1 %1964  ;;  %v3032_v13 = vld [vmem:[#allocation2 + $0xb8] sm:$0xff] }
 0x2d9   : > { %v1963_v11 = vpop.permute.xlu0 %1962  ;;  %v3031_v12 = vld [vmem:[#allocation2 + $0xb0] sm:$0xff]  ;;  %2034 = vst.msk [vmem:[#allocation2 + $0xd8] sm:$0xff] %vm2006_vm3, %v1965_v10 }
 0x2da   : > { %2033 = vst.msk [vmem:[#allocation2 + $0xd0] sm:$0xff] %vm2006_vm3, %v1963_v11  ;;  %v3052_v14 = vpack.c.bf16 %v3032_v13, %v3031_v12 }
 0x2dc   : > { %3832 = vmatmul.mubr.bf16.gmra.mrb[4].mxu1 %v3052_v14  ;;  %v2155_v15 = vpop.permute.xlu1 %2154 }
 0x2dd   : > { %v2153_v16 = vpop.permute.xlu0 %2152  ;;  %2226 = vst.msk [vmem:[#allocation2 + $0xc8] sm:$0xff] %vm2200_vm4, %v2155_v15 }
 0x2de   : > { %2225 = vst.msk [vmem:[#allocation2 + $0xc0] sm:$0xff] %vm2200_vm4, %v2153_v16 }
 0x2e0   : > { %v2159_v17 = vpop.permute.xlu1 %2158 }
 0x2e1   : > { %v2157_v18 = vpop.permute.xlu0 %2156  ;;  %2228 = vst.msk [vmem:[#allocation2 + $0xd8] sm:$0xff] %vm2200_vm4, %v2159_v17 }
 0x2e2   : > { %2227 = vst.msk [vmem:[#allocation2 + $0xd0] sm:$0xff] %vm2200_vm4, %v2157_v18 }
 0x2e4   : > { %v2349_v19 = vpop.permute.xlu1 %2348 }
 0x2e5   : > { %v2347_v20 = vpop.permute.xlu0 %2346  ;;  %2420 = vst.msk [vmem:[#allocation2 + $0xc8] sm:$0xff] %vm2394_vm5, %v2349_v19 }
 0x2e6   : > { %2419 = vst.msk [vmem:[#allocation2 + $0xc0] sm:$0xff] %vm2394_vm5, %v2347_v20 }
 0x2e8   : > { %v2353_v21 = vpop.permute.xlu1 %2352 }
 0x2e9   : > { %v2351_v22 = vpop.permute.xlu0 %2350  ;;  %2422 = vst.msk [vmem:[#allocation2 + $0xd8] sm:$0xff] %vm2394_vm5, %v2353_v21 }
 0x2ea   : > { %2421 = vst.msk [vmem:[#allocation2 + $0xd0] sm:$0xff] %vm2394_vm5, %v2351_v22 }
 0x2ec   : > { %v2543_v23 = vpop.permute.xlu1 %2542 }
 0x2ed   : > { %v2541_v24 = vpop.permute.xlu0 %2540  ;;  %2614 = vst.msk [vmem:[#allocation2 + $0xc8] sm:$0xff] %vm2588_vm6, %v2543_v23 }
 0x2ee   : > { %2613 = vst.msk [vmem:[#allocation2 + $0xc0] sm:$0xff] %vm2588_vm6, %v2541_v24 }
 0x2f0   : > { %v2547_v25 = vpop.permute.xlu1 %2546 }
 0x2f1   : > { %v2545_v26 = vpop.permute.xlu0 %2544  ;;  %2616 = vst.msk [vmem:[#allocation2 + $0xd8] sm:$0xff] %vm2588_vm6, %v2547_v25 }
 0x2f2   : > { %2615 = vst.msk [vmem:[#allocation2 + $0xd0] sm:$0xff] %vm2588_vm6, %v2545_v26 }
 0x2f3   : > { %v3817_v27 = vpop.f32.mrb[4].mxu0 }
 0x2f4   : > { %3288 = vst [vmem:[%s4577_s6 + $0x30] sm:$0xff] %v3817_v27  ;;  %v3171_v28 = vpop.f32.mrb[5].mxu0  ;;  %v2737_v31 = vpop.permute.xlu1 %2736  ;;  %v3361_v40 = vmul.f32 %v3817_v27, %v3817_v27 }
 0x2f5   : > { %3286 = vst [vmem:[%s4577_s6 + $0x20] sm:$0xff] %v3171_v28  ;;  %v3318_v29 = vadd.f32 %v3317_v3, %v3171_v28  ;;  %v3359_v30 = vmul.f32 %v3171_v28, %v3171_v28  ;;  %v2735_v32 = vpop.permute.xlu0 %2734  ;;  %2808 = vst.msk [vmem:[#allocation2 + $0xc8] sm:$0xff] %vm2782_vm7, %v2737_v31  ;;  %v3818_v33 = vpop.f32.mrb[6].mxu0 }
 0x2f6   : > { %2807 = vst.msk [vmem:[#allocation2 + $0xc0] sm:$0xff] %vm2782_vm7, %v2735_v32  ;;  %3289 = vst [vmem:[%s4577_s6 + $0x38] sm:$0xff] %v3818_v33  ;;  %v3174_v35 = vpop.f32.mrb[7].mxu0  ;;  %v3362_v43 = vmul.f32 %v3818_v33, %v3818_v33 }
 0x2f7   : > { %v3390_v34 = vadd.f32 %v3389_v9, %v3359_v30  ;;  %3287 = vst [vmem:[%s4577_s6 + $0x28] sm:$0xff] %v3174_v35  ;;  %v3319_v36 = vadd.f32 %v3318_v29, %v3174_v35  ;;  %v3360_v37 = vmul.f32 %v3174_v35, %v3174_v35 }
 0x2f8   : > { %v2741_v38 = vpop.permute.xlu1 %2740 }
 0x2f9   : > { %v2739_v39 = vpop.permute.xlu0 %2738  ;;  %v3320_v41 = vadd.f32 %v3817_v27, %v3319_v36  ;;  %v3391_v42 = vadd.f32 %v3390_v34, %v3360_v37  ;;  %2810 = vst.msk [vmem:[#allocation2 + $0xd8] sm:$0xff] %vm2782_vm7, %v2741_v38 }
 0x2fa   : > { %2809 = vst.msk [vmem:[#allocation2 + $0xd0] sm:$0xff] %vm2782_vm7, %v2739_v39 }
 0x2fb   : > { %v3392_v44 = vadd.f32 %v3391_v42, %v3361_v40  ;;  %v3321_v45 = vadd.f32 %v3818_v33, %v3320_v41 }
 0x2fc   : > { %v2931_v46 = vpop.permute.xlu1 %2930 }
 0x2fd   : > { %v2929_v47 = vpop.permute.xlu0 %2928  ;;  %3002 = vst.msk [vmem:[#allocation2 + $0xc8] sm:$0xff] %vm2976_vm8, %v2931_v46  ;;  %v3393_v48 = vadd.f32 %v3392_v44, %v3362_v43 }
 0x2fe   : > { %3001 = vst.msk [vmem:[#allocation2 + $0xc0] sm:$0xff] %vm2976_vm8, %v2929_v47 }
 0x300   : > { %v2935_v49 = vpop.permute.xlu1 %2934 }
 0x301   : > { %v2933_v50 = vpop.permute.xlu0 %2932  ;;  %3004 = vst.msk [vmem:[#allocation2 + $0xd8] sm:$0xff] %vm2976_vm8, %v2935_v49 }
 0x302   : > { %3003 = vst.msk [vmem:[#allocation2 + $0xd0] sm:$0xff] %vm2976_vm8, %v2933_v50 }
 0x304   : > { %v1969_v51 = vpop.permute.xlu1 %1968  ;;  %v3034_v54 = vld [vmem:[#allocation2 + $0xc8] sm:$0xff] }
 0x305   : > { %v1967_v52 = vpop.permute.xlu0 %1966  ;;  %v3033_v53 = vld [vmem:[#allocation2 + $0xc0] sm:$0xff]  ;;  %2036 = vst.msk [vmem:[#allocation2 + $0xe8] sm:$0xff] %vm2006_vm3, %v1969_v51 }
 0x306   : > { %2035 = vst.msk [vmem:[#allocation2 + $0xe0] sm:$0xff] %vm2006_vm3, %v1967_v52  ;;  %v3053_v55 = vpack.c.bf16 %v3034_v54, %v3033_v53 }
 0x308   : > { %3835 = vmatprep.mubr.bf16.mxu1 %v3053_v55  ;;  %v1973_v56 = vpop.permute.xlu1 %1972  ;;  %v3036_v59 = vld [vmem:[#allocation2 + $0xd8] sm:$0xff] }
 0x309   : > { %v1971_v57 = vpop.permute.xlu0 %1970  ;;  %v3035_v58 = vld [vmem:[#allocation2 + $0xd0] sm:$0xff]  ;;  %2038 = vst.msk [vmem:[#allocation2 + $0xf8] sm:$0xff] %vm2006_vm3, %v1973_v56 }
 0x30a   : > { %2037 = vst.msk [vmem:[#allocation2 + $0xf0] sm:$0xff] %vm2006_vm3, %v1971_v57  ;;  %v3054_v60 = vpack.c.bf16 %v3036_v59, %v3035_v58 }
 0x30c   : > { %3836 = vmatmul.mubr.bf16.gmra.mrb[8].mxu1 %v3054_v60  ;;  %v2163_v61 = vpop.permute.xlu1 %2162 }
 0x30d   : > { %v2161_v62 = vpop.permute.xlu0 %2160  ;;  %2230 = vst.msk [vmem:[#allocation2 + $0xe8] sm:$0xff] %vm2200_vm4, %v2163_v61 }
 0x30e   : > { %2229 = vst.msk [vmem:[#allocation2 + $0xe0] sm:$0xff] %vm2200_vm4, %v2161_v62 }
 0x310   : > { %v2167_v63 = vpop.permute.xlu1 %2166 }
 0x311   : > { %v2165_v0 = vpop.permute.xlu0 %2164  ;;  %2232 = vst.msk [vmem:[#allocation2 + $0xf8] sm:$0xff] %vm2200_vm4, %v2167_v63 }
 0x312   : > { %2231 = vst.msk [vmem:[#allocation2 + $0xf0] sm:$0xff] %vm2200_vm4, %v2165_v0 }
 0x314   : > { %v2357_v1 = vpop.permute.xlu1 %2356 }
 0x315   : > { %v2355_v2 = vpop.permute.xlu0 %2354  ;;  %2424 = vst.msk [vmem:[#allocation2 + $0xe8] sm:$0xff] %vm2394_vm5, %v2357_v1 }
 0x316   : > { %2423 = vst.msk [vmem:[#allocation2 + $0xe0] sm:$0xff] %vm2394_vm5, %v2355_v2 }
 0x318   : > { %v2361_v3 = vpop.permute.xlu1 %2360 }
 0x319   : > { %v2359_v4 = vpop.permute.xlu0 %2358  ;;  %2426 = vst.msk [vmem:[#allocation2 + $0xf8] sm:$0xff] %vm2394_vm5, %v2361_v3 }
 0x31a   : > { %2425 = vst.msk [vmem:[#allocation2 + $0xf0] sm:$0xff] %vm2394_vm5, %v2359_v4 }
 0x31c   : > { %v2551_v5 = vpop.permute.xlu1 %2550 }
 0x31d   : > { %v2549_v6 = vpop.permute.xlu0 %2548  ;;  %2618 = vst.msk [vmem:[#allocation2 + $0xe8] sm:$0xff] %vm2588_vm6, %v2551_v5 }
 0x31e   : > { %2617 = vst.msk [vmem:[#allocation2 + $0xe0] sm:$0xff] %vm2588_vm6, %v2549_v6  ;;  %v3821_v7 = vpop.f32.mrb[8].mxu0 }
 0x31f   : > { %3292 = vst [vmem:[%s4577_s6 + $0x50] sm:$0xff] %v3821_v7  ;;  %v3187_v8 = vpop.f32.mrb[9].mxu0  ;;  %v3365_v20 = vmul.f32 %v3821_v7, %v3821_v7 }
 0x320   : > { %3290 = vst [vmem:[%s4577_s6 + $0x40] sm:$0xff] %v3187_v8  ;;  %v3322_v9 = vadd.f32 %v3321_v45, %v3187_v8  ;;  %v3363_v10 = vmul.f32 %v3187_v8, %v3187_v8  ;;  %v2555_v11 = vpop.permute.xlu1 %2554  ;;  %v3822_v13 = vpop.f32.mrb[10].mxu0 }
 0x321   : > { %v2553_v12 = vpop.permute.xlu0 %2552  ;;  %2620 = vst.msk [vmem:[#allocation2 + $0xf8] sm:$0xff] %vm2588_vm6, %v2555_v11  ;;  %3293 = vst [vmem:[%s4577_s6 + $0x58] sm:$0xff] %v3822_v13  ;;  %v3190_v15 = vpop.f32.mrb[11].mxu0  ;;  %v3366_v23 = vmul.f32 %v3822_v13, %v3822_v13 }
 0x322   : > { %2619 = vst.msk [vmem:[#allocation2 + $0xf0] sm:$0xff] %vm2588_vm6, %v2553_v12  ;;  %v3394_v14 = vadd.f32 %v3393_v48, %v3363_v10  ;;  %3291 = vst [vmem:[%s4577_s6 + $0x48] sm:$0xff] %v3190_v15  ;;  %v3323_v16 = vadd.f32 %v3322_v9, %v3190_v15  ;;  %v3364_v17 = vmul.f32 %v3190_v15, %v3190_v15 }
 0x324   : > { %v2745_v18 = vpop.permute.xlu1 %2744  ;;  %v3324_v21 = vadd.f32 %v3821_v7, %v3323_v16  ;;  %v3395_v22 = vadd.f32 %v3394_v14, %v3364_v17 }
 0x325   : > { %v2743_v19 = vpop.permute.xlu0 %2742  ;;  %2812 = vst.msk [vmem:[#allocation2 + $0xe8] sm:$0xff] %vm2782_vm7, %v2745_v18 }
 0x326   : > { %2811 = vst.msk [vmem:[#allocation2 + $0xe0] sm:$0xff] %vm2782_vm7, %v2743_v19  ;;  %v3396_v24 = vadd.f32 %v3395_v22, %v3365_v20  ;;  %v3325_v25 = vadd.f32 %v3822_v13, %v3324_v21 }
 0x328   : > { %v2749_v26 = vpop.permute.xlu1 %2748  ;;  %v3397_v28 = vadd.f32 %v3396_v24, %v3366_v23 }
 0x329   : > { %v2747_v27 = vpop.permute.xlu0 %2746  ;;  %2814 = vst.msk [vmem:[#allocation2 + $0xf8] sm:$0xff] %vm2782_vm7, %v2749_v26 }
 0x32a   : > { %2813 = vst.msk [vmem:[#allocation2 + $0xf0] sm:$0xff] %vm2782_vm7, %v2747_v27 }
 0x32c   : > { %v2939_v29 = vpop.permute.xlu1 %2938 }
 0x32d   : > { %v2937_v30 = vpop.permute.xlu0 %2936  ;;  %3006 = vst.msk [vmem:[#allocation2 + $0xe8] sm:$0xff] %vm2976_vm8, %v2939_v29 }
 0x32e   : > { %3005 = vst.msk [vmem:[#allocation2 + $0xe0] sm:$0xff] %vm2976_vm8, %v2937_v30 }
 0x330   : > { %v2943_v31 = vpop.permute.xlu1 %2942 }
 0x331   : > { %v2941_v32 = vpop.permute.xlu0 %2940  ;;  %3008 = vst.msk [vmem:[#allocation2 + $0xf8] sm:$0xff] %vm2976_vm8, %v2943_v31 }
 0x332   : > { %3007 = vst.msk [vmem:[#allocation2 + $0xf0] sm:$0xff] %vm2976_vm8, %v2941_v32 }
 0x334   : > { %v3038_v34 = vld [vmem:[#allocation2 + $0xe8] sm:$0xff] }
 0x335   : > { %v3037_v33 = vld [vmem:[#allocation2 + $0xe0] sm:$0xff] }
 0x336   : > { %v3055_v35 = vpack.c.bf16 %v3038_v34, %v3037_v33 }
 0x338   : > { %3839 = vmatprep.mubr.bf16.mxu1 %v3055_v35  ;;  %v3040_v37 = vld [vmem:[#allocation2 + $0xf8] sm:$0xff] }
 0x339   : > { %v3039_v36 = vld [vmem:[#allocation2 + $0xf0] sm:$0xff] }
 0x33a   : > { %v3056_v38 = vpack.c.bf16 %v3040_v37, %v3039_v36 }
 0x33c   : > { %3840 = vmatmul.mubr.bf16.gmra.mrb[12].mxu1 %v3056_v38 }
 0x34e   : > { %v3825_v39 = vpop.f32.mrb[12].mxu0 }
 0x34f   : > { %3296 = vst [vmem:[%s4577_s6 + $0x70] sm:$0xff] %v3825_v39  ;;  %v3203_v40 = vpop.f32.mrb[13].mxu0  ;;  %v3369_v48 = vmul.f32 %v3825_v39, %v3825_v39 }
 0x350   : > { %3294 = vst [vmem:[%s4577_s6 + $0x60] sm:$0xff] %v3203_v40  ;;  %v3326_v41 = vadd.f32 %v3325_v25, %v3203_v40  ;;  %v3367_v42 = vmul.f32 %v3203_v40, %v3203_v40  ;;  %v3826_v43 = vpop.f32.mrb[14].mxu0 }
 0x351   : > { %3297 = vst [vmem:[%s4577_s6 + $0x78] sm:$0xff] %v3826_v43  ;;  %v3206_v44 = vpop.f32.mrb[15].mxu0  ;;  %v3370_v51 = vmul.f32 %v3826_v43, %v3826_v43 }
 0x352   : > { %v3398_v45 = vadd.f32 %v3397_v28, %v3367_v42  ;;  %3295 = vst [vmem:[%s4577_s6 + $0x68] sm:$0xff] %v3206_v44  ;;  %v3327_v46 = vadd.f32 %v3326_v41, %v3206_v44  ;;  %v3368_v47 = vmul.f32 %v3206_v44, %v3206_v44 }
 0x354   : > { %v3328_v49 = vadd.f32 %v3825_v39, %v3327_v46  ;;  %v3399_v50 = vadd.f32 %v3398_v45, %v3368_v47 }
 0x356   : > { %v3400_v52 = vadd.f32 %v3399_v50, %v3369_v48  ;;  %v3329_v53 = vadd.f32 %v3826_v43, %v3328_v49 }
 0x358   : > { %v3401_v54 = vadd.f32 %v3400_v52, %v3370_v51 }
 0x37e   : > { %v3829_v55 = vpop.f32.mrb[0].mxu1 }
 0x37f   : > { %3300 = vst [vmem:[%s4577_s6 + $0x90] sm:$0xff] %v3829_v55  ;;  %v3219_v56 = vpop.f32.mrb[1].mxu1  ;;  %v3373_v0 = vmul.f32 %v3829_v55, %v3829_v55 }
 0x380   : > { %3298 = vst [vmem:[%s4577_s6 + $0x80] sm:$0xff] %v3219_v56  ;;  %v3330_v57 = vadd.f32 %v3329_v53, %v3219_v56  ;;  %v3371_v58 = vmul.f32 %v3219_v56, %v3219_v56  ;;  %v3830_v59 = vpop.f32.mrb[2].mxu1 }
 0x381   : > { %3301 = vst [vmem:[%s4577_s6 + $0x98] sm:$0xff] %v3830_v59  ;;  %v3222_v60 = vpop.f32.mrb[3].mxu1  ;;  %v3374_v3 = vmul.f32 %v3830_v59, %v3830_v59 }
 0x382   : > { %v3402_v61 = vadd.f32 %v3401_v54, %v3371_v58  ;;  %3299 = vst [vmem:[%s4577_s6 + $0x88] sm:$0xff] %v3222_v60  ;;  %v3331_v62 = vadd.f32 %v3330_v57, %v3222_v60  ;;  %v3372_v63 = vmul.f32 %v3222_v60, %v3222_v60 }
 0x384   : > { %v3332_v1 = vadd.f32 %v3829_v55, %v3331_v62  ;;  %v3403_v2 = vadd.f32 %v3402_v61, %v3372_v63 }
 0x386   : > { %v3404_v4 = vadd.f32 %v3403_v2, %v3373_v0  ;;  %v3333_v5 = vadd.f32 %v3830_v59, %v3332_v1  ;;  %v3314_v0 = vld [vmem:[%s5499_s3] sm:$0x1] }
 0x388   : > { %v3405_v6 = vadd.f32 %v3404_v4, %v3374_v3  ;;  %v3354_v3 = vld [vmem:[%s5499_s3 + $0x1] sm:$0x1] }
 0x3af   : > { %v3833_v7 = vpop.f32.mrb[4].mxu1 }
 0x3b0   : > { %3304 = vst [vmem:[%s4577_s6 + $0xb0] sm:$0xff] %v3833_v7  ;;  %v3235_v8 = vpop.f32.mrb[5].mxu1  ;;  %v3377_v16 = vmul.f32 %v3833_v7, %v3833_v7 }
 0x3b1   : > { %3302 = vst [vmem:[%s4577_s6 + $0xa0] sm:$0xff] %v3235_v8  ;;  %v3334_v9 = vadd.f32 %v3333_v5, %v3235_v8  ;;  %v3375_v10 = vmul.f32 %v3235_v8, %v3235_v8  ;;  %v3834_v11 = vpop.f32.mrb[6].mxu1 }
 0x3b2   : > { %3305 = vst [vmem:[%s4577_s6 + $0xb8] sm:$0xff] %v3834_v11  ;;  %v3238_v12 = vpop.f32.mrb[7].mxu1  ;;  %v3378_v19 = vmul.f32 %v3834_v11, %v3834_v11 }
 0x3b3   : > { %v3406_v13 = vadd.f32 %v3405_v6, %v3375_v10  ;;  %3303 = vst [vmem:[%s4577_s6 + $0xa8] sm:$0xff] %v3238_v12  ;;  %v3335_v14 = vadd.f32 %v3334_v9, %v3238_v12  ;;  %v3376_v15 = vmul.f32 %v3238_v12, %v3238_v12 }
 0x3b5   : > { %v3336_v17 = vadd.f32 %v3833_v7, %v3335_v14  ;;  %v3407_v18 = vadd.f32 %v3406_v13, %v3376_v15 }
 0x3b7   : > { %v3408_v20 = vadd.f32 %v3407_v18, %v3377_v16  ;;  %v3337_v21 = vadd.f32 %v3834_v11, %v3336_v17 }
 0x3b9   : > { %v3409_v22 = vadd.f32 %v3408_v20, %v3378_v19 }
 0x3df   : > { %v3837_v23 = vpop.f32.mrb[8].mxu1 }
 0x3e0   : > { %3308 = vst [vmem:[%s4577_s6 + $0xd0] sm:$0xff] %v3837_v23  ;;  %v3251_v24 = vpop.f32.mrb[9].mxu1  ;;  %v3381_v32 = vmul.f32 %v3837_v23, %v3837_v23 }
 0x3e1   : > { %3306 = vst [vmem:[%s4577_s6 + $0xc0] sm:$0xff] %v3251_v24  ;;  %v3338_v25 = vadd.f32 %v3337_v21, %v3251_v24  ;;  %v3379_v26 = vmul.f32 %v3251_v24, %v3251_v24  ;;  %v3838_v27 = vpop.f32.mrb[10].mxu1 }
 0x3e2   : > { %3309 = vst [vmem:[%s4577_s6 + $0xd8] sm:$0xff] %v3838_v27  ;;  %v3254_v28 = vpop.f32.mrb[11].mxu1  ;;  %v3382_v35 = vmul.f32 %v3838_v27, %v3838_v27 }
 0x3e3   : > { %v3410_v29 = vadd.f32 %v3409_v22, %v3379_v26  ;;  %3307 = vst [vmem:[%s4577_s6 + $0xc8] sm:$0xff] %v3254_v28  ;;  %v3339_v30 = vadd.f32 %v3338_v25, %v3254_v28  ;;  %v3380_v31 = vmul.f32 %v3254_v28, %v3254_v28 }
 0x3e5   : > { %v3340_v33 = vadd.f32 %v3837_v23, %v3339_v30  ;;  %v3411_v34 = vadd.f32 %v3410_v29, %v3380_v31 }
 0x3e7   : > { %v3412_v36 = vadd.f32 %v3411_v34, %v3381_v32  ;;  %v3341_v37 = vadd.f32 %v3838_v27, %v3340_v33 }
 0x3e9   : > { %v3413_v38 = vadd.f32 %v3412_v36, %v3382_v35 }
 0x40f   : > { %v3841_v39 = vpop.f32.mrb[12].mxu1 }
 0x410   : > { %3312 = vst [vmem:[%s4577_s6 + $0xf0] sm:$0xff] %v3841_v39  ;;  %v3267_v40 = vpop.f32.mrb[13].mxu1  ;;  %v3385_v48 = vmul.f32 %v3841_v39, %v3841_v39 }
 0x411   : > { %3310 = vst [vmem:[%s4577_s6 + $0xe0] sm:$0xff] %v3267_v40  ;;  %v3342_v41 = vadd.f32 %v3341_v37, %v3267_v40  ;;  %v3383_v42 = vmul.f32 %v3267_v40, %v3267_v40  ;;  %v3842_v43 = vpop.f32.mrb[14].mxu1 }
 0x412   : > { %3313 = vst [vmem:[%s4577_s6 + $0xf8] sm:$0xff] %v3842_v43  ;;  %v3270_v44 = vpop.f32.mrb[15].mxu1  ;;  %v3386_v51 = vmul.f32 %v3842_v43, %v3842_v43 }
 0x413   : > { %v3414_v45 = vadd.f32 %v3413_v38, %v3383_v42  ;;  %3311 = vst [vmem:[%s4577_s6 + $0xe8] sm:$0xff] %v3270_v44  ;;  %v3343_v46 = vadd.f32 %v3342_v41, %v3270_v44  ;;  %v3384_v47 = vmul.f32 %v3270_v44, %v3270_v44 }
 0x415   : > { %v3344_v49 = vadd.f32 %v3841_v39, %v3343_v46  ;;  %v3415_v50 = vadd.f32 %v3414_v45, %v3384_v47 }
 0x417   : > { %v3345_v52 = vadd.f32 %v3842_v43, %v3344_v49  ;;  %v3416_v53 = vadd.f32 %v3415_v50, %v3385_v48 }
 0x419   : > { %v3346_v54 = vrot.slane %v3345_v52, 4  ;;  %v3417_v55 = vadd.f32 %v3416_v53, %v3386_v51 }
 0x41b   : > { %v3347_v56 = vadd.f32 %v3346_v54, %v3345_v52  ;;  %v3418_v57 = vrot.slane %v3417_v55, 4 }
 0x41d   : > { %v3348_v58 = vrot.slane %v3347_v56, 2  ;;  %v3419_v59 = vadd.f32 %v3418_v57, %v3417_v55 }
 0x41f   : > { %v3349_v60 = vadd.f32 %v3348_v58, %v3347_v56  ;;  %v3420_v61 = vrot.slane %v3419_v59, 2 }
 0x421   : > { %v3350_v62 = vrot.slane %v3349_v60, 1  ;;  %v3421_v63 = vadd.f32 %v3420_v61, %v3419_v59 }
 0x423   : > { %v3351_v1 = vadd.f32 %v3350_v62, %v3349_v60  ;;  %v3422_v2 = vrot.slane %v3421_v63, 1 }
 0x425   : > { %v3352_v4 = vadd.f32 %v3351_v1, %v3314_v0  ;;  %v3423_v5 = vadd.f32 %v3422_v2, %v3421_v63 }
 0x427   : > { %3353 = vst [vmem:[%s5499_s3] sm:$0x1] %v3352_v4  ;;  %v3424_v6 = vadd.f32 %v3423_v5, %v3354_v3 }
 0x429   : > { %3425 = vst [vmem:[%s5499_s3 + $0x1] sm:$0x1] %v3424_v6 }
 0x42a PF: > { %p11_p10 = scmp.ge.s32.totalorder %s3972_s16, 4   ;;  %s5500_s12 = smov %s3920_s13 }
 0x42b   : > { %s5501_s13 = smov %s3981_s19  ;;  %s5502_s14 = smov %s3972_s16 }
 0x42c   :  { %13 = sbr.rel (!%p11_p10) target bundleno = 2 (0x2), region = 121 }

</bundles_post_ra>
